<compile_context>
chip_gen: v5e
topology: v5e:2x2
jax: 0.10.0
libtpu: 0.0.40
codegen_flags: <defaults>
</compile_context>

<pallas_src>
import jax
import jax.numpy as jnp
from jax import lax
from jax.experimental import pallas as pl
from jax.experimental.pallas import tpu as pltpu


def _char_lstm_kernel(ids_ref, emb_proj_ref, whh_ref, wfc_ref, bfc_ref,
                      out_ref, onehot_sc, xproj_sc):
    """Single grid step == full forward pass for the whole (padded) batch.

    ids_ref      : (B*T,) int32 in SMEM (scalar prefetch), index b*T + t
    emb_proj_ref : (V, 4H)  embedding @ W_ih.T + (b_ih + b_hh), cols (i,f,o,g)
    whh_ref      : (H, 4H)  hidden->gates weight (pre-transposed, cols (i,f,o,g))
    wfc_ref      : (H, Op)  final linear weight (pre-transposed, cols padded)
    bfc_ref      : (1, Op)  final linear bias (padded)
    out_ref      : (Bp, Op) logits for the last timestep (padded batch/out)
    onehot_sc    : (T*Bp, V)  VMEM scratch: one-hot token matrix (time-major)
    xproj_sc     : (T*Bp, 4H) VMEM scratch: hoisted input projection
    """
    Bp = out_ref.shape[0]
    H = whh_ref.shape[0]
    V = emb_proj_ref.shape[0]
    T = xproj_sc.shape[0] // Bp
    B = ids_ref.shape[0] // T

    # --- Build one-hot token matrix from SMEM ids (padded rows stay zero) ----
    onehot_sc[...] = jnp.zeros_like(onehot_sc)
    lane_iota = lax.broadcasted_iota(jnp.int32, (1, V), 1)
    for t in range(T):                       # static, fully unrolled (T*B tiny)
        for b in range(B):
            tok = ids_ref[b * T + t]         # SMEM scalar load
            onehot_sc[pl.ds(t * Bp + b, 1), :] = (lane_iota == tok).astype(
                jnp.float32)

    # --- Hoisted input projection: ONE MXU matmul for the whole sequence -----
    # Bias is already folded into emb_proj (one-hot rows sum to 1).
    xproj_sc[...] = jnp.dot(onehot_sc[...], emb_proj_ref[...],
                            preferred_element_type=jnp.float32)   # (T*Bp, 4H)

    # --- Serial recurrence: only h @ W_hh + elementwise gates per step --------
    whh = whh_ref[...]                        # load once, resident across steps

    def step(t, carry):
        h, c = carry
        row = pl.multiple_of(t * Bp, Bp)      # vreg-aligned sublane slice
        gates = xproj_sc[pl.ds(row, Bp), :] + jnp.dot(
            h, whh, preferred_element_type=jnp.float32)           # (Bp, 4H)
        # Gate columns pre-permuted to (i, f, o, g): one contiguous sigmoid slab.
        sig = jax.nn.sigmoid(gates[:, :3 * H])                    # (Bp, 3H)
        g_g = jnp.tanh(gates[:, 3 * H:])                          # (Bp, H)
        i_g = sig[:, 0 * H:1 * H]
        f_g = sig[:, 1 * H:2 * H]
        o_g = sig[:, 2 * H:3 * H]
        c_new = f_g * c + i_g * g_g
        h_new = o_g * jnp.tanh(c_new)
        return h_new, c_new

    h0 = jnp.zeros((Bp, H), jnp.float32)
    c0 = jnp.zeros((Bp, H), jnp.float32)
    h_last, _ = lax.fori_loop(0, T, step, (h0, c0), unroll=True)

    # --- Fused final FC on the last hidden state (lane-dense padded store) ---
    out_ref[...] = (
        jnp.dot(h_last, wfc_ref[...], preferred_element_type=jnp.float32)
        + bfc_ref[...]
    ).astype(out_ref.dtype)


def prepare_params(params):
    """One-time parameter prep (hoisted out of the per-call forward path)."""
    H = params["w_hh"].shape[1]
    O = params["w_fc"].shape[0]
    # Gate-column permutation: PyTorch (i, f, g, o) -> kernel (i, f, o, g).
    perm = jnp.concatenate([jnp.arange(0, H), jnp.arange(H, 2 * H),
                            jnp.arange(3 * H, 4 * H), jnp.arange(2 * H, 3 * H)])
    emb_proj = (params["embedding"] @ params["w_ih"].T
                + params["b_ih"] + params["b_hh"])[:, perm]        # (V, 4H)
    whh_t = params["w_hh"].T[:, perm]                              # (H, 4H)
    Op = max(128, ((O + 127) // 128) * 128)                        # lane-dense out
    wfc_p = jnp.pad(params["w_fc"].T, ((0, 0), (0, Op - O)))       # (H, Op)
    bfc_p = jnp.pad(params["b_fc"], (0, Op - O)).reshape(1, Op)    # (1, Op)
    return {
        "emb_proj": emb_proj.astype(jnp.float32),
        "whh_t": whh_t.astype(jnp.float32),
        "wfc_p": wfc_p.astype(jnp.float32),
        "bfc_p": bfc_p.astype(jnp.float32),
        "out_size": O,
    }


def char_lstm_forward(x_ids, prep):
    """x_ids: int32 [B, T]. prep: output of prepare_params. Returns [B, O]."""
    B, T = x_ids.shape
    V, fourH = prep["emb_proj"].shape
    H = fourH // 4
    Op = prep["wfc_p"].shape[1]
    O = prep["out_size"]
    Bp = max(8, ((B + 7) // 8) * 8)            # pad batch to sublane multiple

    ids_flat = x_ids.reshape(-1).astype(jnp.int32)   # row-major: index b*T + t

    out = pl.pallas_call(
        _char_lstm_kernel,
        out_shape=jax.ShapeDtypeStruct((Bp, Op), jnp.float32),
        grid_spec=pltpu.PrefetchScalarGridSpec(
            num_scalar_prefetch=1,                   # ids -> SMEM
            grid=(1,),                               # single invocation
            in_specs=[
                pl.BlockSpec((V, fourH), lambda i, ids: (0, 0)),
                pl.BlockSpec((H, fourH), lambda i, ids: (0, 0)),
                pl.BlockSpec((H, Op), lambda i, ids: (0, 0)),
                pl.BlockSpec((1, Op), lambda i, ids: (0, 0)),
            ],
            out_specs=pl.BlockSpec((Bp, Op), lambda i, ids: (0, 0)),
            scratch_shapes=[
                pltpu.VMEM((T * Bp, V), jnp.float32),      # one-hot tokens
                pltpu.VMEM((T * Bp, fourH), jnp.float32),  # hoisted x projection
            ],
        ),
        compiler_params=pltpu.CompilerParams(
            dimension_semantics=("arbitrary",)),
    )(ids_flat, prep["emb_proj"], prep["whh_t"], prep["wfc_p"], prep["bfc_p"])
    return out[:B, :O]


def _reference_forward(x_ids, params):
    """Pure-JAX reference replicating nn.Embedding -> nn.LSTM -> nn.Linear."""
    emb = jnp.take(params["embedding"], x_ids, axis=0)  # (B, T, E)
    B, T, _ = emb.shape
    H = params["w_hh"].shape[1]
    h = jnp.zeros((B, H), jnp.float32)
    c = jnp.zeros((B, H), jnp.float32)
    for t in range(T):
        gates = (emb[:, t, :] @ params["w_ih"].T + params["b_ih"]
                 + h @ params["w_hh"].T + params["b_hh"])
        i_g = jax.nn.sigmoid(gates[:, 0 * H:1 * H])
        f_g = jax.nn.sigmoid(gates[:, 1 * H:2 * H])
        g_g = jnp.tanh(gates[:, 2 * H:3 * H])
        o_g = jax.nn.sigmoid(gates[:, 3 * H:4 * H])
        c = f_g * c + i_g * g_g
        h = o_g * jnp.tanh(c)
    return h @ params["w_fc"].T + params["b_fc"]


def init_params(key, vocab_size, embedding_dim, hidden_size, output_size):
    ks = jax.random.split(key, 7)
    bound = 1.0 / jnp.sqrt(hidden_size)
    u = lambda k, shp, b: jax.random.uniform(k, shp, jnp.float32, -b, b)
    return {
        "embedding": jax.random.normal(ks[0], (vocab_size, embedding_dim), jnp.float32),
        "w_ih": u(ks[1], (4 * hidden_size, embedding_dim), bound),
        "w_hh": u(ks[2], (4 * hidden_size, hidden_size), bound),
        "b_ih": u(ks[3], (4 * hidden_size,), bound),
        "b_hh": u(ks[4], (4 * hidden_size,), bound),
        "w_fc": u(ks[5], (output_size, hidden_size), bound),
        "b_fc": u(ks[6], (output_size,), bound),
    }


if __name__ == "__main__":
    # Module-consistent small shapes (num_hidden_layers=1 -> dropout inactive).
    VOCAB = 64          # stand-in for len(CHAR2ID): input_size == output_size
    EMB = 100           # embedding_dim default
    HIDDEN = 128        # hidden_size default (keeps gate slices lane-aligned)
    OUT = VOCAB
    B, T = 4, 8

    key = jax.random.PRNGKey(0)
    pkey, xkey = jax.random.split(key)
    params = init_params(pkey, VOCAB, EMB, HIDDEN, OUT)
    x_ids = jax.random.randint(xkey, (B, T), 0, VOCAB, dtype=jnp.int32)

    prep = prepare_params(params)           # one-time, hoisted out of forward
    logits = jax.block_until_ready(char_lstm_forward(x_ids, prep))
    ref = _reference_forward(x_ids, params)
    assert logits.shape == (B, OUT)
    assert jnp.max(jnp.abs(logits - ref)) < 1e-3, "mismatch vs pure-JAX reference"
    print("KERNEL_OK")
</pallas_src>

<mosaic_0001>
module attributes {stable_mosaic.version = 11 : i64} {
  func.func @_char_lstm_kernel(%arg0: i32, %arg1: memref<32xi32, #tpu.memory_space<smem>>, %arg2: memref<64x512xf32, #tpu.memory_space<vmem>>, %arg3: memref<128x512xf32, #tpu.memory_space<vmem>>, %arg4: memref<128x128xf32, #tpu.memory_space<vmem>>, %arg5: memref<1x128xf32, #tpu.memory_space<vmem>>, %arg6: memref<8x128xf32, #tpu.memory_space<vmem>>, %arg7: memref<64x64xf32, #tpu.memory_space<vmem>>, %arg8: memref<64x512xf32, #tpu.memory_space<vmem>>) attributes {dimension_semantics = [#tpu.dimension_semantics<arbitrary>], iteration_bounds = array<i64: 1>, scalar_prefetch = 1 : i64, scratch_operands = 2 : i64, tpu.core_type = #tpu.core_type<tc>, window_params = [{pipeline_mode = #tpu.pipeline_mode<synchronous>, transform_indices = @transform_0, window_bounds = array<i64: 64, 512>}, {pipeline_mode = #tpu.pipeline_mode<synchronous>, transform_indices = @transform_1, window_bounds = array<i64: 128, 512>}, {pipeline_mode = #tpu.pipeline_mode<synchronous>, transform_indices = @transform_2, window_bounds = array<i64: 128, 128>}, {pipeline_mode = #tpu.pipeline_mode<synchronous>, transform_indices = @transform_3, window_bounds = array<i64: 1, 128>}, {pipeline_mode = #tpu.pipeline_mode<synchronous>, transform_indices = @transform_4, window_bounds = array<i64: 8, 128>}]} {
    %cst = arith.constant 0.000000e+00 : f32
    %0 = vector.broadcast %cst : f32 to vector<64x64xf32>
    %c0 = arith.constant 0 : index
    %c0_0 = arith.constant 0 : index
    %1 = vector.load %arg7[%c0, %c0_0] : memref<64x64xf32, #tpu.memory_space<vmem>>, vector<64x64xf32>
    tpu.vector_store %arg7[%c0, %c0_0], %0 {strides = array<i32>} : memref<64x64xf32, #tpu.memory_space<vmem>>, vector<64x64xf32>,
    %2 = tpu.iota {dimensions = array<i32: 1>} : vector<1x64xi32>
    %c0_1 = arith.constant 0 : index
    %3 = memref.load %arg1[%c0_1] : memref<32xi32, #tpu.memory_space<smem>>
    %4 = vector.broadcast %3 : i32 to vector<1x64xi32>
    %5 = arith.cmpi eq, %2, %4 : vector<1x64xi32>
    %6 = arith.extui %5 : vector<1x64xi1> to vector<1x64xi32>
    %7 = arith.sitofp %6 : vector<1x64xi32> to vector<1x64xf32>
    %c0_2 = arith.constant 0 : index
    %c0_3 = arith.constant 0 : index
    %8 = vector.load %arg7[%c0_2, %c0_3] : memref<64x64xf32, #tpu.memory_space<vmem>>, vector<1x64xf32>
    tpu.vector_store %arg7[%c0_2, %c0_3], %7 {strides = array<i32>} : memref<64x64xf32, #tpu.memory_space<vmem>>, vector<1x64xf32>,
    %c8 = arith.constant 8 : index
    %9 = memref.load %arg1[%c8] : memref<32xi32, #tpu.memory_space<smem>>
    %10 = vector.broadcast %9 : i32 to vector<1x64xi32>
    %11 = arith.cmpi eq, %2, %10 : vector<1x64xi32>
    %12 = arith.extui %11 : vector<1x64xi1> to vector<1x64xi32>
    %13 = arith.sitofp %12 : vector<1x64xi32> to vector<1x64xf32>
    %c1 = arith.constant 1 : index
    %c0_4 = arith.constant 0 : index
    %14 = vector.load %arg7[%c1, %c0_4] : memref<64x64xf32, #tpu.memory_space<vmem>>, vector<1x64xf32>
    tpu.vector_store %arg7[%c1, %c0_4], %13 {strides = array<i32>} : memref<64x64xf32, #tpu.memory_space<vmem>>, vector<1x64xf32>,
    %c16 = arith.constant 16 : index
    %15 = memref.load %arg1[%c16] : memref<32xi32, #tpu.memory_space<smem>>
    %16 = vector.broadcast %15 : i32 to vector<1x64xi32>
    %17 = arith.cmpi eq, %2, %16 : vector<1x64xi32>
    %18 = arith.extui %17 : vector<1x64xi1> to vector<1x64xi32>
    %19 = arith.sitofp %18 : vector<1x64xi32> to vector<1x64xf32>
    %c2 = arith.constant 2 : index
    %c0_5 = arith.constant 0 : index
    %20 = vector.load %arg7[%c2, %c0_5] : memref<64x64xf32, #tpu.memory_space<vmem>>, vector<1x64xf32>
    tpu.vector_store %arg7[%c2, %c0_5], %19 {strides = array<i32>} : memref<64x64xf32, #tpu.memory_space<vmem>>, vector<1x64xf32>,
    %c24 = arith.constant 24 : index
    %21 = memref.load %arg1[%c24] : memref<32xi32, #tpu.memory_space<smem>>
    %22 = vector.broadcast %21 : i32 to vector<1x64xi32>
    %23 = arith.cmpi eq, %2, %22 : vector<1x64xi32>
    %24 = arith.extui %23 : vector<1x64xi1> to vector<1x64xi32>
    %25 = arith.sitofp %24 : vector<1x64xi32> to vector<1x64xf32>
    %c3 = arith.constant 3 : index
    %c0_6 = arith.constant 0 : index
    %26 = vector.load %arg7[%c3, %c0_6] : memref<64x64xf32, #tpu.memory_space<vmem>>, vector<1x64xf32>
    tpu.vector_store %arg7[%c3, %c0_6], %25 {strides = array<i32>} : memref<64x64xf32, #tpu.memory_space<vmem>>, vector<1x64xf32>,
    %c1_7 = arith.constant 1 : index
    %27 = memref.load %arg1[%c1_7] : memref<32xi32, #tpu.memory_space<smem>>
    %28 = vector.broadcast %27 : i32 to vector<1x64xi32>
    %29 = arith.cmpi eq, %2, %28 : vector<1x64xi32>
    %30 = arith.extui %29 : vector<1x64xi1> to vector<1x64xi32>
    %31 = arith.sitofp %30 : vector<1x64xi32> to vector<1x64xf32>
    %c8_8 = arith.constant 8 : index
    %c0_9 = arith.constant 0 : index
    %32 = vector.load %arg7[%c8_8, %c0_9] : memref<64x64xf32, #tpu.memory_space<vmem>>, vector<1x64xf32>
    tpu.vector_store %arg7[%c8_8, %c0_9], %31 {strides = array<i32>} : memref<64x64xf32, #tpu.memory_space<vmem>>, vector<1x64xf32>,
    %c9 = arith.constant 9 : index
    %33 = memref.load %arg1[%c9] : memref<32xi32, #tpu.memory_space<smem>>
    %34 = vector.broadcast %33 : i32 to vector<1x64xi32>
    %35 = arith.cmpi eq, %2, %34 : vector<1x64xi32>
    %36 = arith.extui %35 : vector<1x64xi1> to vector<1x64xi32>
    %37 = arith.sitofp %36 : vector<1x64xi32> to vector<1x64xf32>
    %c9_10 = arith.constant 9 : index
    %c0_11 = arith.constant 0 : index
    %38 = vector.load %arg7[%c9_10, %c0_11] : memref<64x64xf32, #tpu.memory_space<vmem>>, vector<1x64xf32>
    tpu.vector_store %arg7[%c9_10, %c0_11], %37 {strides = array<i32>} : memref<64x64xf32, #tpu.memory_space<vmem>>, vector<1x64xf32>,
    %c17 = arith.constant 17 : index
    %39 = memref.load %arg1[%c17] : memref<32xi32, #tpu.memory_space<smem>>
    %40 = vector.broadcast %39 : i32 to vector<1x64xi32>
    %41 = arith.cmpi eq, %2, %40 : vector<1x64xi32>
    %42 = arith.extui %41 : vector<1x64xi1> to vector<1x64xi32>
    %43 = arith.sitofp %42 : vector<1x64xi32> to vector<1x64xf32>
    %c10 = arith.constant 10 : index
    %c0_12 = arith.constant 0 : index
    %44 = vector.load %arg7[%c10, %c0_12] : memref<64x64xf32, #tpu.memory_space<vmem>>, vector<1x64xf32>
    tpu.vector_store %arg7[%c10, %c0_12], %43 {strides = array<i32>} : memref<64x64xf32, #tpu.memory_space<vmem>>, vector<1x64xf32>,
    %c25 = arith.constant 25 : index
    %45 = memref.load %arg1[%c25] : memref<32xi32, #tpu.memory_space<smem>>
    %46 = vector.broadcast %45 : i32 to vector<1x64xi32>
    %47 = arith.cmpi eq, %2, %46 : vector<1x64xi32>
    %48 = arith.extui %47 : vector<1x64xi1> to vector<1x64xi32>
    %49 = arith.sitofp %48 : vector<1x64xi32> to vector<1x64xf32>
    %c11 = arith.constant 11 : index
    %c0_13 = arith.constant 0 : index
    %50 = vector.load %arg7[%c11, %c0_13] : memref<64x64xf32, #tpu.memory_space<vmem>>, vector<1x64xf32>
    tpu.vector_store %arg7[%c11, %c0_13], %49 {strides = array<i32>} : memref<64x64xf32, #tpu.memory_space<vmem>>, vector<1x64xf32>,
    %c2_14 = arith.constant 2 : index
    %51 = memref.load %arg1[%c2_14] : memref<32xi32, #tpu.memory_space<smem>>
    %52 = vector.broadcast %51 : i32 to vector<1x64xi32>
    %53 = arith.cmpi eq, %2, %52 : vector<1x64xi32>
    %54 = arith.extui %53 : vector<1x64xi1> to vector<1x64xi32>
    %55 = arith.sitofp %54 : vector<1x64xi32> to vector<1x64xf32>
    %c16_15 = arith.constant 16 : index
    %c0_16 = arith.constant 0 : index
    %56 = vector.load %arg7[%c16_15, %c0_16] : memref<64x64xf32, #tpu.memory_space<vmem>>, vector<1x64xf32>
    tpu.vector_store %arg7[%c16_15, %c0_16], %55 {strides = array<i32>} : memref<64x64xf32, #tpu.memory_space<vmem>>, vector<1x64xf32>,
    %c10_17 = arith.constant 10 : index
    %57 = memref.load %arg1[%c10_17] : memref<32xi32, #tpu.memory_space<smem>>
    %58 = vector.broadcast %57 : i32 to vector<1x64xi32>
    %59 = arith.cmpi eq, %2, %58 : vector<1x64xi32>
    %60 = arith.extui %59 : vector<1x64xi1> to vector<1x64xi32>
    %61 = arith.sitofp %60 : vector<1x64xi32> to vector<1x64xf32>
    %c17_18 = arith.constant 17 : index
    %c0_19 = arith.constant 0 : index
    %62 = vector.load %arg7[%c17_18, %c0_19] : memref<64x64xf32, #tpu.memory_space<vmem>>, vector<1x64xf32>
    tpu.vector_store %arg7[%c17_18, %c0_19], %61 {strides = array<i32>} : memref<64x64xf32, #tpu.memory_space<vmem>>, vector<1x64xf32>,
    %c18 = arith.constant 18 : index
    %63 = memref.load %arg1[%c18] : memref<32xi32, #tpu.memory_space<smem>>
    %64 = vector.broadcast %63 : i32 to vector<1x64xi32>
    %65 = arith.cmpi eq, %2, %64 : vector<1x64xi32>
    %66 = arith.extui %65 : vector<1x64xi1> to vector<1x64xi32>
    %67 = arith.sitofp %66 : vector<1x64xi32> to vector<1x64xf32>
    %c18_20 = arith.constant 18 : index
    %c0_21 = arith.constant 0 : index
    %68 = vector.load %arg7[%c18_20, %c0_21] : memref<64x64xf32, #tpu.memory_space<vmem>>, vector<1x64xf32>
    tpu.vector_store %arg7[%c18_20, %c0_21], %67 {strides = array<i32>} : memref<64x64xf32, #tpu.memory_space<vmem>>, vector<1x64xf32>,
    %c26 = arith.constant 26 : index
    %69 = memref.load %arg1[%c26] : memref<32xi32, #tpu.memory_space<smem>>
    %70 = vector.broadcast %69 : i32 to vector<1x64xi32>
    %71 = arith.cmpi eq, %2, %70 : vector<1x64xi32>
    %72 = arith.extui %71 : vector<1x64xi1> to vector<1x64xi32>
    %73 = arith.sitofp %72 : vector<1x64xi32> to vector<1x64xf32>
    %c19 = arith.constant 19 : index
    %c0_22 = arith.constant 0 : index
    %74 = vector.load %arg7[%c19, %c0_22] : memref<64x64xf32, #tpu.memory_space<vmem>>, vector<1x64xf32>
    tpu.vector_store %arg7[%c19, %c0_22], %73 {strides = array<i32>} : memref<64x64xf32, #tpu.memory_space<vmem>>, vector<1x64xf32>,
    %c3_23 = arith.constant 3 : index
    %75 = memref.load %arg1[%c3_23] : memref<32xi32, #tpu.memory_space<smem>>
    %76 = vector.broadcast %75 : i32 to vector<1x64xi32>
    %77 = arith.cmpi eq, %2, %76 : vector<1x64xi32>
    %78 = arith.extui %77 : vector<1x64xi1> to vector<1x64xi32>
    %79 = arith.sitofp %78 : vector<1x64xi32> to vector<1x64xf32>
    %c24_24 = arith.constant 24 : index
    %c0_25 = arith.constant 0 : index
    %80 = vector.load %arg7[%c24_24, %c0_25] : memref<64x64xf32, #tpu.memory_space<vmem>>, vector<1x64xf32>
    tpu.vector_store %arg7[%c24_24, %c0_25], %79 {strides = array<i32>} : memref<64x64xf32, #tpu.memory_space<vmem>>, vector<1x64xf32>,
    %c11_26 = arith.constant 11 : index
    %81 = memref.load %arg1[%c11_26] : memref<32xi32, #tpu.memory_space<smem>>
    %82 = vector.broadcast %81 : i32 to vector<1x64xi32>
    %83 = arith.cmpi eq, %2, %82 : vector<1x64xi32>
    %84 = arith.extui %83 : vector<1x64xi1> to vector<1x64xi32>
    %85 = arith.sitofp %84 : vector<1x64xi32> to vector<1x64xf32>
    %c25_27 = arith.constant 25 : index
    %c0_28 = arith.constant 0 : index
    %86 = vector.load %arg7[%c25_27, %c0_28] : memref<64x64xf32, #tpu.memory_space<vmem>>, vector<1x64xf32>
    tpu.vector_store %arg7[%c25_27, %c0_28], %85 {strides = array<i32>} : memref<64x64xf32, #tpu.memory_space<vmem>>, vector<1x64xf32>,
    %c19_29 = arith.constant 19 : index
    %87 = memref.load %arg1[%c19_29] : memref<32xi32, #tpu.memory_space<smem>>
    %88 = vector.broadcast %87 : i32 to vector<1x64xi32>
    %89 = arith.cmpi eq, %2, %88 : vector<1x64xi32>
    %90 = arith.extui %89 : vector<1x64xi1> to vector<1x64xi32>
    %91 = arith.sitofp %90 : vector<1x64xi32> to vector<1x64xf32>
    %c26_30 = arith.constant 26 : index
    %c0_31 = arith.constant 0 : index
    %92 = vector.load %arg7[%c26_30, %c0_31] : memref<64x64xf32, #tpu.memory_space<vmem>>, vector<1x64xf32>
    tpu.vector_store %arg7[%c26_30, %c0_31], %91 {strides = array<i32>} : memref<64x64xf32, #tpu.memory_space<vmem>>, vector<1x64xf32>,
    %c27 = arith.constant 27 : index
    %93 = memref.load %arg1[%c27] : memref<32xi32, #tpu.memory_space<smem>>
    %94 = vector.broadcast %93 : i32 to vector<1x64xi32>
    %95 = arith.cmpi eq, %2, %94 : vector<1x64xi32>
    %96 = arith.extui %95 : vector<1x64xi1> to vector<1x64xi32>
    %97 = arith.sitofp %96 : vector<1x64xi32> to vector<1x64xf32>
    %c27_32 = arith.constant 27 : index
    %c0_33 = arith.constant 0 : index
    %98 = vector.load %arg7[%c27_32, %c0_33] : memref<64x64xf32, #tpu.memory_space<vmem>>, vector<1x64xf32>
    tpu.vector_store %arg7[%c27_32, %c0_33], %97 {strides = array<i32>} : memref<64x64xf32, #tpu.memory_space<vmem>>, vector<1x64xf32>,
    %c4 = arith.constant 4 : index
    %99 = memref.load %arg1[%c4] : memref<32xi32, #tpu.memory_space<smem>>
    %100 = vector.broadcast %99 : i32 to vector<1x64xi32>
    %101 = arith.cmpi eq, %2, %100 : vector<1x64xi32>
    %102 = arith.extui %101 : vector<1x64xi1> to vector<1x64xi32>
    %103 = arith.sitofp %102 : vector<1x64xi32> to vector<1x64xf32>
    %c32 = arith.constant 32 : index
    %c0_34 = arith.constant 0 : index
    %104 = vector.load %arg7[%c32, %c0_34] : memref<64x64xf32, #tpu.memory_space<vmem>>, vector<1x64xf32>
    tpu.vector_store %arg7[%c32, %c0_34], %103 {strides = array<i32>} : memref<64x64xf32, #tpu.memory_space<vmem>>, vector<1x64xf32>,
    %c12 = arith.constant 12 : index
    %105 = memref.load %arg1[%c12] : memref<32xi32, #tpu.memory_space<smem>>
    %106 = vector.broadcast %105 : i32 to vector<1x64xi32>
    %107 = arith.cmpi eq, %2, %106 : vector<1x64xi32>
    %108 = arith.extui %107 : vector<1x64xi1> to vector<1x64xi32>
    %109 = arith.sitofp %108 : vector<1x64xi32> to vector<1x64xf32>
    %c33 = arith.constant 33 : index
    %c0_35 = arith.constant 0 : index
    %110 = vector.load %arg7[%c33, %c0_35] : memref<64x64xf32, #tpu.memory_space<vmem>>, vector<1x64xf32>
    tpu.vector_store %arg7[%c33, %c0_35], %109 {strides = array<i32>} : memref<64x64xf32, #tpu.memory_space<vmem>>, vector<1x64xf32>,
    %c20 = arith.constant 20 : index
    %111 = memref.load %arg1[%c20] : memref<32xi32, #tpu.memory_space<smem>>
    %112 = vector.broadcast %111 : i32 to vector<1x64xi32>
    %113 = arith.cmpi eq, %2, %112 : vector<1x64xi32>
    %114 = arith.extui %113 : vector<1x64xi1> to vector<1x64xi32>
    %115 = arith.sitofp %114 : vector<1x64xi32> to vector<1x64xf32>
    %c34 = arith.constant 34 : index
    %c0_36 = arith.constant 0 : index
    %116 = vector.load %arg7[%c34, %c0_36] : memref<64x64xf32, #tpu.memory_space<vmem>>, vector<1x64xf32>
    tpu.vector_store %arg7[%c34, %c0_36], %115 {strides = array<i32>} : memref<64x64xf32, #tpu.memory_space<vmem>>, vector<1x64xf32>,
    %c28 = arith.constant 28 : index
    %117 = memref.load %arg1[%c28] : memref<32xi32, #tpu.memory_space<smem>>
    %118 = vector.broadcast %117 : i32 to vector<1x64xi32>
    %119 = arith.cmpi eq, %2, %118 : vector<1x64xi32>
    %120 = arith.extui %119 : vector<1x64xi1> to vector<1x64xi32>
    %121 = arith.sitofp %120 : vector<1x64xi32> to vector<1x64xf32>
    %c35 = arith.constant 35 : index
    %c0_37 = arith.constant 0 : index
    %122 = vector.load %arg7[%c35, %c0_37] : memref<64x64xf32, #tpu.memory_space<vmem>>, vector<1x64xf32>
    tpu.vector_store %arg7[%c35, %c0_37], %121 {strides = array<i32>} : memref<64x64xf32, #tpu.memory_space<vmem>>, vector<1x64xf32>,
    %c5 = arith.constant 5 : index
    %123 = memref.load %arg1[%c5] : memref<32xi32, #tpu.memory_space<smem>>
    %124 = vector.broadcast %123 : i32 to vector<1x64xi32>
    %125 = arith.cmpi eq, %2, %124 : vector<1x64xi32>
    %126 = arith.extui %125 : vector<1x64xi1> to vector<1x64xi32>
    %127 = arith.sitofp %126 : vector<1x64xi32> to vector<1x64xf32>
    %c40 = arith.constant 40 : index
    %c0_38 = arith.constant 0 : index
    %128 = vector.load %arg7[%c40, %c0_38] : memref<64x64xf32, #tpu.memory_space<vmem>>, vector<1x64xf32>
    tpu.vector_store %arg7[%c40, %c0_38], %127 {strides = array<i32>} : memref<64x64xf32, #tpu.memory_space<vmem>>, vector<1x64xf32>,
    %c13 = arith.constant 13 : index
    %129 = memref.load %arg1[%c13] : memref<32xi32, #tpu.memory_space<smem>>
    %130 = vector.broadcast %129 : i32 to vector<1x64xi32>
    %131 = arith.cmpi eq, %2, %130 : vector<1x64xi32>
    %132 = arith.extui %131 : vector<1x64xi1> to vector<1x64xi32>
    %133 = arith.sitofp %132 : vector<1x64xi32> to vector<1x64xf32>
    %c41 = arith.constant 41 : index
    %c0_39 = arith.constant 0 : index
    %134 = vector.load %arg7[%c41, %c0_39] : memref<64x64xf32, #tpu.memory_space<vmem>>, vector<1x64xf32>
    tpu.vector_store %arg7[%c41, %c0_39], %133 {strides = array<i32>} : memref<64x64xf32, #tpu.memory_space<vmem>>, vector<1x64xf32>,
    %c21 = arith.constant 21 : index
    %135 = memref.load %arg1[%c21] : memref<32xi32, #tpu.memory_space<smem>>
    %136 = vector.broadcast %135 : i32 to vector<1x64xi32>
    %137 = arith.cmpi eq, %2, %136 : vector<1x64xi32>
    %138 = arith.extui %137 : vector<1x64xi1> to vector<1x64xi32>
    %139 = arith.sitofp %138 : vector<1x64xi32> to vector<1x64xf32>
    %c42 = arith.constant 42 : index
    %c0_40 = arith.constant 0 : index
    %140 = vector.load %arg7[%c42, %c0_40] : memref<64x64xf32, #tpu.memory_space<vmem>>, vector<1x64xf32>
    tpu.vector_store %arg7[%c42, %c0_40], %139 {strides = array<i32>} : memref<64x64xf32, #tpu.memory_space<vmem>>, vector<1x64xf32>,
    %c29 = arith.constant 29 : index
    %141 = memref.load %arg1[%c29] : memref<32xi32, #tpu.memory_space<smem>>
    %142 = vector.broadcast %141 : i32 to vector<1x64xi32>
    %143 = arith.cmpi eq, %2, %142 : vector<1x64xi32>
    %144 = arith.extui %143 : vector<1x64xi1> to vector<1x64xi32>
    %145 = arith.sitofp %144 : vector<1x64xi32> to vector<1x64xf32>
    %c43 = arith.constant 43 : index
    %c0_41 = arith.constant 0 : index
    %146 = vector.load %arg7[%c43, %c0_41] : memref<64x64xf32, #tpu.memory_space<vmem>>, vector<1x64xf32>
    tpu.vector_store %arg7[%c43, %c0_41], %145 {strides = array<i32>} : memref<64x64xf32, #tpu.memory_space<vmem>>, vector<1x64xf32>,
    %c6 = arith.constant 6 : index
    %147 = memref.load %arg1[%c6] : memref<32xi32, #tpu.memory_space<smem>>
    %148 = vector.broadcast %147 : i32 to vector<1x64xi32>
    %149 = arith.cmpi eq, %2, %148 : vector<1x64xi32>
    %150 = arith.extui %149 : vector<1x64xi1> to vector<1x64xi32>
    %151 = arith.sitofp %150 : vector<1x64xi32> to vector<1x64xf32>
    %c48 = arith.constant 48 : index
    %c0_42 = arith.constant 0 : index
    %152 = vector.load %arg7[%c48, %c0_42] : memref<64x64xf32, #tpu.memory_space<vmem>>, vector<1x64xf32>
    tpu.vector_store %arg7[%c48, %c0_42], %151 {strides = array<i32>} : memref<64x64xf32, #tpu.memory_space<vmem>>, vector<1x64xf32>,
    %c14 = arith.constant 14 : index
    %153 = memref.load %arg1[%c14] : memref<32xi32, #tpu.memory_space<smem>>
    %154 = vector.broadcast %153 : i32 to vector<1x64xi32>
    %155 = arith.cmpi eq, %2, %154 : vector<1x64xi32>
    %156 = arith.extui %155 : vector<1x64xi1> to vector<1x64xi32>
    %157 = arith.sitofp %156 : vector<1x64xi32> to vector<1x64xf32>
    %c49 = arith.constant 49 : index
    %c0_43 = arith.constant 0 : index
    %158 = vector.load %arg7[%c49, %c0_43] : memref<64x64xf32, #tpu.memory_space<vmem>>, vector<1x64xf32>
    tpu.vector_store %arg7[%c49, %c0_43], %157 {strides = array<i32>} : memref<64x64xf32, #tpu.memory_space<vmem>>, vector<1x64xf32>,
    %c22 = arith.constant 22 : index
    %159 = memref.load %arg1[%c22] : memref<32xi32, #tpu.memory_space<smem>>
    %160 = vector.broadcast %159 : i32 to vector<1x64xi32>
    %161 = arith.cmpi eq, %2, %160 : vector<1x64xi32>
    %162 = arith.extui %161 : vector<1x64xi1> to vector<1x64xi32>
    %163 = arith.sitofp %162 : vector<1x64xi32> to vector<1x64xf32>
    %c50 = arith.constant 50 : index
    %c0_44 = arith.constant 0 : index
    %164 = vector.load %arg7[%c50, %c0_44] : memref<64x64xf32, #tpu.memory_space<vmem>>, vector<1x64xf32>
    tpu.vector_store %arg7[%c50, %c0_44], %163 {strides = array<i32>} : memref<64x64xf32, #tpu.memory_space<vmem>>, vector<1x64xf32>,
    %c30 = arith.constant 30 : index
    %165 = memref.load %arg1[%c30] : memref<32xi32, #tpu.memory_space<smem>>
    %166 = vector.broadcast %165 : i32 to vector<1x64xi32>
    %167 = arith.cmpi eq, %2, %166 : vector<1x64xi32>
    %168 = arith.extui %167 : vector<1x64xi1> to vector<1x64xi32>
    %169 = arith.sitofp %168 : vector<1x64xi32> to vector<1x64xf32>
    %c51 = arith.constant 51 : index
    %c0_45 = arith.constant 0 : index
    %170 = vector.load %arg7[%c51, %c0_45] : memref<64x64xf32, #tpu.memory_space<vmem>>, vector<1x64xf32>
    tpu.vector_store %arg7[%c51, %c0_45], %169 {strides = array<i32>} : memref<64x64xf32, #tpu.memory_space<vmem>>, vector<1x64xf32>,
    %c7 = arith.constant 7 : index
    %171 = memref.load %arg1[%c7] : memref<32xi32, #tpu.memory_space<smem>>
    %172 = vector.broadcast %171 : i32 to vector<1x64xi32>
    %173 = arith.cmpi eq, %2, %172 : vector<1x64xi32>
    %174 = arith.extui %173 : vector<1x64xi1> to vector<1x64xi32>
    %175 = arith.sitofp %174 : vector<1x64xi32> to vector<1x64xf32>
    %c56 = arith.constant 56 : index
    %c0_46 = arith.constant 0 : index
    %176 = vector.load %arg7[%c56, %c0_46] : memref<64x64xf32, #tpu.memory_space<vmem>>, vector<1x64xf32>
    tpu.vector_store %arg7[%c56, %c0_46], %175 {strides = array<i32>} : memref<64x64xf32, #tpu.memory_space<vmem>>, vector<1x64xf32>,
    %c15 = arith.constant 15 : index
    %177 = memref.load %arg1[%c15] : memref<32xi32, #tpu.memory_space<smem>>
    %178 = vector.broadcast %177 : i32 to vector<1x64xi32>
    %179 = arith.cmpi eq, %2, %178 : vector<1x64xi32>
    %180 = arith.extui %179 : vector<1x64xi1> to vector<1x64xi32>
    %181 = arith.sitofp %180 : vector<1x64xi32> to vector<1x64xf32>
    %c57 = arith.constant 57 : index
    %c0_47 = arith.constant 0 : index
    %182 = vector.load %arg7[%c57, %c0_47] : memref<64x64xf32, #tpu.memory_space<vmem>>, vector<1x64xf32>
    tpu.vector_store %arg7[%c57, %c0_47], %181 {strides = array<i32>} : memref<64x64xf32, #tpu.memory_space<vmem>>, vector<1x64xf32>,
    %c23 = arith.constant 23 : index
    %183 = memref.load %arg1[%c23] : memref<32xi32, #tpu.memory_space<smem>>
    %184 = vector.broadcast %183 : i32 to vector<1x64xi32>
    %185 = arith.cmpi eq, %2, %184 : vector<1x64xi32>
    %186 = arith.extui %185 : vector<1x64xi1> to vector<1x64xi32>
    %187 = arith.sitofp %186 : vector<1x64xi32> to vector<1x64xf32>
    %c58 = arith.constant 58 : index
    %c0_48 = arith.constant 0 : index
    %188 = vector.load %arg7[%c58, %c0_48] : memref<64x64xf32, #tpu.memory_space<vmem>>, vector<1x64xf32>
    tpu.vector_store %arg7[%c58, %c0_48], %187 {strides = array<i32>} : memref<64x64xf32, #tpu.memory_space<vmem>>, vector<1x64xf32>,
    %c31 = arith.constant 31 : index
    %189 = memref.load %arg1[%c31] : memref<32xi32, #tpu.memory_space<smem>>
    %190 = vector.broadcast %189 : i32 to vector<1x64xi32>
    %191 = arith.cmpi eq, %2, %190 : vector<1x64xi32>
    %192 = arith.extui %191 : vector<1x64xi1> to vector<1x64xi32>
    %193 = arith.sitofp %192 : vector<1x64xi32> to vector<1x64xf32>
    %c59 = arith.constant 59 : index
    %c0_49 = arith.constant 0 : index
    %194 = vector.load %arg7[%c59, %c0_49] : memref<64x64xf32, #tpu.memory_space<vmem>>, vector<1x64xf32>
    tpu.vector_store %arg7[%c59, %c0_49], %193 {strides = array<i32>} : memref<64x64xf32, #tpu.memory_space<vmem>>, vector<1x64xf32>,
    %c0_50 = arith.constant 0 : index
    %c0_51 = arith.constant 0 : index
    %195 = vector.load %arg7[%c0_50, %c0_51] : memref<64x64xf32, #tpu.memory_space<vmem>>, vector<64x64xf32>
    %c0_52 = arith.constant 0 : index
    %c0_53 = arith.constant 0 : index
    %196 = vector.load %arg2[%c0_52, %c0_53] : memref<64x512xf32, #tpu.memory_space<vmem>>, vector<64x512xf32>
    %cst_54 = arith.constant dense<0.000000e+00> : vector<64x512xf32>
    %197 = tpu.matmul %195, %196, %cst_54 {dimension_numbers = #tpu.dot_dimension_numbers<[1], [0], [0], [1], [0, 0, 1, 1], [], []>} : vector<64x64xf32>, vector<64x512xf32>, vector<64x512xf32> -> vector<64x512xf32>
    %c0_55 = arith.constant 0 : index
    %c0_56 = arith.constant 0 : index
    %198 = vector.load %arg8[%c0_55, %c0_56] : memref<64x512xf32, #tpu.memory_space<vmem>>, vector<64x512xf32>
    tpu.vector_store %arg8[%c0_55, %c0_56], %197 {strides = array<i32>} : memref<64x512xf32, #tpu.memory_space<vmem>>, vector<64x512xf32>,
    %c0_57 = arith.constant 0 : index
    %c0_58 = arith.constant 0 : index
    %199 = vector.load %arg3[%c0_57, %c0_58] : memref<128x512xf32, #tpu.memory_space<vmem>>, vector<128x512xf32>
    %cst_59 = arith.constant 0.000000e+00 : f32
    %200 = vector.broadcast %cst_59 : f32 to vector<8x128xf32>
    %cst_60 = arith.constant 0.000000e+00 : f32
    %201 = vector.broadcast %cst_60 : f32 to vector<8x128xf32>
    %c0_i32 = arith.constant 0 : i32
    %c8_i32 = arith.constant 8 : i32
    %202 = arith.muli %c0_i32, %c8_i32 : i32
    %203 = tpu.assume_multiple %202, 8 : i32
    %204 = arith.index_cast %203 : i32 to index
    %c0_61 = arith.constant 0 : index
    %205 = vector.load %arg8[%204, %c0_61] : memref<64x512xf32, #tpu.memory_space<vmem>>, vector<8x512xf32>
    %cst_62 = arith.constant dense<0.000000e+00> : vector<8x512xf32>
    %206 = tpu.matmul %200, %199, %cst_62 {dimension_numbers = #tpu.dot_dimension_numbers<[1], [0], [0], [1], [0, 0, 1, 1], [], []>} : vector<8x128xf32>, vector<128x512xf32>, vector<8x512xf32> -> vector<8x512xf32>
    %207 = arith.addf %205, %206 : vector<8x512xf32>
    %208 = vector.extract_strided_slice %207 {offsets = [0, 0], sizes = [8, 384], strides = [1, 1]} : vector<8x512xf32> to vector<8x384xf32>
    %209 = arith.negf %208 : vector<8x384xf32>
    %210 = math.exp %209 : vector<8x384xf32>
    %cst_63 = arith.constant 1.000000e+00 : f32
    %211 = vector.broadcast %cst_63 : f32 to vector<8x384xf32>
    %212 = arith.addf %211, %210 : vector<8x384xf32>
    %213 = arith.divf %211, %212 : vector<8x384xf32>
    %214 = vector.extract_strided_slice %207 {offsets = [0, 384], sizes = [8, 128], strides = [1, 1]} : vector<8x512xf32> to vector<8x128xf32>
    %215 = math.tanh %214 : vector<8x128xf32>
    %216 = vector.extract_strided_slice %213 {offsets = [0, 0], sizes = [8, 128], strides = [1, 1]} : vector<8x384xf32> to vector<8x128xf32>
    %217 = vector.extract_strided_slice %213 {offsets = [0, 128], sizes = [8, 128], strides = [1, 1]} : vector<8x384xf32> to vector<8x128xf32>
    %218 = vector.extract_strided_slice %213 {offsets = [0, 256], sizes = [8, 128], strides = [1, 1]} : vector<8x384xf32> to vector<8x128xf32>
    %219 = arith.mulf %217, %201 : vector<8x128xf32>
    %220 = arith.mulf %216, %215 : vector<8x128xf32>
    %221 = arith.addf %219, %220 : vector<8x128xf32>
    %222 = math.tanh %221 : vector<8x128xf32>
    %223 = arith.mulf %218, %222 : vector<8x128xf32>
    %c1_i32 = arith.constant 1 : i32
    %c8_i32_64 = arith.constant 8 : i32
    %224 = arith.muli %c1_i32, %c8_i32_64 : i32
    %225 = tpu.assume_multiple %224, 8 : i32
    %226 = arith.index_cast %225 : i32 to index
    %c0_65 = arith.constant 0 : index
    %227 = vector.load %arg8[%226, %c0_65] : memref<64x512xf32, #tpu.memory_space<vmem>>, vector<8x512xf32>
    %cst_66 = arith.constant dense<0.000000e+00> : vector<8x512xf32>
    %228 = tpu.matmul %223, %199, %cst_66 {dimension_numbers = #tpu.dot_dimension_numbers<[1], [0], [0], [1], [0, 0, 1, 1], [], []>} : vector<8x128xf32>, vector<128x512xf32>, vector<8x512xf32> -> vector<8x512xf32>
    %229 = arith.addf %227, %228 : vector<8x512xf32>
    %230 = vector.extract_strided_slice %229 {offsets = [0, 0], sizes = [8, 384], strides = [1, 1]} : vector<8x512xf32> to vector<8x384xf32>
    %231 = arith.negf %230 : vector<8x384xf32>
    %232 = math.exp %231 : vector<8x384xf32>
    %cst_67 = arith.constant 1.000000e+00 : f32
    %233 = vector.broadcast %cst_67 : f32 to vector<8x384xf32>
    %234 = arith.addf %233, %232 : vector<8x384xf32>
    %235 = arith.divf %233, %234 : vector<8x384xf32>
    %236 = vector.extract_strided_slice %229 {offsets = [0, 384], sizes = [8, 128], strides = [1, 1]} : vector<8x512xf32> to vector<8x128xf32>
    %237 = math.tanh %236 : vector<8x128xf32>
    %238 = vector.extract_strided_slice %235 {offsets = [0, 0], sizes = [8, 128], strides = [1, 1]} : vector<8x384xf32> to vector<8x128xf32>
    %239 = vector.extract_strided_slice %235 {offsets = [0, 128], sizes = [8, 128], strides = [1, 1]} : vector<8x384xf32> to vector<8x128xf32>
    %240 = vector.extract_strided_slice %235 {offsets = [0, 256], sizes = [8, 128], strides = [1, 1]} : vector<8x384xf32> to vector<8x128xf32>
    %241 = arith.mulf %239, %221 : vector<8x128xf32>
    %242 = arith.mulf %238, %237 : vector<8x128xf32>
    %243 = arith.addf %241, %242 : vector<8x128xf32>
    %244 = math.tanh %243 : vector<8x128xf32>
    %245 = arith.mulf %240, %244 : vector<8x128xf32>
    %c2_i32 = arith.constant 2 : i32
    %c8_i32_68 = arith.constant 8 : i32
    %246 = arith.muli %c2_i32, %c8_i32_68 : i32
    %247 = tpu.assume_multiple %246, 8 : i32
    %248 = arith.index_cast %247 : i32 to index
    %c0_69 = arith.constant 0 : index
    %249 = vector.load %arg8[%248, %c0_69] : memref<64x512xf32, #tpu.memory_space<vmem>>, vector<8x512xf32>
    %cst_70 = arith.constant dense<0.000000e+00> : vector<8x512xf32>
    %250 = tpu.matmul %245, %199, %cst_70 {dimension_numbers = #tpu.dot_dimension_numbers<[1], [0], [0], [1], [0, 0, 1, 1], [], []>} : vector<8x128xf32>, vector<128x512xf32>, vector<8x512xf32> -> vector<8x512xf32>
    %251 = arith.addf %249, %250 : vector<8x512xf32>
    %252 = vector.extract_strided_slice %251 {offsets = [0, 0], sizes = [8, 384], strides = [1, 1]} : vector<8x512xf32> to vector<8x384xf32>
    %253 = arith.negf %252 : vector<8x384xf32>
    %254 = math.exp %253 : vector<8x384xf32>
    %cst_71 = arith.constant 1.000000e+00 : f32
    %255 = vector.broadcast %cst_71 : f32 to vector<8x384xf32>
    %256 = arith.addf %255, %254 : vector<8x384xf32>
    %257 = arith.divf %255, %256 : vector<8x384xf32>
    %258 = vector.extract_strided_slice %251 {offsets = [0, 384], sizes = [8, 128], strides = [1, 1]} : vector<8x512xf32> to vector<8x128xf32>
    %259 = math.tanh %258 : vector<8x128xf32>
    %260 = vector.extract_strided_slice %257 {offsets = [0, 0], sizes = [8, 128], strides = [1, 1]} : vector<8x384xf32> to vector<8x128xf32>
    %261 = vector.extract_strided_slice %257 {offsets = [0, 128], sizes = [8, 128], strides = [1, 1]} : vector<8x384xf32> to vector<8x128xf32>
    %262 = vector.extract_strided_slice %257 {offsets = [0, 256], sizes = [8, 128], strides = [1, 1]} : vector<8x384xf32> to vector<8x128xf32>
    %263 = arith.mulf %261, %243 : vector<8x128xf32>
    %264 = arith.mulf %260, %259 : vector<8x128xf32>
    %265 = arith.addf %263, %264 : vector<8x128xf32>
    %266 = math.tanh %265 : vector<8x128xf32>
    %267 = arith.mulf %262, %266 : vector<8x128xf32>
    %c3_i32 = arith.constant 3 : i32
    %c8_i32_72 = arith.constant 8 : i32
    %268 = arith.muli %c3_i32, %c8_i32_72 : i32
    %269 = tpu.assume_multiple %268, 8 : i32
    %270 = arith.index_cast %269 : i32 to index
    %c0_73 = arith.constant 0 : index
    %271 = vector.load %arg8[%270, %c0_73] : memref<64x512xf32, #tpu.memory_space<vmem>>, vector<8x512xf32>
    %cst_74 = arith.constant dense<0.000000e+00> : vector<8x512xf32>
    %272 = tpu.matmul %267, %199, %cst_74 {dimension_numbers = #tpu.dot_dimension_numbers<[1], [0], [0], [1], [0, 0, 1, 1], [], []>} : vector<8x128xf32>, vector<128x512xf32>, vector<8x512xf32> -> vector<8x512xf32>
    %273 = arith.addf %271, %272 : vector<8x512xf32>
    %274 = vector.extract_strided_slice %273 {offsets = [0, 0], sizes = [8, 384], strides = [1, 1]} : vector<8x512xf32> to vector<8x384xf32>
    %275 = arith.negf %274 : vector<8x384xf32>
    %276 = math.exp %275 : vector<8x384xf32>
    %cst_75 = arith.constant 1.000000e+00 : f32
    %277 = vector.broadcast %cst_75 : f32 to vector<8x384xf32>
    %278 = arith.addf %277, %276 : vector<8x384xf32>
    %279 = arith.divf %277, %278 : vector<8x384xf32>
    %280 = vector.extract_strided_slice %273 {offsets = [0, 384], sizes = [8, 128], strides = [1, 1]} : vector<8x512xf32> to vector<8x128xf32>
    %281 = math.tanh %280 : vector<8x128xf32>
    %282 = vector.extract_strided_slice %279 {offsets = [0, 0], sizes = [8, 128], strides = [1, 1]} : vector<8x384xf32> to vector<8x128xf32>
    %283 = vector.extract_strided_slice %279 {offsets = [0, 128], sizes = [8, 128], strides = [1, 1]} : vector<8x384xf32> to vector<8x128xf32>
    %284 = vector.extract_strided_slice %279 {offsets = [0, 256], sizes = [8, 128], strides = [1, 1]} : vector<8x384xf32> to vector<8x128xf32>
    %285 = arith.mulf %283, %265 : vector<8x128xf32>
    %286 = arith.mulf %282, %281 : vector<8x128xf32>
    %287 = arith.addf %285, %286 : vector<8x128xf32>
    %288 = math.tanh %287 : vector<8x128xf32>
    %289 = arith.mulf %284, %288 : vector<8x128xf32>
    %c4_i32 = arith.constant 4 : i32
    %c8_i32_76 = arith.constant 8 : i32
    %290 = arith.muli %c4_i32, %c8_i32_76 : i32
    %291 = tpu.assume_multiple %290, 8 : i32
    %292 = arith.index_cast %291 : i32 to index
    %c0_77 = arith.constant 0 : index
    %293 = vector.load %arg8[%292, %c0_77] : memref<64x512xf32, #tpu.memory_space<vmem>>, vector<8x512xf32>
    %cst_78 = arith.constant dense<0.000000e+00> : vector<8x512xf32>
    %294 = tpu.matmul %289, %199, %cst_78 {dimension_numbers = #tpu.dot_dimension_numbers<[1], [0], [0], [1], [0, 0, 1, 1], [], []>} : vector<8x128xf32>, vector<128x512xf32>, vector<8x512xf32> -> vector<8x512xf32>
    %295 = arith.addf %293, %294 : vector<8x512xf32>
    %296 = vector.extract_strided_slice %295 {offsets = [0, 0], sizes = [8, 384], strides = [1, 1]} : vector<8x512xf32> to vector<8x384xf32>
    %297 = arith.negf %296 : vector<8x384xf32>
    %298 = math.exp %297 : vector<8x384xf32>
    %cst_79 = arith.constant 1.000000e+00 : f32
    %299 = vector.broadcast %cst_79 : f32 to vector<8x384xf32>
    %300 = arith.addf %299, %298 : vector<8x384xf32>
    %301 = arith.divf %299, %300 : vector<8x384xf32>
    %302 = vector.extract_strided_slice %295 {offsets = [0, 384], sizes = [8, 128], strides = [1, 1]} : vector<8x512xf32> to vector<8x128xf32>
    %303 = math.tanh %302 : vector<8x128xf32>
    %304 = vector.extract_strided_slice %301 {offsets = [0, 0], sizes = [8, 128], strides = [1, 1]} : vector<8x384xf32> to vector<8x128xf32>
    %305 = vector.extract_strided_slice %301 {offsets = [0, 128], sizes = [8, 128], strides = [1, 1]} : vector<8x384xf32> to vector<8x128xf32>
    %306 = vector.extract_strided_slice %301 {offsets = [0, 256], sizes = [8, 128], strides = [1, 1]} : vector<8x384xf32> to vector<8x128xf32>
    %307 = arith.mulf %305, %287 : vector<8x128xf32>
    %308 = arith.mulf %304, %303 : vector<8x128xf32>
    %309 = arith.addf %307, %308 : vector<8x128xf32>
    %310 = math.tanh %309 : vector<8x128xf32>
    %311 = arith.mulf %306, %310 : vector<8x128xf32>
    %c5_i32 = arith.constant 5 : i32
    %c8_i32_80 = arith.constant 8 : i32
    %312 = arith.muli %c5_i32, %c8_i32_80 : i32
    %313 = tpu.assume_multiple %312, 8 : i32
    %314 = arith.index_cast %313 : i32 to index
    %c0_81 = arith.constant 0 : index
    %315 = vector.load %arg8[%314, %c0_81] : memref<64x512xf32, #tpu.memory_space<vmem>>, vector<8x512xf32>
    %cst_82 = arith.constant dense<0.000000e+00> : vector<8x512xf32>
    %316 = tpu.matmul %311, %199, %cst_82 {dimension_numbers = #tpu.dot_dimension_numbers<[1], [0], [0], [1], [0, 0, 1, 1], [], []>} : vector<8x128xf32>, vector<128x512xf32>, vector<8x512xf32> -> vector<8x512xf32>
    %317 = arith.addf %315, %316 : vector<8x512xf32>
    %318 = vector.extract_strided_slice %317 {offsets = [0, 0], sizes = [8, 384], strides = [1, 1]} : vector<8x512xf32> to vector<8x384xf32>
    %319 = arith.negf %318 : vector<8x384xf32>
    %320 = math.exp %319 : vector<8x384xf32>
    %cst_83 = arith.constant 1.000000e+00 : f32
    %321 = vector.broadcast %cst_83 : f32 to vector<8x384xf32>
    %322 = arith.addf %321, %320 : vector<8x384xf32>
    %323 = arith.divf %321, %322 : vector<8x384xf32>
    %324 = vector.extract_strided_slice %317 {offsets = [0, 384], sizes = [8, 128], strides = [1, 1]} : vector<8x512xf32> to vector<8x128xf32>
    %325 = math.tanh %324 : vector<8x128xf32>
    %326 = vector.extract_strided_slice %323 {offsets = [0, 0], sizes = [8, 128], strides = [1, 1]} : vector<8x384xf32> to vector<8x128xf32>
    %327 = vector.extract_strided_slice %323 {offsets = [0, 128], sizes = [8, 128], strides = [1, 1]} : vector<8x384xf32> to vector<8x128xf32>
    %328 = vector.extract_strided_slice %323 {offsets = [0, 256], sizes = [8, 128], strides = [1, 1]} : vector<8x384xf32> to vector<8x128xf32>
    %329 = arith.mulf %327, %309 : vector<8x128xf32>
    %330 = arith.mulf %326, %325 : vector<8x128xf32>
    %331 = arith.addf %329, %330 : vector<8x128xf32>
    %332 = math.tanh %331 : vector<8x128xf32>
    %333 = arith.mulf %328, %332 : vector<8x128xf32>
    %c6_i32 = arith.constant 6 : i32
    %c8_i32_84 = arith.constant 8 : i32
    %334 = arith.muli %c6_i32, %c8_i32_84 : i32
    %335 = tpu.assume_multiple %334, 8 : i32
    %336 = arith.index_cast %335 : i32 to index
    %c0_85 = arith.constant 0 : index
    %337 = vector.load %arg8[%336, %c0_85] : memref<64x512xf32, #tpu.memory_space<vmem>>, vector<8x512xf32>
    %cst_86 = arith.constant dense<0.000000e+00> : vector<8x512xf32>
    %338 = tpu.matmul %333, %199, %cst_86 {dimension_numbers = #tpu.dot_dimension_numbers<[1], [0], [0], [1], [0, 0, 1, 1], [], []>} : vector<8x128xf32>, vector<128x512xf32>, vector<8x512xf32> -> vector<8x512xf32>
    %339 = arith.addf %337, %338 : vector<8x512xf32>
    %340 = vector.extract_strided_slice %339 {offsets = [0, 0], sizes = [8, 384], strides = [1, 1]} : vector<8x512xf32> to vector<8x384xf32>
    %341 = arith.negf %340 : vector<8x384xf32>
    %342 = math.exp %341 : vector<8x384xf32>
    %cst_87 = arith.constant 1.000000e+00 : f32
    %343 = vector.broadcast %cst_87 : f32 to vector<8x384xf32>
    %344 = arith.addf %343, %342 : vector<8x384xf32>
    %345 = arith.divf %343, %344 : vector<8x384xf32>
    %346 = vector.extract_strided_slice %339 {offsets = [0, 384], sizes = [8, 128], strides = [1, 1]} : vector<8x512xf32> to vector<8x128xf32>
    %347 = math.tanh %346 : vector<8x128xf32>
    %348 = vector.extract_strided_slice %345 {offsets = [0, 0], sizes = [8, 128], strides = [1, 1]} : vector<8x384xf32> to vector<8x128xf32>
    %349 = vector.extract_strided_slice %345 {offsets = [0, 128], sizes = [8, 128], strides = [1, 1]} : vector<8x384xf32> to vector<8x128xf32>
    %350 = vector.extract_strided_slice %345 {offsets = [0, 256], sizes = [8, 128], strides = [1, 1]} : vector<8x384xf32> to vector<8x128xf32>
    %351 = arith.mulf %349, %331 : vector<8x128xf32>
    %352 = arith.mulf %348, %347 : vector<8x128xf32>
    %353 = arith.addf %351, %352 : vector<8x128xf32>
    %354 = math.tanh %353 : vector<8x128xf32>
    %355 = arith.mulf %350, %354 : vector<8x128xf32>
    %c7_i32 = arith.constant 7 : i32
    %c8_i32_88 = arith.constant 8 : i32
    %356 = arith.muli %c7_i32, %c8_i32_88 : i32
    %357 = tpu.assume_multiple %356, 8 : i32
    %358 = arith.index_cast %357 : i32 to index
    %c0_89 = arith.constant 0 : index
    %359 = vector.load %arg8[%358, %c0_89] : memref<64x512xf32, #tpu.memory_space<vmem>>, vector<8x512xf32>
    %cst_90 = arith.constant dense<0.000000e+00> : vector<8x512xf32>
    %360 = tpu.matmul %355, %199, %cst_90 {dimension_numbers = #tpu.dot_dimension_numbers<[1], [0], [0], [1], [0, 0, 1, 1], [], []>} : vector<8x128xf32>, vector<128x512xf32>, vector<8x512xf32> -> vector<8x512xf32>
    %361 = arith.addf %359, %360 : vector<8x512xf32>
    %362 = vector.extract_strided_slice %361 {offsets = [0, 0], sizes = [8, 384], strides = [1, 1]} : vector<8x512xf32> to vector<8x384xf32>
    %363 = arith.negf %362 : vector<8x384xf32>
    %364 = math.exp %363 : vector<8x384xf32>
    %cst_91 = arith.constant 1.000000e+00 : f32
    %365 = vector.broadcast %cst_91 : f32 to vector<8x384xf32>
    %366 = arith.addf %365, %364 : vector<8x384xf32>
    %367 = arith.divf %365, %366 : vector<8x384xf32>
    %368 = vector.extract_strided_slice %361 {offsets = [0, 384], sizes = [8, 128], strides = [1, 1]} : vector<8x512xf32> to vector<8x128xf32>
    %369 = math.tanh %368 : vector<8x128xf32>
    %370 = vector.extract_strided_slice %367 {offsets = [0, 0], sizes = [8, 128], strides = [1, 1]} : vector<8x384xf32> to vector<8x128xf32>
    %371 = vector.extract_strided_slice %367 {offsets = [0, 128], sizes = [8, 128], strides = [1, 1]} : vector<8x384xf32> to vector<8x128xf32>
    %372 = vector.extract_strided_slice %367 {offsets = [0, 256], sizes = [8, 128], strides = [1, 1]} : vector<8x384xf32> to vector<8x128xf32>
    %373 = arith.mulf %371, %353 : vector<8x128xf32>
    %374 = arith.mulf %370, %369 : vector<8x128xf32>
    %375 = arith.addf %373, %374 : vector<8x128xf32>
    %376 = math.tanh %375 : vector<8x128xf32>
    %377 = arith.mulf %372, %376 : vector<8x128xf32>
    %c8_i32_92 = arith.constant 8 : i32
    %c0_93 = arith.constant 0 : index
    %c0_94 = arith.constant 0 : index
    %378 = vector.load %arg4[%c0_93, %c0_94] : memref<128x128xf32, #tpu.memory_space<vmem>>, vector<128x128xf32>
    %cst_95 = arith.constant dense<0.000000e+00> : vector<8x128xf32>
    %379 = tpu.matmul %377, %378, %cst_95 {dimension_numbers = #tpu.dot_dimension_numbers<[1], [0], [0], [1], [0, 0, 1, 1], [], []>} : vector<8x128xf32>, vector<128x128xf32>, vector<8x128xf32> -> vector<8x128xf32>
    %c0_96 = arith.constant 0 : index
    %c0_97 = arith.constant 0 : index
    %380 = vector.load %arg5[%c0_96, %c0_97] : memref<1x128xf32, #tpu.memory_space<vmem>>, vector<1x128xf32>
    %381 = vector.broadcast %380 : vector<1x128xf32> to vector<8x128xf32>
    %382 = arith.addf %379, %381 : vector<8x128xf32>
    %c0_98 = arith.constant 0 : index
    %c0_99 = arith.constant 0 : index
    %383 = vector.load %arg6[%c0_98, %c0_99] : memref<8x128xf32, #tpu.memory_space<vmem>>, vector<8x128xf32>
    tpu.vector_store %arg6[%c0_98, %c0_99], %382 {strides = array<i32>} : memref<8x128xf32, #tpu.memory_space<vmem>>, vector<8x128xf32>,
    return
  }
  func.func @transform_0(%arg0: i32, %arg1: memref<32xi32, #tpu.memory_space<smem>>) -> (i32, i32) {
    %c0_i32 = arith.constant 0 : i32
    %c0_i32_0 = arith.constant 0 : i32
    %c0_i32_1 = arith.constant 0 : i32
    return %c0_i32, %c0_i32_0 : i32, i32
  }
  func.func @transform_1(%arg0: i32, %arg1: memref<32xi32, #tpu.memory_space<smem>>) -> (i32, i32) {
    %c0_i32 = arith.constant 0 : i32
    %c0_i32_0 = arith.constant 0 : i32
    %c0_i32_1 = arith.constant 0 : i32
    return %c0_i32, %c0_i32_0 : i32, i32
  }
  func.func @transform_2(%arg0: i32, %arg1: memref<32xi32, #tpu.memory_space<smem>>) -> (i32, i32) {
    %c0_i32 = arith.constant 0 : i32
    %c0_i32_0 = arith.constant 0 : i32
    %c0_i32_1 = arith.constant 0 : i32
    return %c0_i32, %c0_i32_0 : i32, i32
  }
  func.func @transform_3(%arg0: i32, %arg1: memref<32xi32, #tpu.memory_space<smem>>) -> (i32, i32) {
    %c0_i32 = arith.constant 0 : i32
    %c0_i32_0 = arith.constant 0 : i32
    %c0_i32_1 = arith.constant 0 : i32
    return %c0_i32, %c0_i32_0 : i32, i32
  }
  func.func @transform_4(%arg0: i32, %arg1: memref<32xi32, #tpu.memory_space<smem>>) -> (i32, i32) {
    %c0_i32 = arith.constant 0 : i32
    %c0_i32_0 = arith.constant 0 : i32
    %c0_i32_1 = arith.constant 0 : i32
    return %c0_i32, %c0_i32_0 : i32, i32
  }
}

</mosaic_0001>

<bundles_post_ra>
// kernel: tpu_custom_call.1
= control target key start
LH: loop header
LB: loop body
LE: loop exit
PB: predicated region body
PF: predicated region fallthrough
CT: control target
= control target key end

     0   :  { %s2356_s21 = smov [#allocation5]   ;;  %s3580_s0 = inlined_call_operand.hbm [shape: s32[32], index: 0, kind: input, shape index: {}]   ;;  %s3581_s1 = inlined_call_operand.hbm [shape: f32[64,512], index: 1, kind: input, shape index: {}]   ;;  %s3582_s2 = inlined_call_operand.hbm [shape: f32[128,512], index: 2, kind: input, shape index: {}]   ;;  %s3583_s3 = inlined_call_operand.hbm [shape: f32[128,128], index: 3, kind: input, shape index: {}]   ;;  %s3584_s4 = inlined_call_operand.vmem [shape: f32[1,128], index: 4, kind: input, shape index: {}]   ;;  %s3585_s5 = inlined_call_operand.hbm [shape: f32[8,128], index: 5, kind: output, shape index: {}]  }
   0x1   :  { %s11_s20 = sshll.u32 %s3580_s0, 4  ;;  %s12_s20 = int_to_ptr.hbm [resolvable:$true] %s11_s20 }
   0x2   :  { %14 = dma.hbm_to_smem %s12_s20, 16, %s2356_s21, [#allocation4] }
   0x3   :  { %2348 = dma.done.wait [#allocation4], 16 }
   0x4   :  { %2349 = vsyncadd [#allocation4], 4294967280 }
   0x5   :  { %17 = sfence }
   0x6   :  { %18 = vsyncpa [#allocation7], 0 }
   0x7   :  { %19 = vsyncpa [#allocation10], 0 }
   0x8   :  { %20 = vsyncpa [#allocation8], 0  ;;  %s38_s24 = sshll.u32 %s3582_s2, 4  ;;  %s2357_s25 = smov [#allocation9]   ;;  %s39_s24 = int_to_ptr.hbm [resolvable:$true] %s38_s24 }
   0x9   :  { %s40_s26 = sshll.u32 %s2357_s25, 4  ;;  %s25_s0 = sshll.u32 %s3581_s1, 4  ;;  %s41_s26 = int_to_ptr.vmem [resolvable:$true] %s40_s26  ;;  %s26_s0 = int_to_ptr.hbm [resolvable:$true] %s25_s0 }
   0xa   :  { %s2358_s29 = smov 512   ;;  %s2359_s30 = smov 32  }
   0xb   :  { %46 = dma.hbm_to_vmem [thread:$0]  %s39_s24, 8192, %s41_s26, [#allocation10], %s2358_s29, %s2358_s29, %s2359_s30  }
   0xc   :  { %s2360_s6 = smov [#allocation6]   ;;  %s51_s10 = sshll.u32 %s3583_s3, 4  ;;  %s52_s10 = int_to_ptr.hbm [resolvable:$true] %s51_s10 }
   0xd   :  { %s27_s7 = sshll.u32 %s2360_s6, 4  ;;  %s2361_s2 = smov [#allocation11]   ;;  %s28_s7 = int_to_ptr.vmem [resolvable:$true] %s27_s7 }
   0xe   :  { %33 = dma.hbm_to_vmem [thread:$0]  %s26_s0, 4096, %s28_s7, [#allocation7], %s2358_s29, %s2358_s29, %s2359_s30  }
   0xf   :  { %s53_s11 = sshll.u32 %s2361_s2, 4  ;;  %s2362_s12 = smov 128   ;;  %s54_s11 = int_to_ptr.vmem [resolvable:$true] %s53_s11 }
  0x10   :  { %s2363_s13 = smov 8  }
  0x11   :  { %59 = dma.hbm_to_vmem [thread:$0]  %s52_s10, 2048, %s54_s11, [#allocation10], %s2362_s12, %s2362_s12, %s2363_s13  }
  0x12   :  { %2350 = dma.done.wait [#allocation7], 4096  }
  0x13   :  { %2351 = vsyncadd [#allocation7], 4294963200 }
  0x14   :  { %2352 = dma.done.wait [#allocation10], 10240  }
  0x15   :  { %2353 = vsyncadd [#allocation10], 4294957056  ;;  %vm74_vm0 = vcmask 523264   ;;  %v83_v0 = vlaneseq  ;;  %v3586_v1 = vmov 0.0   ;;  %s85_s1 = sld [smem:[#allocation5]]  ;;  %vm90_vm1 = vcmask 516096  }
  0x16   :  { %75 = vst.msk [vmem:[#allocation2] sm:$0xff] %vm74_vm0, %v3586_v1  ;;  %s1901_s3 = sld [smem:[#allocation5 + $0x8]]  ;;  %v314_v3 = vld [vmem:[#allocation6 + $0xe0] sm:$0xff]  ;;  %v317_v4 = vld [vmem:[#allocation6 + $0xf8] sm:$0xff]  ;;  %v315_v38 = vld [vmem:[#allocation6 + $0xe8] sm:$0xff] }
  0x17   :  { %76 = vst.msk [vmem:[#allocation2 + $0x8] sm:$0xff] %vm74_vm0, %v3586_v1  ;;  %s2412_s14 = sld [smem:[#allocation5 + $0x10]]  ;;  %v2416_v2 = vand.u32 127, %v83_v0  ;;  %v310_v5 = vld [vmem:[#allocation6 + $0xc0] sm:$0xff]  ;;  %350 = vmatpush.msra.mxu0 %v314_v3  ;;  %2019 = vmatpush.msra.mxu1 %v314_v3  ;;  %v313_v7 = vld [vmem:[#allocation6 + $0xd8] sm:$0xff]  ;;  %v316_v40 = vld [vmem:[#allocation6 + $0xf0] sm:$0xff] }
  0x18   :  { %77 = vst.msk [vmem:[#allocation2 + $0x10] sm:$0xff] %vm74_vm0, %v3586_v1  ;;  %s2418_s15 = sld [smem:[#allocation5 + $0x18]]  ;;  %2020 = vmatpush.msra.mxu2 %v314_v3  ;;  %473 = vmatpush.msra.mxu3 %v317_v4  ;;  %v306_v9 = vld [vmem:[#allocation6 + $0xa0] sm:$0xff]  ;;  %v309_v12 = vld [vmem:[#allocation6 + $0xb8] sm:$0xff]  ;;  %v311_v41 = vld [vmem:[#allocation6 + $0xc8] sm:$0xff] }
  0x19   :  { %78 = vst.msk [vmem:[#allocation2 + $0x18] sm:$0xff] %vm74_vm0, %v3586_v1  ;;  %s2424_s16 = sld [smem:[#allocation5 + $0x5]]  ;;  %351 = vmatpush.msra.mxu0 %v310_v5  ;;  %2021 = vmatpush.msra.mxu1 %v310_v5  ;;  %v302_v15 = vld [vmem:[#allocation6 + $0x80] sm:$0xff]  ;;  %v305_v18 = vld [vmem:[#allocation6 + $0x98] sm:$0xff]  ;;  %v312_v43 = vld [vmem:[#allocation6 + $0xd0] sm:$0xff] }
  0x1a   :  { %79 = vst.msk [vmem:[#allocation2 + $0x20] sm:$0xff] %vm74_vm0, %v3586_v1  ;;  %s2428_s17 = sld [smem:[#allocation5 + $0xd]]  ;;  %2022 = vmatpush.msra.mxu2 %v310_v5  ;;  %474 = vmatpush.msra.mxu3 %v313_v7  ;;  %v298_v21 = vld [vmem:[#allocation6 + $0x60] sm:$0xff]  ;;  %v301_v24 = vld [vmem:[#allocation6 + $0x78] sm:$0xff]  ;;  %v307_v44 = vld [vmem:[#allocation6 + $0xa8] sm:$0xff] }
  0x1b   :  { %80 = vst.msk [vmem:[#allocation2 + $0x28] sm:$0xff] %vm74_vm0, %v3586_v1  ;;  %v86_v6 = vstv %s85_s1  ;;  %s2432_s18 = sld [smem:[#allocation5 + $0x15]]  ;;  %352 = vmatpush.msra.mxu0 %v306_v9  ;;  %2023 = vmatpush.msra.mxu1 %v306_v9  ;;  %v294_v27 = vld [vmem:[#allocation6 + $0x40] sm:$0xff]  ;;  %v297_v30 = vld [vmem:[#allocation6 + $0x58] sm:$0xff]  ;;  %v308_v49 = vld [vmem:[#allocation6 + $0xb0] sm:$0xff] }
  0x1c   :  { %81 = vst.msk [vmem:[#allocation2 + $0x30] sm:$0xff] %vm74_vm0, %v3586_v1  ;;  %vm87_vm2 = vcmp.eq.s32.totalorder %v2416_v2, %v86_v6  ;;  %v93_v8 = vstv %s1901_s3  ;;  %s2437_s19 = sld [smem:[#allocation5 + $0x1d]]  ;;  %2024 = vmatpush.msra.mxu2 %v306_v9  ;;  %475 = vmatpush.msra.mxu3 %v309_v12  ;;  %v290_v32 = vld [vmem:[#allocation6 + $0x20] sm:$0xff]  ;;  %v293_v34 = vld [vmem:[#allocation6 + $0x38] sm:$0xff]  ;;  %v303_v52 = vld [vmem:[#allocation6 + $0x88] sm:$0xff] }
  0x1d   :  { %82 = vst.msk [vmem:[#allocation2 + $0x38] sm:$0xff] %vm74_vm0, %v3586_v1  ;;  %v1900_v10 = vsel %vm87_vm2, 1.0, %v3586_v1  ;;  %vm94_vm3 = vcmp.eq.s32.totalorder %v2416_v2, %v93_v8  ;;  %v99_v11 = vstv %s2412_s14  ;;  %s2442_s20 = sld [smem:[#allocation5 + $0x7]]  ;;  %353 = vmatpush.msra.mxu0 %v302_v15  ;;  %2025 = vmatpush.msra.mxu1 %v302_v15  ;;  %v286_v35 = vld [vmem:[#allocation6] sm:$0xff]  ;;  %v289_v36 = vld [vmem:[#allocation6 + $0x18] sm:$0xff]  ;;  %v304_v55 = vld [vmem:[#allocation6 + $0x90] sm:$0xff] }
  0x1e   :  { %91 = vst.msk [vmem:[#allocation2] sm:$0x1] %vm90_vm1, %v1900_v10  ;;  %v1902_v13 = vsel %vm94_vm3, 1.0, %v3586_v1  ;;  %vm100_vm4 = vcmp.eq.s32.totalorder %v2416_v2, %v99_v11  ;;  %v105_v14 = vstv %s2418_s15  ;;  %2026 = vmatpush.msra.mxu2 %v302_v15  ;;  %476 = vmatpush.msra.mxu3 %v305_v18  ;;  %s2468_s21 = sld [smem:[#allocation5 + $0xf]]  ;;  %v2500_v47 = vld [vmem:[#allocation9 + $0x1e0] sm:$0xff]  ;;  %v299_v61 = vld [vmem:[#allocation6 + $0x68] sm:$0xff] }
  0x1f   :  { %97 = vst.msk [vmem:[#allocation2 + $0x1] sm:$0x1] %vm90_vm1, %v1902_v13  ;;  %v1904_v16 = vsel %vm100_vm4, 1.0, %v3586_v1  ;;  %vm106_vm5 = vcmp.eq.s32.totalorder %v2416_v2, %v105_v14  ;;  %v207_v17 = vstv %s2424_s16  ;;  %354 = vmatpush.msra.mxu0 %v298_v21  ;;  %2027 = vmatpush.msra.mxu1 %v298_v21  ;;  %s2473_s22 = sld [smem:[#allocation5 + $0x17]]  ;;  %v2526_v58 = vld [vmem:[#allocation9 + $0x1c0] sm:$0xff]  ;;  %v300_v0 = vld [vmem:[#allocation6 + $0x70] sm:$0xff] }
  0x20   :  { %103 = vst.msk [vmem:[#allocation2 + $0x2] sm:$0x1] %vm90_vm1, %v1904_v16  ;;  %v1906_v19 = vsel %vm106_vm5, 1.0, %v3586_v1  ;;  %vm208_vm6 = vcmp.eq.s32.totalorder %v2416_v2, %v207_v17  ;;  %v213_v20 = vstv %s2428_s17  ;;  %2028 = vmatpush.msra.mxu2 %v298_v21  ;;  %477 = vmatpush.msra.mxu3 %v301_v24  ;;  %s2477_s23 = sld [smem:[#allocation5 + $0x1f]]  ;;  %v2541_v3 = vld [vmem:[#allocation9 + $0x1a0] sm:$0xff]  ;;  %v295_v6 = vld [vmem:[#allocation6 + $0x48] sm:$0xff] }
  0x21   :  { %109 = vst.msk [vmem:[#allocation2 + $0x3] sm:$0x1] %vm90_vm1, %v1906_v19  ;;  %v1940_v22 = vsel %vm208_vm6, 1.0, %v3586_v1  ;;  %vm214_vm7 = vcmp.eq.s32.totalorder %v2416_v2, %v213_v20  ;;  %v219_v23 = vstv %s2432_s18  ;;  %355 = vmatpush.msra.mxu0 %v294_v27  ;;  %2029 = vmatpush.msra.mxu1 %v294_v27  ;;  %s2480_s24 = sld [smem:[#allocation5 + $0x1]]  ;;  %v296_v9 = vld [vmem:[#allocation6 + $0x50] sm:$0xff]  ;;  %v2556_v10 = vld [vmem:[#allocation9 + $0x180] sm:$0xff] }
  0x22   :  { %211 = vst.msk [vmem:[#allocation2 + $0x28] sm:$0x1] %vm90_vm1, %v1940_v22  ;;  %v1942_v25 = vsel %vm214_vm7, 1.0, %v3586_v1  ;;  %vm220_vm8 = vcmp.eq.s32.totalorder %v2416_v2, %v219_v23  ;;  %v225_v26 = vstv %s2437_s19  ;;  %2030 = vmatpush.msra.mxu2 %v294_v27  ;;  %478 = vmatpush.msra.mxu3 %v297_v30  ;;  %s2482_s25 = sld [smem:[#allocation5 + $0x9]]  ;;  %v291_v13 = vld [vmem:[#allocation6 + $0x28] sm:$0xff]  ;;  %v292_v15 = vld [vmem:[#allocation6 + $0x30] sm:$0xff] }
  0x23   :  { %217 = vst.msk [vmem:[#allocation2 + $0x29] sm:$0x1] %vm90_vm1, %v1942_v25  ;;  %v1944_v28 = vsel %vm220_vm8, 1.0, %v3586_v1  ;;  %vm226_vm9 = vcmp.eq.s32.totalorder %v2416_v2, %v225_v26  ;;  %v255_v29 = vstv %s2442_s20  ;;  %356 = vmatpush.msra.mxu0 %v290_v32  ;;  %2031 = vmatpush.msra.mxu1 %v290_v32  ;;  %s2484_s26 = sld [smem:[#allocation5 + $0x11]]  ;;  %v2571_v17 = vld [vmem:[#allocation9 + $0x160] sm:$0xff]  ;;  %v287_v21 = vld [vmem:[#allocation6 + $0x8] sm:$0xff] }
  0x24   :  { %223 = vst.msk [vmem:[#allocation2 + $0x2a] sm:$0x1] %vm90_vm1, %v1944_v28  ;;  %v1946_v31 = vsel %vm226_vm9, 1.0, %v3586_v1  ;;  %vm256_vm10 = vcmp.eq.s32.totalorder %v2416_v2, %v255_v29  ;;  %2032 = vmatpush.msra.mxu2 %v290_v32  ;;  %479 = vmatpush.msra.mxu3 %v293_v34  ;;  %v261_v39 = vstv %s2468_s21  ;;  %s2489_s27 = sld [smem:[#allocation5 + $0x19]]  ;;  %v288_v22 = vld [vmem:[#allocation6 + $0x10] sm:$0xff]  ;;  %v2590_v25 = vld [vmem:[#allocation9 + $0x140] sm:$0xff] }
  0x25   :  { %229 = vst.msk [vmem:[#allocation2 + $0x2b] sm:$0x1] %vm90_vm1, %v1946_v31  ;;  %v1956_v33 = vsel %vm256_vm10, 1.0, %v3586_v1  ;;  %357 = vmatpush.msra.mxu0 %v286_v35  ;;  %2033 = vmatpush.msra.mxu1 %v286_v35  ;;  %vm262_vm11 = vcmp.eq.s32.totalorder %v2416_v2, %v261_v39  ;;  %v267_v42 = vstv %s2473_s22  ;;  %s2493_s28 = sld [smem:[#allocation5 + $0x6]]  ;;  %v2592_v26 = vld [vmem:[#allocation9 + $0x1f8] sm:$0xff]  ;;  %v2598_v29 = vld [vmem:[#allocation9 + $0x1e8] sm:$0xff] }
  0x26   :  { %259 = vst.msk [vmem:[#allocation2 + $0x38] sm:$0x1] %vm90_vm1, %v1956_v33  ;;  %2034 = vmatpush.msra.mxu2 %v286_v35  ;;  %480 = vmatpush.msra.mxu3 %v289_v36  ;;  %v1958_v45 = vsel %vm262_vm11, 1.0, %v3586_v1  ;;  %vm268_vm12 = vcmp.eq.s32.totalorder %v2416_v2, %v267_v42  ;;  %v273_v46 = vstv %s2477_s23  ;;  %s2498_s0 = sld [smem:[#allocation5 + $0xe]]  ;;  %v2606_v31 = vld [vmem:[#allocation9 + $0x120] sm:$0xff]  ;;  %v2626_v36 = vld [vmem:[#allocation9 + $0x1f0] sm:$0xff] }
  0x27   :  { %391 = vmatpush.msrb.mxu1 %v315_v38  ;;  %265 = vst.msk [vmem:[#allocation2 + $0x39] sm:$0x1] %vm90_vm1, %v1958_v45  ;;  %v1960_v50 = vsel %vm268_vm12, 1.0, %v3586_v1  ;;  %vm274_vm13 = vcmp.eq.s32.totalorder %v2416_v2, %v273_v46  ;;  %v111_v51 = vstv %s2480_s24  ;;  %s2510_s29 = sld [smem:[#allocation5 + $0x16]]  ;;  %609 = vmatpush.msrb.mxu0 %v2500_v47  ;;  %v2637_v42 = vld [vmem:[#allocation9 + $0x1d8] sm:$0xff]  ;;  %s2365_s17 = smov [#allocation12]  }
  0x28   :  { %v2486_v37 = vld [vmem:[#allocation2] sm:$0xff]  ;;  %432 = vmatpush.msrb.mxu2 %v316_v40  ;;  %271 = vst.msk [vmem:[#allocation2 + $0x3a] sm:$0x1] %vm90_vm1, %v1960_v50  ;;  %v1962_v53 = vsel %vm274_vm13, 1.0, %v3586_v1  ;;  %vm112_vm14 = vcmp.eq.s32.totalorder %v2416_v2, %v111_v51  ;;  %v117_v54 = vstv %s2482_s25  ;;  %s2518_s30 = sld [smem:[#allocation5 + $0x1e]]  ;;  %669 = vmatpush.msrb.mxu3 %v2592_v26  ;;  %v2653_v50 = vld [vmem:[#allocation9 + $0x1d0] sm:$0xff] }
  0x29   :  { %1963 = vmatmul.msk.f32.vlgmr.msra.gmra.mxu0 %vm74_vm0, %v2486_v37  ;;  %1987 = vmatmul.msk.f32.vlgmr.msra.gmra.mxu3 %vm74_vm0, %v2486_v37  ;;  %277 = vst.msk [vmem:[#allocation2 + $0x3b] sm:$0x1] %vm90_vm1, %v1962_v53  ;;  %v1908_v56 = vsel %vm112_vm14, 1.0, %v3586_v1  ;;  %vm118_vm15 = vcmp.eq.s32.totalorder %v2416_v2, %v117_v54  ;;  %v123_v57 = vstv %s2484_s26  ;;  %s2528_s6 = sld [smem:[#allocation5 + $0x2]]  ;;  %v2664_v53 = vld [vmem:[#allocation9 + $0x1a8] sm:$0xff]  ;;  %v2666_v54 = vld [vmem:[#allocation9 + $0xe0] sm:$0xff] }
  0x2a   :  { %392 = vmatpush.msrb.mxu1 %v311_v41  ;;  %3688 = vst [vmem:[#allocation17_spill] sm:$0xff] %v2526_v58  ;;  %433 = vmatpush.msrb.mxu2 %v312_v43  ;;  %v1910_v59 = vsel %vm118_vm15, 1.0, %v3586_v1  ;;  %vm124_vm2 = vcmp.eq.s32.totalorder %v2416_v2, %v123_v57  ;;  %v129_v60 = vstv %s2489_s27  ;;  %s2535_s7 = sld [smem:[#allocation5 + $0xa]]  ;;  %v2640_v43 = vld [vmem:[#allocation9 + $0x1c8] sm:$0xff]  ;;  %s1880_s18 = sshll.u32 %s2365_s17, 4  ;;  %s1881_s18 = int_to_ptr.vmem [resolvable:$true] %s1880_s18 }
  0x2b   :  { %115 = vst.msk [vmem:[#allocation2 + $0x8] sm:$0x1] %vm90_vm1, %v1908_v56  ;;  %v1912_v62 = vsel %vm124_vm2, 1.0, %v3586_v1  ;;  %vm130_vm3 = vcmp.eq.s32.totalorder %v2416_v2, %v129_v60  ;;  %v231_v63 = vstv %s2493_s28  ;;  %s2543_s8 = sld [smem:[#allocation5 + $0x12]]  ;;  %610 = vmatpush.msrb.mxu0 %v2526_v58  ;;  %670 = vmatpush.msrb.mxu3 %v2637_v42  ;;  %v2672_v56 = vld [vmem:[#allocation9 + $0xc0] sm:$0xff]  ;;  %v2678_v60 = vld [vmem:[#allocation9 + $0x188] sm:$0xff] }
  0x2c   :  { %v2504_v48 = vld [vmem:[#allocation2 + $0x28] sm:$0xff]  ;;  %393 = vmatpush.msrb.mxu1 %v307_v44  ;;  %121 = vst.msk [vmem:[#allocation2 + $0x9] sm:$0x1] %vm90_vm1, %v1910_v59  ;;  %434 = vmatpush.msrb.mxu2 %v308_v49  ;;  %v1914_v4 = vsel %vm130_vm3, 1.0, %v3586_v1  ;;  %vm232_vm4 = vcmp.eq.s32.totalorder %v2416_v2, %v231_v63  ;;  %v237_v5 = vstv %s2498_s0  ;;  %s2550_s9 = sld [smem:[#allocation5 + $0x1a]]  ;;  %v2643_v44 = vld [vmem:[#allocation9 + $0x100] sm:$0xff] }
  0x2d   :  { %1968 = vmatmul.msk.f32.vlgmr.msra.gmra.mxu1 %vm74_vm0, %v2504_v48  ;;  %3689 = vst [vmem:[#allocation18_spill] sm:$0xff] %v2541_v3  ;;  %v1948_v7 = vsel %vm232_vm4, 1.0, %v3586_v1  ;;  %vm238_vm5 = vcmp.eq.s32.totalorder %v2416_v2, %v237_v5  ;;  %v243_v8 = vstv %s2510_s29  ;;  %s2558_s10 = sld [smem:[#allocation5 + $0x3]]  ;;  %611 = vmatpush.msrb.mxu0 %v2541_v3  ;;  %s1882_s21 = sshll.u32 %s3585_s5, 4  ;;  %s1883_s21 = int_to_ptr.hbm [resolvable:$true] %s1882_s21 }
  0x2e   :  { %127 = vst.msk [vmem:[#allocation2 + $0xa] sm:$0x1] %vm90_vm1, %v1912_v62  ;;  %394 = vmatpush.msrb.mxu1 %v303_v52  ;;  %435 = vmatpush.msrb.mxu2 %v304_v55  ;;  %v1950_v11 = vsel %vm238_vm5, 1.0, %v3586_v1  ;;  %vm244_vm6 = vcmp.eq.s32.totalorder %v2416_v2, %v243_v8  ;;  %v249_v12 = vstv %s2518_s30  ;;  %s2565_s2 = sld [smem:[#allocation5 + $0xb]]  ;;  %v2657_v52 = vld [vmem:[#allocation9 + $0x1b8] sm:$0xff]  ;;  %v2704_v8 = vld [vmem:[#allocation9 + $0x168] sm:$0xff] }
  0x2f   :  { %133 = vst.msk [vmem:[#allocation2 + $0xb] sm:$0x1] %vm90_vm1, %v1914_v4  ;;  %v1952_v14 = vsel %vm244_vm6, 1.0, %v3586_v1  ;;  %vm250_vm7 = vcmp.eq.s32.totalorder %v2416_v2, %v249_v12  ;;  %v135_v16 = vstv %s2528_s6  ;;  %s2573_s11 = sld [smem:[#allocation5 + $0x13]]  ;;  %612 = vmatpush.msrb.mxu0 %v2556_v10  ;;  %671 = vmatpush.msrb.mxu3 %v2657_v52  ;;  %v2719_v12 = vld [vmem:[#allocation9 + $0x178] sm:$0xff] }
  0x30   :  { %3690 = vst [vmem:[#allocation19_spill] sm:$0xff] %v2556_v10  ;;  %395 = vmatpush.msrb.mxu1 %v299_v61  ;;  %v2575_v18 = vld [vmem:[#allocation2 + $0x38] sm:$0xff]  ;;  %v1954_v19 = vsel %vm250_vm7, 1.0, %v3586_v1  ;;  %436 = vmatpush.msrb.mxu2 %v300_v0  ;;  %vm136_vm8 = vcmp.eq.s32.totalorder %v2416_v2, %v135_v16  ;;  %v141_v20 = vstv %s2535_s7  ;;  %s2582_s12 = sld [smem:[#allocation5 + $0x1b]]  ;;  %v2680_v61 = vld [vmem:[#allocation9 + $0x1b0] sm:$0xff]  ;;  %v2733_v16 = vld [vmem:[#allocation9 + $0x40] sm:$0xff] }
  0x31   :  { %235 = vst.msk [vmem:[#allocation2 + $0x30] sm:$0x1] %vm90_vm1, %v1948_v7  ;;  %1970 = vmatmul.msk.f32.vlgmr.msra.gmra.mxu2 %vm74_vm0, %v2575_v18  ;;  %v1916_v23 = vsel %vm136_vm8, 1.0, %v3586_v1  ;;  %vm142_vm9 = vcmp.eq.s32.totalorder %v2416_v2, %v141_v20  ;;  %v147_v24 = vstv %s2543_s8  ;;  %613 = vmatpush.msrb.mxu0 %v2571_v17  ;;  %s2601_s13 = sld [smem:[#allocation5 + $0x4]]  ;;  %v2687_v0 = vld [vmem:[#allocation9 + $0x198] sm:$0xff] }
  0x32   :  { %241 = vst.msk [vmem:[#allocation2 + $0x31] sm:$0x1] %vm90_vm1, %v1950_v11  ;;  %396 = vmatpush.msrb.mxu1 %v295_v6  ;;  %437 = vmatpush.msrb.mxu2 %v296_v9  ;;  %v1918_v27 = vsel %vm142_vm9, 1.0, %v3586_v1  ;;  %vm148_vm10 = vcmp.eq.s32.totalorder %v2416_v2, %v147_v24  ;;  %v153_v28 = vstv %s2550_s9  ;;  %s2610_s1 = sld [smem:[#allocation5 + $0xc]]  ;;  %v2700_v6 = vld [vmem:[#allocation9 + $0xa0] sm:$0xff]  ;;  %v2712_v9 = vld [vmem:[#allocation9 + $0x190] sm:$0xff] }
  0x33   :  { %247 = vst.msk [vmem:[#allocation2 + $0x32] sm:$0x1] %vm90_vm1, %v1952_v14  ;;  %v1920_v30 = vsel %vm148_vm10, 1.0, %v3586_v1  ;;  %vm154_vm11 = vcmp.eq.s32.totalorder %v2416_v2, %v153_v28  ;;  %v159_v32 = vstv %s2558_s10  ;;  %614 = vmatpush.msrb.mxu0 %v2590_v25  ;;  %s2619_s3 = sld [smem:[#allocation5 + $0x14]]  ;;  %672 = vmatpush.msrb.mxu3 %v2687_v0  ;;  %v2717_v11 = vld [vmem:[#allocation9 + $0x148] sm:$0xff]  ;;  %v2727_v14 = vld [vmem:[#allocation9 + $0x170] sm:$0xff] }
  0x34   :  { %253 = vst.msk [vmem:[#allocation2 + $0x33] sm:$0x1] %vm90_vm1, %v1954_v19  ;;  %397 = vmatpush.msrb.mxu1 %v291_v13  ;;  %438 = vmatpush.msrb.mxu2 %v292_v15  ;;  %v1922_v34 = vsel %vm154_vm11, 1.0, %v3586_v1  ;;  %vm160_vm12 = vcmp.eq.s32.totalorder %v2416_v2, %v159_v32  ;;  %v165_v35 = vstv %s2565_s2  ;;  %s2631_s14 = sld [smem:[#allocation5 + $0x1c]]  ;;  %v2725_v13 = vld [vmem:[#allocation9 + $0x60] sm:$0xff]  ;;  %v2736_v19 = vld [vmem:[#allocation9 + $0x128] sm:$0xff] }
  0x35   :  { %139 = vst.msk [vmem:[#allocation2 + $0x10] sm:$0x1] %vm90_vm1, %v1916_v23  ;;  %v1924_v38 = vsel %vm160_vm12, 1.0, %v3586_v1  ;;  %vm166_vm13 = vcmp.eq.s32.totalorder %v2416_v2, %v165_v35  ;;  %v171_v39 = vstv %s2573_s11  ;;  %615 = vmatpush.msrb.mxu0 %v2606_v31  ;;  %673 = vmatpush.msrb.mxu3 %v2719_v12  ;;  %v2743_v20 = vld [vmem:[#allocation9 + $0x158] sm:$0xff]  ;;  %v2755_v23 = vld [vmem:[#allocation9] sm:$0xff]  ;;  %v2759_v24 = vld [vmem:[#allocation9 + $0x130] sm:$0xff] }
  0x36   :  { %145 = vst.msk [vmem:[#allocation2 + $0x11] sm:$0x1] %vm90_vm1, %v1918_v27  ;;  %v2612_v33 = vld [vmem:[#allocation2 + $0x8] sm:$0xff]  ;;  %398 = vmatpush.msrb.mxu1 %v287_v21  ;;  %439 = vmatpush.msrb.mxu2 %v288_v22  ;;  %v1926_v40 = vsel %vm166_vm13, 1.0, %v3586_v1  ;;  %vm172_vm14 = vcmp.eq.s32.totalorder %v2416_v2, %v171_v39  ;;  %v177_v41 = vstv %s2582_s12  ;;  %v2749_v21 = vld [vmem:[#allocation9 + $0x20] sm:$0xff]  ;;  %v2763_v27 = vld [vmem:[#allocation9 + $0x138] sm:$0xff] }
  0x37   :  { %151 = vst.msk [vmem:[#allocation2 + $0x12] sm:$0x1] %vm90_vm1, %v1920_v30  ;;  %1964 = vmatmul.msk.f32.gmra.mxu0 %vm74_vm0, %v2612_v33  ;;  %1988 = vmatmul.msk.f32.gmra.mxu3 %vm74_vm0, %v2612_v33  ;;  %v1928_v45 = vsel %vm172_vm14, 1.0, %v3586_v1  ;;  %vm178_vm15 = vcmp.eq.s32.totalorder %v2416_v2, %v177_v41  ;;  %v183_v51 = vstv %s2601_s13  ;;  %v2751_v22 = vld [vmem:[#allocation9 + $0x108] sm:$0xff]  ;;  %v2771_v30 = vld [vmem:[#allocation9 + $0x110] sm:$0xff] }
  0x38   :  { %157 = vst.msk [vmem:[#allocation2 + $0x13] sm:$0x1] %vm90_vm1, %v1922_v34  ;;  %629 = vmatpush.msra.mxu1 %v2598_v29  ;;  %649 = vmatpush.msra.mxu2 %v2626_v36  ;;  %v1930_v49 = vsel %vm178_vm15, 1.0, %v3586_v1  ;;  %vm184_vm2 = vcmp.eq.s32.totalorder %v2416_v2, %v183_v51  ;;  %v189_v55 = vstv %s2610_s1  ;;  %v2765_v28 = vld [vmem:[#allocation9 + $0xe8] sm:$0xff]  ;;  %v2778_v34 = vld [vmem:[#allocation9 + $0x118] sm:$0xff]  ;;  %v2800_v41 = vld [vmem:[#allocation9 + $0xd0] sm:$0xff] }
  0x39   :  { %163 = vst.msk [vmem:[#allocation2 + $0x18] sm:$0x1] %vm90_vm1, %v1924_v38  ;;  %1979 = vmatmul.msk.f32.vlgmr.msrb.gmra.mxu2 %vm74_vm0, %v2486_v37  ;;  %616 = vmatpush.msrb.mxu0 %v2643_v44  ;;  %v1932_v57 = vsel %vm184_vm2, 1.0, %v3586_v1  ;;  %vm190_vm3 = vcmp.eq.s32.totalorder %v2416_v2, %v189_v55  ;;  %v195_v59 = vstv %s2619_s3  ;;  %v2781_v35 = vld [vmem:[#allocation9 + $0xc8] sm:$0xff]  ;;  %v2791_v38 = vld [vmem:[#allocation9 + $0xf8] sm:$0xff]  ;;  %v2813_v51 = vld [vmem:[#allocation9 + $0xb0] sm:$0xff] }
  0x3a   :  { %169 = vst.msk [vmem:[#allocation2 + $0x19] sm:$0x1] %vm90_vm1, %v1926_v40  ;;  %630 = vmatpush.msra.mxu1 %v2640_v43  ;;  %650 = vmatpush.msra.mxu2 %v2653_v50  ;;  %v1934_v62 = vsel %vm190_vm3, 1.0, %v3586_v1  ;;  %vm196_vm4 = vcmp.eq.s32.totalorder %v2416_v2, %v195_v59  ;;  %v201_v63 = vstv %s2631_s14  ;;  %v2793_v39 = vld [vmem:[#allocation9 + $0xa8] sm:$0xff]  ;;  %v2797_v40 = vld [vmem:[#allocation9 + $0xd8] sm:$0xff]  ;;  %v2825_v59 = vld [vmem:[#allocation9 + $0x90] sm:$0xff] }
  0x3b   :  { %v2648_v46 = vld [vmem:[#allocation2 + $0x30] sm:$0xff]  ;;  %175 = vst.msk [vmem:[#allocation2 + $0x1a] sm:$0x1] %vm90_vm1, %v1928_v45  ;;  %617 = vmatpush.msrb.mxu0 %v2666_v54  ;;  %v1936_v5 = vsel %vm196_vm4, 1.0, %v3586_v1  ;;  %vm202_vm5 = vcmp.eq.s32.totalorder %v2416_v2, %v201_v63  ;;  %v2710_v2 = vld [vmem:[#allocation9 + $0x80] sm:$0xff]  ;;  %674 = vmatpush.msrb.mxu3 %v2743_v20  ;;  %v2805_v45 = vld [vmem:[#allocation9 + $0x88] sm:$0xff] }
  0x3c   :  { %1969 = vmatmul.msk.f32.gmra.mxu1 %vm74_vm0, %v2648_v46  ;;  %181 = vst.msk [vmem:[#allocation2 + $0x1b] sm:$0x1] %vm90_vm1, %v1930_v49  ;;  %v1938_v7 = vsel %vm202_vm5, 1.0, %v3586_v1  ;;  %651 = vmatpush.msra.mxu2 %v2680_v61  ;;  %v2811_v49 = vld [vmem:[#allocation9 + $0xb8] sm:$0xff]  ;;  %v2832_v63 = vld [vmem:[#allocation9 + $0x48] sm:$0xff] }
  0x3d   :  { %187 = vst.msk [vmem:[#allocation2 + $0x20] sm:$0x1] %vm90_vm1, %v1932_v57  ;;  %631 = vmatpush.msra.mxu1 %v2664_v53  ;;  %618 = vmatpush.msrb.mxu0 %v2672_v56  ;;  %v2817_v55 = vld [vmem:[#allocation9 + $0x98] sm:$0xff]  ;;  %v2820_v57 = vld [vmem:[#allocation9 + $0x68] sm:$0xff] }
  0x3e   :  { %193 = vst.msk [vmem:[#allocation2 + $0x21] sm:$0x1] %vm90_vm1, %v1934_v62  ;;  %652 = vmatpush.msra.mxu2 %v2712_v9  ;;  %675 = vmatpush.msrb.mxu3 %v2763_v27  ;;  %v2830_v62 = vld [vmem:[#allocation9 + $0x78] sm:$0xff] }
  0x3f   :  { %v2689_v4 = vld [vmem:[#allocation2 + $0x10] sm:$0xff]  ;;  %3691 = vst [vmem:[#allocation20_spill] sm:$0xff] %v2700_v6  ;;  %632 = vmatpush.msra.mxu1 %v2678_v60  ;;  %619 = vmatpush.msrb.mxu0 %v2700_v6 }
  0x40   :  { %1965 = vmatmul.msk.f32.gmra.mxu0 %vm74_vm0, %v2689_v4  ;;  %1989 = vmatmul.msk.f32.gmra.mxu3 %vm74_vm0, %v2689_v4  ;;  %199 = vst.msk [vmem:[#allocation2 + $0x22] sm:$0x1] %vm90_vm1, %v1936_v5  ;;  %v2839_v5 = vld [vmem:[#allocation9 + $0x70] sm:$0xff] }
  0x41   :  { %205 = vst.msk [vmem:[#allocation2 + $0x23] sm:$0x1] %vm90_vm1, %v1938_v7  ;;  %633 = vmatpush.msra.mxu1 %v2704_v8  ;;  %1980 = vmatmul.msk.f32.gmra.mxu2 %vm74_vm0, %v2612_v33  ;;  %v2848_v7 = vld [vmem:[#allocation9 + $0x38] sm:$0xff] }
  0x42   :  { %3692 = vst [vmem:[#allocation21_spill] sm:$0xff] %v2710_v2  ;;  %620 = vmatpush.msrb.mxu0 %v2710_v2  ;;  %653 = vmatpush.msra.mxu2 %v2727_v14 }
  0x43   :  { %3693 = vst [vmem:[#allocation22_spill] sm:$0xff] %v2725_v13  ;;  %v2729_v15 = vld [vmem:[#allocation2 + $0x18] sm:$0xff]  ;;  %634 = vmatpush.msra.mxu1 %v2717_v11  ;;  %676 = vmatpush.msrb.mxu3 %v2778_v34 }
  0x44   :  { %1971 = vmatmul.msk.f32.vlgmr.msrb.gmra.mxu1 %vm74_vm0, %v2486_v37  ;;  %3694 = vst [vmem:[#allocation23_spill] sm:$0xff] %v2733_v16  ;;  %621 = vmatpush.msrb.mxu0 %v2725_v13  ;;  %v2741_v37 = vld [vmem:[#allocation9 + $0x150] sm:$0xff] }
  0x45   :  { %3695 = vst [vmem:[#allocation24_spill] sm:$0xff] %v2749_v21  ;;  %635 = vmatpush.msra.mxu1 %v2736_v19  ;;  %654 = vmatpush.msra.mxu2 %v2741_v37 }
  0x46   :  { %622 = vmatpush.msrb.mxu0 %v2733_v16  ;;  %3696 = vst [vmem:[#allocation25_spill] sm:$0xff] %v2755_v23  ;;  %677 = vmatpush.msrb.mxu3 %v2791_v38 }
  0x47   :  { %636 = vmatpush.msra.mxu1 %v2751_v22  ;;  %655 = vmatpush.msra.mxu2 %v2759_v24  ;;  %3697 = vst [vmem:[#allocation26_spill] sm:$0xff] %v2793_v39 }
  0x48   :  { %1966 = vmatmul.msk.f32.gmra.mxu0 %vm74_vm0, %v2729_v15  ;;  %1990 = vmatmul.msk.f32.gmra.mxu3 %vm74_vm0, %v2729_v15  ;;  %v2773_v32 = vld [vmem:[#allocation2 + $0x20] sm:$0xff]  ;;  %3698 = vst [vmem:[#allocation27_spill] sm:$0xff] %v2805_v45 }
  0x49   :  { %623 = vmatpush.msrb.mxu0 %v2749_v21  ;;  %1981 = vmatmul.msk.f32.gmra.mxu2 %vm74_vm0, %v2689_v4  ;;  %3699 = vst [vmem:[#allocation28_spill] sm:$0xff] %v2811_v49 }
  0x4a   :  { %637 = vmatpush.msra.mxu1 %v2765_v28  ;;  %656 = vmatpush.msra.mxu2 %v2771_v30  ;;  %3700 = vst [vmem:[#allocation29_spill] sm:$0xff] %v2813_v51 }
  0x4b   :  { %624 = vmatpush.msrb.mxu0 %v2755_v23  ;;  %678 = vmatpush.msrb.mxu3 %v2797_v40  ;;  %3701 = vst [vmem:[#allocation30_spill] sm:$0xff] %v2817_v55 }
  0x4c   :  { %1972 = vmatmul.msk.f32.gmra.mxu1 %vm74_vm0, %v2612_v33  ;;  %v2784_v33 = vld [vmem:[#allocation9 + $0xf0] sm:$0xff]  ;;  %3702 = vst [vmem:[#allocation31_spill] sm:$0xff] %v2820_v57 }
  0x4d   :  { %763 = vmatpush.msra.mxu0 %v2500_v47  ;;  %638 = vmatpush.msra.mxu1 %v2781_v35  ;;  %3703 = vst [vmem:[#allocation32_spill] sm:$0xff] %v2825_v59 }
  0x4e   :  { %657 = vmatpush.msra.mxu2 %v2784_v33  ;;  %679 = vmatpush.msrb.mxu3 %v2811_v49  ;;  %3704 = vst [vmem:[#allocation33_spill] sm:$0xff] %v2830_v62 }
  0x4f   :  { %764 = vmatpush.msra.mxu0 %v2526_v58  ;;  %639 = vmatpush.msra.mxu1 %v2793_v39  ;;  %3705 = vst [vmem:[#allocation34_spill] sm:$0xff] %v2832_v63  ;;  %v2858_v58 = vld [vmem:[#allocation9 + $0x18] sm:$0xff] }
  0x50   :  { %1967 = vmatmul.msk.f32.gmra.mxu0 %vm74_vm0, %v2773_v32  ;;  %1991 = vmatmul.msk.f32.gmra.mxu3 %vm74_vm0, %v2773_v32  ;;  %3707 = vst [vmem:[#allocation36_spill] sm:$0xff] %v2839_v5 }
  0x51   :  { %1982 = vmatmul.msk.f32.gmra.mxu2 %vm74_vm0, %v2729_v15  ;;  %640 = vmatpush.msra.mxu1 %v2805_v45  ;;  %3708 = vst [vmem:[#allocation37_spill] sm:$0xff] %v2848_v7 }
  0x52   :  { %658 = vmatpush.msra.mxu2 %v2800_v41  ;;  %765 = vmatpush.msra.mxu0 %v2541_v3  ;;  %v2852_v3 = vld [vmem:[#allocation9 + $0x50] sm:$0xff]  ;;  %3712 = vst [vmem:[#allocation41_spill] sm:$0xff] %v2858_v58 }
  0x53   :  { %680 = vmatpush.msrb.mxu3 %v2817_v55  ;;  %641 = vmatpush.msra.mxu1 %v2820_v57  ;;  %3710 = vst [vmem:[#allocation39_spill] sm:$0xff] %v2852_v3 }
  0x54   :  { %1973 = vmatmul.msk.f32.gmra.mxu1 %vm74_vm0, %v2689_v4  ;;  %659 = vmatpush.msra.mxu2 %v2813_v51  ;;  %v2836_v4 = vld [vmem:[#allocation9 + $0x58] sm:$0xff] }
  0x55   :  { %3706 = vst [vmem:[#allocation35_spill] sm:$0xff] %v2836_v4  ;;  %766 = vmatpush.msra.mxu0 %v2556_v10  ;;  %681 = vmatpush.msrb.mxu3 %v2830_v62  ;;  %v2856_v10 = vld [vmem:[#allocation9 + $0x8] sm:$0xff] }
  0x56   :  { %660 = vmatpush.msra.mxu2 %v2825_v59  ;;  %642 = vmatpush.msra.mxu1 %v2832_v63  ;;  %3711 = vst [vmem:[#allocation40_spill] sm:$0xff] %v2856_v10 }
  0x57   :  { %682 = vmatpush.msrb.mxu3 %v2836_v4  ;;  %767 = vmatpush.msra.mxu0 %v2571_v17  ;;  %v2869_v4 = vld [vmem:[#allocation9 + $0x10] sm:$0xff] }
  0x58   :  { %1992 = vmatmul.msk.f32.gmra.mxu3 %vm74_vm0, %v2504_v48  ;;  %625 = vmatmul.f32.vlgmr.msrb.gmra.mxu0 %v3586_v1  ;;  %v2850_v1 = vld [vmem:[#allocation9 + $0x28] sm:$0xff]  ;;  %3714 = vst [vmem:[#allocation43_spill] sm:$0xff] %v2869_v4 }
  0x59   :  { %1983 = vmatmul.msk.f32.gmra.mxu2 %vm74_vm0, %v2773_v32  ;;  %3709 = vst [vmem:[#allocation38_spill] sm:$0xff] %v2850_v1  ;;  %643 = vmatpush.msra.mxu1 %v2850_v1 }
  0x5a   :  { %661 = vmatpush.msra.mxu2 %v2839_v5  ;;  %683 = vmatpush.msrb.mxu3 %v2848_v7 }
  0x5b   :  { %644 = vmatpush.msra.mxu1 %v2856_v10  ;;  %768 = vmatpush.msra.mxu0 %v2590_v25 }
  0x5c   :  { %1974 = vmatmul.msk.f32.gmra.mxu1 %vm74_vm0, %v2729_v15  ;;  %v2861_v15 = vld [vmem:[#allocation9 + $0x30] sm:$0xff]  ;;  %662 = vmatpush.msra.mxu2 %v2852_v3 }
  0x5d   :  { %3713 = vst [vmem:[#allocation42_spill] sm:$0xff] %v2861_v15  ;;  %684 = vmatpush.msrb.mxu3 %v2858_v58  ;;  %783 = vmatpush.msrb.mxu1 %v2598_v29 }
  0x5e   :  { %663 = vmatpush.msra.mxu2 %v2861_v15  ;;  %769 = vmatpush.msra.mxu0 %v2606_v31 }
  0x5f   :  { %823 = vmatpush.msra.mxu3 %v2592_v26  ;;  %784 = vmatpush.msrb.mxu1 %v2640_v43 }
  0x60   :  { %1993 = vmatmul.msk.f32.gmra.mxu3 %vm74_vm0, %v2648_v46  ;;  %664 = vmatpush.msra.mxu2 %v2869_v4 }
  0x61   :  { %1984 = vmatmul.msk.f32.gmra.mxu2 %vm74_vm0, %v2504_v48  ;;  %824 = vmatpush.msra.mxu3 %v2637_v42 }
  0x62   :  { %803 = vmatpush.msrb.mxu2 %v2626_v36  ;;  %785 = vmatpush.msrb.mxu1 %v2664_v53 }
  0x63   :  { %770 = vmatpush.msra.mxu0 %v2643_v44  ;;  %825 = vmatpush.msra.mxu3 %v2657_v52 }
  0x64   :  { %1975 = vmatmul.msk.f32.gmra.mxu1 %vm74_vm0, %v2773_v32  ;;  %804 = vmatpush.msrb.mxu2 %v2653_v50  ;;  %v3715_v32 = vmov 0.0  }
  0x65   :  { %786 = vmatpush.msrb.mxu1 %v2678_v60  ;;  %771 = vmatpush.msra.mxu0 %v2666_v54 }
  0x66   :  { %805 = vmatpush.msrb.mxu2 %v2680_v61  ;;  %826 = vmatpush.msra.mxu3 %v2687_v0 }
  0x67   :  { %787 = vmatpush.msrb.mxu1 %v2704_v8  ;;  %772 = vmatpush.msra.mxu0 %v2672_v56 }
  0x68   :  { %1994 = vmatmul.msk.f32.gmra.mxu3 %vm74_vm0, %v2575_v18  ;;  %806 = vmatpush.msrb.mxu2 %v2712_v9 }
  0x69   :  { %1985 = vmatmul.msk.f32.gmra.mxu2 %vm74_vm0, %v2648_v46  ;;  %827 = vmatpush.msra.mxu3 %v2719_v12 }
  0x6a   :  { %807 = vmatpush.msrb.mxu2 %v2727_v14  ;;  %788 = vmatpush.msrb.mxu1 %v2717_v11 }
  0x6b   :  { %773 = vmatpush.msra.mxu0 %v2700_v6  ;;  %828 = vmatpush.msra.mxu3 %v2743_v20 }
  0x6c   :  { %1976 = vmatmul.msk.f32.gmra.mxu1 %vm74_vm0, %v2504_v48  ;;  %808 = vmatpush.msrb.mxu2 %v2741_v37  ;;  %v3716_v48 = vld [vmem:[#allocation35_spill] sm:$0xff] }
  0x6d   :  { %789 = vmatpush.msrb.mxu1 %v2736_v19  ;;  %774 = vmatpush.msra.mxu0 %v2710_v2 }
  0x6e   :  { %809 = vmatpush.msrb.mxu2 %v2759_v24  ;;  %829 = vmatpush.msra.mxu3 %v2763_v27 }
  0x6f   :  { %790 = vmatpush.msrb.mxu1 %v2751_v22  ;;  %775 = vmatpush.msra.mxu0 %v2725_v13 }
  0x70   :  { %685 = vmatmul.f32.vlgmr.msrb.gmra.mxu3 %v3715_v32  ;;  %810 = vmatpush.msrb.mxu2 %v2771_v30 }
  0x71   :  { %1986 = vmatmul.msk.f32.gmra.mxu2 %vm74_vm0, %v2575_v18  ;;  %830 = vmatpush.msra.mxu3 %v2778_v34 }
  0x72   :  { %791 = vmatpush.msrb.mxu1 %v2765_v28  ;;  %811 = vmatpush.msrb.mxu2 %v2784_v33 }
  0x73   :  { %831 = vmatpush.msra.mxu3 %v2791_v38  ;;  %776 = vmatpush.msra.mxu0 %v2733_v16 }
  0x74   :  { %1977 = vmatmul.msk.f32.gmra.mxu1 %vm74_vm0, %v2648_v46  ;;  %812 = vmatpush.msrb.mxu2 %v2800_v41  ;;  %v3719_v46 = vld [vmem:[#allocation19_spill] sm:$0xff] }
  0x75   :  { %792 = vmatpush.msrb.mxu1 %v2781_v35  ;;  %832 = vmatpush.msra.mxu3 %v2797_v40 }
  0x76   :  { %777 = vmatpush.msra.mxu0 %v2749_v21  ;;  %813 = vmatpush.msrb.mxu2 %v2813_v51 }
  0x77   :  { %793 = vmatpush.msrb.mxu1 %v2793_v39  ;;  %833 = vmatpush.msra.mxu3 %v2811_v49 }
  0x78   :  { %814 = vmatpush.msrb.mxu2 %v2825_v59  ;;  %778 = vmatpush.msra.mxu0 %v2755_v23 }
  0x79   :  { %665 = vmatmul.f32.vlgmr.msra.gmra.mxu2 %v3715_v32  ;;  %794 = vmatpush.msrb.mxu1 %v2805_v45 }
  0x7a   :  { %834 = vmatpush.msra.mxu3 %v2817_v55  ;;  %815 = vmatpush.msrb.mxu2 %v2839_v5 }
  0x7b   :  { %795 = vmatpush.msrb.mxu1 %v2820_v57  ;;  %917 = vmatpush.msrb.mxu0 %v2500_v47  ;;  %v3718_v47 = vld [vmem:[#allocation18_spill] sm:$0xff] }
  0x7c   :  { %1978 = vmatmul.msk.f32.gmra.mxu1 %vm74_vm0, %v2575_v18  ;;  %835 = vmatpush.msra.mxu3 %v2830_v62  ;;  %v3717_v18 = vld [vmem:[#allocation17_spill] sm:$0xff] }
  0x7d   :  { %796 = vmatpush.msrb.mxu1 %v2832_v63  ;;  %816 = vmatpush.msrb.mxu2 %v2852_v3 }
  0x7e   :  { %836 = vmatpush.msra.mxu3 %v3716_v48  ;;  %918 = vmatpush.msrb.mxu0 %v3717_v18 }
  0x7f   :  { %797 = vmatpush.msrb.mxu1 %v2850_v1  ;;  %817 = vmatpush.msrb.mxu2 %v2861_v15 }
  0x80   :  { %837 = vmatpush.msra.mxu3 %v2848_v7  ;;  %919 = vmatpush.msrb.mxu0 %v3718_v47 }
  0x81   :  { %798 = vmatpush.msrb.mxu1 %v2856_v10  ;;  %818 = vmatpush.msrb.mxu2 %v2869_v4 }
  0x82   :  { %838 = vmatpush.msra.mxu3 %v2858_v58  ;;  %920 = vmatpush.msrb.mxu0 %v3719_v46 }
  0x83   :  { %957 = vmatpush.msra.mxu2 %v2626_v36 }
  0x84   :  { %645 = vmatmul.f32.vlgmr.msra.gmra.mxu1 %v3715_v32  ;;  %977 = vmatpush.msrb.mxu3 %v2592_v26 }
  0x85   :  { %937 = vmatpush.msra.mxu1 %v2598_v29  ;;  %958 = vmatpush.msra.mxu2 %v2653_v50 }
  0x86   :  { %978 = vmatpush.msrb.mxu3 %v2637_v42  ;;  %921 = vmatpush.msrb.mxu0 %v2571_v17 }
  0x87   :  { %938 = vmatpush.msra.mxu1 %v2640_v43  ;;  %959 = vmatpush.msra.mxu2 %v2680_v61 }
  0x88   :  { %979 = vmatpush.msrb.mxu3 %v2657_v52  ;;  %922 = vmatpush.msrb.mxu0 %v2590_v25 }
  0x89   :  { %939 = vmatpush.msra.mxu1 %v2664_v53  ;;  %960 = vmatpush.msra.mxu2 %v2712_v9 }
  0x8a   :  { %980 = vmatpush.msrb.mxu3 %v2687_v0  ;;  %923 = vmatpush.msrb.mxu0 %v2606_v31 }
  0x8b   :  { %940 = vmatpush.msra.mxu1 %v2678_v60  ;;  %961 = vmatpush.msra.mxu2 %v2727_v14 }
  0x8c   :  { %981 = vmatpush.msrb.mxu3 %v2719_v12  ;;  %924 = vmatpush.msrb.mxu0 %v2643_v44 }
  0x8d   :  { %941 = vmatpush.msra.mxu1 %v2704_v8  ;;  %962 = vmatpush.msra.mxu2 %v2741_v37 }
  0x8e   :  { %982 = vmatpush.msrb.mxu3 %v2743_v20  ;;  %925 = vmatpush.msrb.mxu0 %v2666_v54 }
  0x8f   :  { %942 = vmatpush.msra.mxu1 %v2717_v11  ;;  %963 = vmatpush.msra.mxu2 %v2759_v24 }
  0x90   :  { %983 = vmatpush.msrb.mxu3 %v2763_v27  ;;  %926 = vmatpush.msrb.mxu0 %v2672_v56 }
  0x91   :  { %943 = vmatpush.msra.mxu1 %v2736_v19  ;;  %964 = vmatpush.msra.mxu2 %v2771_v30 }
  0x92   :  { %984 = vmatpush.msrb.mxu3 %v2778_v34  ;;  %927 = vmatpush.msrb.mxu0 %v2700_v6 }
  0x93   :  { %944 = vmatpush.msra.mxu1 %v2751_v22  ;;  %965 = vmatpush.msra.mxu2 %v2784_v33 }
  0x94   :  { %985 = vmatpush.msrb.mxu3 %v2791_v38  ;;  %928 = vmatpush.msrb.mxu0 %v2710_v2 }
  0x95   :  { %945 = vmatpush.msra.mxu1 %v2765_v28  ;;  %966 = vmatpush.msra.mxu2 %v2800_v41 }
  0x96   :  { %986 = vmatpush.msrb.mxu3 %v2797_v40  ;;  %929 = vmatpush.msrb.mxu0 %v2725_v13 }
  0x97   :  { %946 = vmatpush.msra.mxu1 %v2781_v35  ;;  %967 = vmatpush.msra.mxu2 %v2813_v51 }
  0x98   :  { %987 = vmatpush.msrb.mxu3 %v2811_v49  ;;  %930 = vmatpush.msrb.mxu0 %v2733_v16 }
  0x99   :  { %947 = vmatpush.msra.mxu1 %v2793_v39  ;;  %968 = vmatpush.msra.mxu2 %v2825_v59 }
  0x9a   :  { %988 = vmatpush.msrb.mxu3 %v2817_v55  ;;  %931 = vmatpush.msrb.mxu0 %v2749_v21 }
  0x9b   :  { %948 = vmatpush.msra.mxu1 %v2805_v45  ;;  %969 = vmatpush.msra.mxu2 %v2839_v5 }
  0x9c   :  { %989 = vmatpush.msrb.mxu3 %v2830_v62  ;;  %932 = vmatpush.msrb.mxu0 %v2755_v23 }
  0x9d   :  { %949 = vmatpush.msra.mxu1 %v2820_v57  ;;  %970 = vmatpush.msra.mxu2 %v2852_v3 }
  0x9e   :  { %990 = vmatpush.msrb.mxu3 %v3716_v48 }
  0x9f   :  { %950 = vmatpush.msra.mxu1 %v2832_v63  ;;  %971 = vmatpush.msra.mxu2 %v2861_v15 }
  0xa0   :  { %991 = vmatpush.msrb.mxu3 %v2848_v7 }
  0xa1   :  { %951 = vmatpush.msra.mxu1 %v2850_v1  ;;  %972 = vmatpush.msra.mxu2 %v2869_v4 }
  0xa2   :  { %992 = vmatpush.msrb.mxu3 %v2858_v58 }
  0xa3   :  { %952 = vmatpush.msra.mxu1 %v2856_v10 }
  0xa6   :  { %v359_v21 = vpop.f32.mrf.mxu0 }
  0xaa   :  { %v3016_v32 = vpop.f32.mrf.mxu1 }
  0xab   :  { %3720 = vst [vmem:[#allocation17_spill] sm:$0xff] %v3016_v32 }
  0xac   :  { %v482_v3 = vpop.f32.mrf.mxu3 }
  0xb4   :  { %v3018_v18 = vpop.f32.mrf.mxu2  ;;  %v3022_v63 = vpop.f32.mrf.mxu0 }
  0xb5   :  { %3721 = vst [vmem:[#allocation18_spill] sm:$0xff] %v3018_v18 }
  0xb6   :  { %3723 = vst [vmem:[#allocation44_spill] sm:$0xff] %v3022_v63 }
  0xb9   :  { %v3020_v48 = vpop.f32.mrf.mxu1 }
  0xba   :  { %3722 = vst [vmem:[#allocation19_spill] sm:$0xff] %v3020_v48  ;;  %v3028_v10 = vpop.f32.mrf.mxu3 }
  0xbb   :  { %3726 = vst [vmem:[#allocation47_spill] sm:$0xff] %v3028_v10 }
  0xbc   :  { %v441_v1 = vpop.f32.mrf.mxu2 }
  0xbd   :  { %v3030_v4 = vpop.f32.mrf.mxu0 }
  0xbe   :  { %3727 = vst [vmem:[#allocation48_spill] sm:$0xff] %v3030_v4 }
  0xc1   :  { %v400_v23 = vpop.f32.mrf.mxu1 }
  0xc3   :  { %v3036_v18 = vpop.f32.mrf.mxu3 }
  0xc4   :  { %v3024_v15 = vpop.f32.mrf.mxu2  ;;  %3730 = vst [vmem:[#allocation51_spill] sm:$0xff] %v3036_v18 }
  0xc5   :  { %3724 = vst [vmem:[#allocation45_spill] sm:$0xff] %v3024_v15  ;;  %v3038_v48 = vpop.f32.mrf.mxu0 }
  0xc6   :  { %3731 = vst [vmem:[#allocation52_spill] sm:$0xff] %v3038_v48 }
  0xc9   :  { %v3026_v7 = vpop.f32.mrf.mxu1 }
  0xca   :  { %3725 = vst [vmem:[#allocation46_spill] sm:$0xff] %v3026_v7 }
  0xcb   :  { %v3044_v63 = vpop.f32.mrf.mxu3 }
  0xcc   :  { %v3032_v58 = vpop.f32.mrf.mxu2  ;;  %3734 = vst [vmem:[#allocation55_spill] sm:$0xff] %v3044_v63 }
  0xcd   :  { %3728 = vst [vmem:[#allocation49_spill] sm:$0xff] %v3032_v58  ;;  %v3048_v7 = vpop.f32.mrf.mxu0 }
  0xce   :  { %3736 = vst [vmem:[#allocation57_spill] sm:$0xff] %v3048_v7 }
  0xd1   :  { %v3034_v32 = vpop.f32.mrf.mxu1 }
  0xd2   :  { %3729 = vst [vmem:[#allocation50_spill] sm:$0xff] %v3034_v32 }
  0xd3   :  { %v3054_v58 = vpop.f32.mrf.mxu3 }
  0xd4   :  { %v3040_v16 = vpop.f32.mrf.mxu2  ;;  %3739 = vst [vmem:[#allocation60_spill] sm:$0xff] %v3054_v58 }
  0xd5   :  { %3732 = vst [vmem:[#allocation53_spill] sm:$0xff] %v3040_v16  ;;  %v626_v18 = vpop.f32.mrf.mxu0 }
  0xd6   :  { %v689_v48 = vadd.f32 %v626_v18, %v359_v21 }
  0xd9   :  { %v3042_v62 = vpop.f32.mrf.mxu1 }
  0xda   :  { %3733 = vst [vmem:[#allocation54_spill] sm:$0xff] %v3042_v62  ;;  %v1995_v62 = vmul.f32 -1.442695, %v689_v48 }
  0xdb   :  { %v3062_v63 = vpop.f32.mrf.mxu3 }
  0xdc   :  { %v3046_v15 = vpop.f32.mrf.mxu2  ;;  %3743 = vst [vmem:[#allocation64_spill] sm:$0xff] %v3062_v63  ;;  %2046 = vpow2.f32 %v1995_v62 }
  0xdd   :  { %3735 = vst [vmem:[#allocation56_spill] sm:$0xff] %v3046_v15 }
  0xe1   :  { %v3050_v10 = vpop.f32.mrf.mxu1 }
  0xe2   :  { %3737 = vst [vmem:[#allocation58_spill] sm:$0xff] %v3050_v10  ;;  %v2047_v10 = vpop.eup %2046 }
  0xe3   :  { %v702_v58 = vadd.f32 1.0, %v2047_v10 }
  0xe4   :  { %v3052_v4 = vpop.f32.mrf.mxu2 }
  0xe5   :  { %3738 = vst [vmem:[#allocation59_spill] sm:$0xff] %v3052_v4  ;;  %v3068_v4 = vpop.f32.mrf.mxu3  ;;  %2048 = vrcp.f32 %v702_v58  ;;  %vm710_vm1 = vweird.f32 %v702_v58  ;;  %v714_v59 = vand.u32 2147483647, %v702_v58 }
  0xe6   :  { %3746 = vst [vmem:[#allocation67_spill] sm:$0xff] %v3068_v4 }
  0xe7   :  { %vm715_vm10 = vcmp.eq.f32.partialorder %v714_v59, 8.507059e+37 }
  0xe9   :  { %v3056_v32 = vpop.f32.mrf.mxu1 }
  0xea   :  { %3740 = vst [vmem:[#allocation61_spill] sm:$0xff] %v3056_v32 }
  0xeb   :  { %v2049_v62 = vpop.eup %2048 }
  0xec   :  { %v3058_v5 = vpop.f32.mrf.mxu2  ;;  %vm711_vm0 = vweird.f32 %v2049_v62 }
  0xed   :  { %3741 = vst [vmem:[#allocation62_spill] sm:$0xff] %v3058_v5  ;;  %v3070_v48 = vpop.f32.mrf.mxu3  ;;  %vm712_vm7 = vmor %vm710_vm1, %vm711_vm0 }
  0xee   :  { %3747 = vst [vmem:[#allocation68_spill] sm:$0xff] %v3070_v48  ;;  %v716_v48 = vand.u32 2147483648, %v702_v58 }
  0xf1   :  { %v3060_v16 = vpop.f32.mrf.mxu1 }
  0xf2   :  { %3742 = vst [vmem:[#allocation63_spill] sm:$0xff] %v3060_v16 }
  0xf4   :  { %v3064_v15 = vpop.f32.mrf.mxu2 }
  0xf5   :  { %3744 = vst [vmem:[#allocation65_spill] sm:$0xff] %v3064_v15  ;;  %v686_v4 = vpop.f32.mrf.mxu3 }
  0xf9   :  { %v3066_v7 = vpop.f32.mrf.mxu1 }
  0xfa   :  { %3745 = vst [vmem:[#allocation66_spill] sm:$0xff] %v3066_v7  ;;  %v706_v7 = vmul.f32 %v2049_v62, %v702_v58 }
  0xfc   :  { %v666_v57 = vpop.f32.mrf.mxu2  ;;  %v707_v10 = vsub.f32 1.0, %v706_v7 }
  0xfd   :  { %v691_v32 = vadd.f32 %v666_v57, %v441_v1  ;;  %v692_v1 = vadd.f32 %v686_v4, %v482_v3 }
  0xff   :  { %v1997_v18 = vmul.f32 -1.442695, %v691_v32 }
 0x101   :  { %v646_v13 = vpop.f32.mrf.mxu1  ;;  %2050 = vpow2.f32 %v1997_v18 }
 0x102   :  { %v690_v21 = vadd.f32 %v646_v13, %v400_v23  ;;  %v708_v13 = vmul.f32 %v2049_v62, %v707_v10  ;;  %v717_v10 = vor.u32 1.1754944e-38, %v716_v48 }
 0x104   :  { %v1996_v5 = vmul.f32 -1.442695, %v690_v21  ;;  %v709_v18 = vadd.f32 %v2049_v62, %v708_v13 }
 0x106   :  { %2052 = vpow2.f32 %v1996_v5  ;;  %v713_v2 = vsel %vm712_vm7, %v2049_v62, %v709_v18 }
 0x107   :  { %v2051_v16 = vpop.eup %2050 }
 0x108   :  { %v704_v15 = vadd.f32 1.0, %v2051_v16 }
 0x10a   :  { %2054 = vrcp.f32 %v704_v15  ;;  %vm740_vm13 = vweird.f32 %v704_v15 }
 0x10c   :  { %v2053_v63 = vpop.eup %2052 }
 0x10d   :  { %v703_v55 = vadd.f32 1.0, %v2053_v63 }
 0x10f   :  { %2056 = vrcp.f32 %v703_v55  ;;  %v731_v16 = vand.u32 2147483648, %v703_v55  ;;  %v729_v63 = vand.u32 2147483647, %v703_v55  ;;  %vm725_vm8 = vweird.f32 %v703_v55 }
 0x110   :  { %v2055_v57 = vpop.eup %2054  ;;  %2058 = vtanh.f32 %v692_v1 }
 0x111   :  { %v736_v21 = vmul.f32 %v2055_v57, %v704_v15  ;;  %v732_v1 = vor.u32 1.1754944e-38, %v731_v16  ;;  %vm730_vm11 = vcmp.eq.f32.partialorder %v729_v63, 8.507059e+37  ;;  %vm741_vm12 = vweird.f32 %v2055_v57  ;;  %v3772_v16 = vld [vmem:[#allocation44_spill] sm:$0xff] }
 0x112   :  { %vm742_vm14 = vmor %vm740_vm13, %vm741_vm12 }
 0x113   :  { %v737_v7 = vsub.f32 1.0, %v736_v21  ;;  %v746_v21 = vand.u32 2147483648, %v704_v15 }
 0x115   :  { %v2057_v23 = vpop.eup %2056  ;;  %v738_v51 = vmul.f32 %v2055_v57, %v737_v7  ;;  %v747_v48 = vor.u32 1.1754944e-38, %v746_v21  ;;  %v3773_v7 = vld [vmem:[#allocation46_spill] sm:$0xff] }
 0x116   :  { %v721_v32 = vmul.f32 %v2057_v23, %v703_v55  ;;  %vm726_vm6 = vweird.f32 %v2057_v23  ;;  %v2059_v4 = vpop.eup %2058 }
 0x117   :  { %vm727_vm9 = vmor %vm725_vm8, %vm726_vm6  ;;  %v739_v6 = vadd.f32 %v2055_v57, %v738_v51  ;;  %v3767_v51 = vld [vmem:[#allocation37_spill] sm:$0xff] }
 0x118   :  { %v722_v5 = vsub.f32 1.0, %v721_v32  ;;  %v718_v32 = vsel %vm715_vm10, %v717_v10, %v713_v2 }
 0x119   :  { %v752_v39 = vmul.f32 %v2059_v4, %v718_v32  ;;  %v743_v55 = vsel %vm742_vm14, %v2055_v57, %v739_v6  ;;  %v3081_v6 = vld [vmem:[#allocation9 + $0x1c0] sm:$0xff]  ;;  %v3771_v57 = vld [vmem:[#allocation41_spill] sm:$0xff] }
 0x11a   :  { %v723_v45 = vmul.f32 %v2057_v23, %v722_v5 }
 0x11c   :  { %v724_v3 = vadd.f32 %v2057_v23, %v723_v45  ;;  %v744_v45 = vand.u32 2147483647, %v704_v15  ;;  %v3768_v15 = vld [vmem:[#allocation25_spill] sm:$0xff] }
 0x11e   :  { %v728_v13 = vsel %vm727_vm9, %v2057_v23, %v724_v3  ;;  %vm745_vm15 = vcmp.eq.f32.partialorder %v744_v45, 8.507059e+37 }
 0x11f   :  { %v733_v49 = vsel %vm730_vm11, %v732_v1, %v728_v13  ;;  %v748_v62 = vsel %vm745_vm15, %v747_v48, %v743_v55  ;;  %v3774_v13 = vld [vmem:[#allocation45_spill] sm:$0xff] }
 0x120   :  { %v751_v58 = vmul.f32 0.0, %v733_v49  ;;  %v3766_v49 = vld [vmem:[#allocation42_spill] sm:$0xff] }
 0x122   :  { %v3072_v5 = vadd.f32 %v752_v39, %v751_v58  ;;  %v3075_v39 = vld [vmem:[#allocation9 + $0x1e0] sm:$0xff] }
 0x124   :  { %2060 = vtanh.f32 %v3072_v5 }
 0x12a   :  { %v2061_v59 = vpop.eup %2060 }
 0x12b   :  { %v755_v2 = vmul.f32 %v2061_v59, %v748_v62 }
 0x12d   :  { %779 = vmatmul.f32.vlgmr.msra.gmra.mxu0 %v755_v2  ;;  %799 = vmatmul.f32.vlgmr.msrb.gmra.mxu1 %v755_v2 }
 0x12e   :  { %819 = vmatmul.f32.vlgmr.msrb.gmra.mxu2 %v755_v2  ;;  %839 = vmatmul.f32.vlgmr.msra.gmra.mxu3 %v755_v2 }
 0x12f   :  { %1071 = vmatpush.msra.mxu0 %v3075_v39  ;;  %1091 = vmatpush.msrb.mxu1 %v2598_v29  ;;  %v3751_v29 = vld [vmem:[#allocation28_spill] sm:$0xff] }
 0x130   :  { %1111 = vmatpush.msrb.mxu2 %v2626_v36  ;;  %1131 = vmatpush.msra.mxu3 %v2592_v26  ;;  %v3750_v26 = vld [vmem:[#allocation29_spill] sm:$0xff]  ;;  %v3753_v36 = vld [vmem:[#allocation27_spill] sm:$0xff] }
 0x131   :  { %1072 = vmatpush.msra.mxu0 %v3081_v6  ;;  %1092 = vmatpush.msrb.mxu1 %v2640_v43  ;;  %v3755_v43 = vld [vmem:[#allocation30_spill] sm:$0xff] }
 0x132   :  { %1112 = vmatpush.msrb.mxu2 %v2653_v50  ;;  %1132 = vmatpush.msra.mxu3 %v2637_v42  ;;  %v3754_v42 = vld [vmem:[#allocation32_spill] sm:$0xff]  ;;  %v3757_v50 = vld [vmem:[#allocation31_spill] sm:$0xff] }
 0x133   :  { %1073 = vmatpush.msra.mxu0 %v3718_v47  ;;  %1093 = vmatpush.msrb.mxu1 %v2664_v53  ;;  %v3759_v53 = vld [vmem:[#allocation33_spill] sm:$0xff]  ;;  %v3769_v47 = vld [vmem:[#allocation40_spill] sm:$0xff] }
 0x134   :  { %1113 = vmatpush.msrb.mxu2 %v2680_v61  ;;  %1133 = vmatpush.msra.mxu3 %v2657_v52  ;;  %v3758_v52 = vld [vmem:[#allocation36_spill] sm:$0xff]  ;;  %v3763_v61 = vld [vmem:[#allocation35_spill] sm:$0xff] }
 0x135   :  { %1074 = vmatpush.msra.mxu0 %v3719_v46  ;;  %1094 = vmatpush.msrb.mxu1 %v2678_v60  ;;  %v3762_v60 = vld [vmem:[#allocation39_spill] sm:$0xff] }
 0x136   :  { %1114 = vmatpush.msrb.mxu2 %v2712_v9  ;;  %1134 = vmatpush.msra.mxu3 %v2687_v0  ;;  %v3764_v0 = vld [vmem:[#allocation24_spill] sm:$0xff]  ;;  %v3770_v46 = vld [vmem:[#allocation43_spill] sm:$0xff] }
 0x137   :  { %1075 = vmatpush.msra.mxu0 %v2571_v17  ;;  %1095 = vmatpush.msrb.mxu1 %v2704_v8  ;;  %v3748_v17 = vld [vmem:[#allocation20_spill] sm:$0xff]  ;;  %v3765_v8 = vld [vmem:[#allocation38_spill] sm:$0xff] }
 0x138   :  { %1115 = vmatpush.msrb.mxu2 %v2727_v14  ;;  %1135 = vmatpush.msra.mxu3 %v2719_v12 }
 0x139   :  { %1076 = vmatpush.msra.mxu0 %v2590_v25  ;;  %1096 = vmatpush.msrb.mxu1 %v2717_v11  ;;  %v3749_v25 = vld [vmem:[#allocation26_spill] sm:$0xff] }
 0x13a   :  { %1116 = vmatpush.msrb.mxu2 %v2741_v37  ;;  %1136 = vmatpush.msra.mxu3 %v2743_v20 }
 0x13b   :  { %1077 = vmatpush.msra.mxu0 %v2606_v31  ;;  %1097 = vmatpush.msrb.mxu1 %v2736_v19  ;;  %v3752_v31 = vld [vmem:[#allocation21_spill] sm:$0xff] }
 0x13c   :  { %1117 = vmatpush.msrb.mxu2 %v2759_v24  ;;  %1137 = vmatpush.msra.mxu3 %v2763_v27 }
 0x13d   :  { %1078 = vmatpush.msra.mxu0 %v2643_v44  ;;  %1098 = vmatpush.msrb.mxu1 %v2751_v22  ;;  %v3756_v44 = vld [vmem:[#allocation22_spill] sm:$0xff] }
 0x13e   :  { %1118 = vmatpush.msrb.mxu2 %v2771_v30  ;;  %1138 = vmatpush.msra.mxu3 %v2778_v34 }
 0x13f   :  { %1079 = vmatpush.msra.mxu0 %v2666_v54  ;;  %1099 = vmatpush.msrb.mxu1 %v2765_v28  ;;  %v3760_v54 = vld [vmem:[#allocation23_spill] sm:$0xff] }
 0x140   :  { %1119 = vmatpush.msrb.mxu2 %v2784_v33  ;;  %1139 = vmatpush.msra.mxu3 %v2791_v38 }
 0x141   :  { %1080 = vmatpush.msra.mxu0 %v2672_v56  ;;  %1100 = vmatpush.msrb.mxu1 %v2781_v35  ;;  %v3761_v56 = vld [vmem:[#allocation34_spill] sm:$0xff] }
 0x142   :  { %1120 = vmatpush.msrb.mxu2 %v2800_v41  ;;  %1140 = vmatpush.msra.mxu3 %v2797_v40 }
 0x143   :  { %1081 = vmatpush.msra.mxu0 %v3748_v17  ;;  %1101 = vmatpush.msrb.mxu1 %v3749_v25 }
 0x144   :  { %1121 = vmatpush.msrb.mxu2 %v3750_v26  ;;  %1141 = vmatpush.msra.mxu3 %v3751_v29 }
 0x145   :  { %1082 = vmatpush.msra.mxu0 %v3752_v31  ;;  %1102 = vmatpush.msrb.mxu1 %v3753_v36  ;;  %v3775_v31 = vld [vmem:[#allocation47_spill] sm:$0xff] }
 0x146   :  { %1122 = vmatpush.msrb.mxu2 %v3754_v42  ;;  %1142 = vmatpush.msra.mxu3 %v3755_v43 }
 0x147   :  { %1083 = vmatpush.msra.mxu0 %v3756_v44  ;;  %1103 = vmatpush.msrb.mxu1 %v3757_v50 }
 0x148   :  { %1123 = vmatpush.msrb.mxu2 %v3758_v52  ;;  %1143 = vmatpush.msra.mxu3 %v3759_v53 }
 0x149   :  { %1084 = vmatpush.msra.mxu0 %v3760_v54  ;;  %1104 = vmatpush.msrb.mxu1 %v3761_v56 }
 0x14a   :  { %1124 = vmatpush.msrb.mxu2 %v3762_v60  ;;  %1144 = vmatpush.msra.mxu3 %v3763_v61 }
 0x14b   :  { %1085 = vmatpush.msra.mxu0 %v3764_v0  ;;  %1105 = vmatpush.msrb.mxu1 %v3765_v8 }
 0x14c   :  { %1125 = vmatpush.msrb.mxu2 %v3766_v49  ;;  %1145 = vmatpush.msra.mxu3 %v3767_v51 }
 0x14d   :  { %1086 = vmatpush.msra.mxu0 %v3768_v15  ;;  %1106 = vmatpush.msrb.mxu1 %v3769_v47 }
 0x14e   :  { %1126 = vmatpush.msrb.mxu2 %v3770_v46  ;;  %1146 = vmatpush.msra.mxu3 %v3771_v57 }
 0x1aa   :  { %v780_v23 = vpop.f32.mrf.mxu0  ;;  %v800_v18 = vpop.f32.mrf.mxu1 }
 0x1ab   :  { %v843_v63 = vadd.f32 %v780_v23, %v3772_v16  ;;  %v844_v3 = vadd.f32 %v800_v18, %v3773_v7 }
 0x1ad   :  { %v1998_v4 = vmul.f32 -1.442695, %v843_v63  ;;  %v1999_v10 = vmul.f32 -1.442695, %v844_v3 }
 0x1af   :  { %2062 = vpow2.f32 %v1998_v4 }
 0x1b0   :  { %2064 = vpow2.f32 %v1999_v10 }
 0x1b1   :  { %v820_v1 = vpop.f32.mrf.mxu2  ;;  %v840_v59 = vpop.f32.mrf.mxu3 }
 0x1b2   :  { %v845_v32 = vadd.f32 %v820_v1, %v3774_v13  ;;  %v846_v44 = vadd.f32 %v840_v59, %v3775_v31 }
 0x1b4   :  { %v2000_v58 = vmul.f32 -1.442695, %v845_v32 }
 0x1b5   :  { %v2063_v21 = vpop.eup %2062 }
 0x1b6   :  { %v2065_v45 = vpop.eup %2064  ;;  %v856_v55 = vadd.f32 1.0, %v2063_v21  ;;  %2066 = vpow2.f32 %v2000_v58 }
 0x1b7   :  { %v857_v48 = vadd.f32 1.0, %v2065_v45 }
 0x1b8   :  { %2068 = vrcp.f32 %v856_v55  ;;  %v870_v16 = vand.u32 2147483648, %v856_v55  ;;  %v868_v3 = vand.u32 2147483647, %v856_v55  ;;  %vm864_vm4 = vweird.f32 %v856_v55 }
 0x1b9   :  { %2070 = vrcp.f32 %v857_v48  ;;  %v885_v63 = vand.u32 2147483648, %v857_v48  ;;  %v883_v10 = vand.u32 2147483647, %v857_v48  ;;  %vm879_vm5 = vweird.f32 %v857_v48 }
 0x1ba   :  { %v871_v58 = vor.u32 1.1754944e-38, %v870_v16  ;;  %vm869_vm6 = vcmp.eq.f32.partialorder %v868_v3, 8.507059e+37 }
 0x1bb   :  { %v886_v45 = vor.u32 1.1754944e-38, %v885_v63  ;;  %vm884_vm7 = vcmp.eq.f32.partialorder %v883_v10, 8.507059e+37 }
 0x1bc   :  { %v2067_v62 = vpop.eup %2066 }
 0x1bd   :  { %v858_v2 = vadd.f32 1.0, %v2067_v62 }
 0x1be   :  { %v2069_v17 = vpop.eup %2068 }
 0x1bf   :  { %v2071_v54 = vpop.eup %2070  ;;  %v860_v0 = vmul.f32 %v2069_v17, %v856_v55  ;;  %2072 = vrcp.f32 %v858_v2  ;;  %vm865_vm2 = vweird.f32 %v2069_v17  ;;  %v900_v16 = vand.u32 2147483648, %v858_v2 }
 0x1c0   :  { %v875_v15 = vmul.f32 %v2071_v54, %v857_v48  ;;  %2074 = vtanh.f32 %v846_v44  ;;  %vm880_vm3 = vweird.f32 %v2071_v54  ;;  %vm866_vm0 = vmor %vm864_vm4, %vm865_vm2  ;;  %vm894_vm9 = vweird.f32 %v858_v2 }
 0x1c1   :  { %v861_v23 = vsub.f32 1.0, %v860_v0  ;;  %vm881_vm1 = vmor %vm879_vm5, %vm880_vm3  ;;  %v901_v3 = vor.u32 1.1754944e-38, %v900_v16 }
 0x1c2   :  { %v876_v18 = vsub.f32 1.0, %v875_v15 }
 0x1c3   :  { %v862_v7 = vmul.f32 %v2069_v17, %v861_v23 }
 0x1c4   :  { %v877_v4 = vmul.f32 %v2071_v54, %v876_v18 }
 0x1c5   :  { %v2073_v1 = vpop.eup %2072  ;;  %v863_v13 = vadd.f32 %v2069_v17, %v862_v7 }
 0x1c6   :  { %v890_v32 = vmul.f32 %v2073_v1, %v858_v2  ;;  %v878_v21 = vadd.f32 %v2071_v54, %v877_v4  ;;  %v2075_v62 = vpop.eup %2074  ;;  %vm895_vm8 = vweird.f32 %v2073_v1 }
 0x1c7   :  { %v867_v59 = vsel %vm866_vm0, %v2069_v17, %v863_v13  ;;  %v898_v17 = vand.u32 2147483647, %v858_v2  ;;  %vm896_vm10 = vmor %vm894_vm9, %vm895_vm8  ;;  %v3155_v13 = vld [vmem:[#allocation9 + $0x1f0] sm:$0xff]  ;;  %v3158_v2 = vld [vmem:[#allocation9 + $0x1f8] sm:$0xff] }
 0x1c8   :  { %v891_v31 = vsub.f32 1.0, %v890_v32  ;;  %v872_v44 = vsel %vm869_vm6, %v871_v58, %v867_v59  ;;  %v882_v0 = vsel %vm881_vm1, %v2071_v54, %v878_v21  ;;  %v3165_v32 = vld [vmem:[#allocation9 + $0x1d0] sm:$0xff]  ;;  %v3168_v58 = vld [vmem:[#allocation9 + $0x1d8] sm:$0xff]  ;;  %v3171_v21 = vld [vmem:[#allocation9 + $0x1a0] sm:$0xff] }
 0x1c9   :  { %v887_v15 = vsel %vm884_vm7, %v886_v45, %v882_v0  ;;  %v906_v23 = vmul.f32 %v2075_v62, %v872_v44  ;;  %vm899_vm11 = vcmp.eq.f32.partialorder %v898_v17, 8.507059e+37  ;;  %v3174_v45 = vld [vmem:[#allocation9 + $0x1a8] sm:$0xff]  ;;  %v3177_v59 = vld [vmem:[#allocation9 + $0x1b0] sm:$0xff]  ;;  %v3180_v62 = vld [vmem:[#allocation9 + $0x1b8] sm:$0xff] }
 0x1ca   :  { %v905_v18 = vmul.f32 %v887_v15, %v3072_v5  ;;  %v892_v7 = vmul.f32 %v2073_v1, %v891_v31  ;;  %v3152_v5 = vld [vmem:[#allocation9 + $0x1e8] sm:$0xff]  ;;  %v3183_v31 = vld [vmem:[#allocation9 + $0x180] sm:$0xff]  ;;  %v3190_v0 = vld [vmem:[#allocation9 + $0x198] sm:$0xff] }
 0x1cb   :  { %v3186_v44 = vld [vmem:[#allocation9 + $0x188] sm:$0xff]  ;;  %v3193_v15 = vld [vmem:[#allocation9 + $0x160] sm:$0xff] }
 0x1cc   :  { %v3148_v55 = vadd.f32 %v906_v23, %v905_v18  ;;  %v893_v48 = vadd.f32 %v2073_v1, %v892_v7  ;;  %v3196_v23 = vld [vmem:[#allocation9 + $0x168] sm:$0xff]  ;;  %v3201_v18 = vld [vmem:[#allocation9 + $0x140] sm:$0xff] }
 0x1ce   :  { %2076 = vtanh.f32 %v3148_v55  ;;  %v897_v63 = vsel %vm896_vm10, %v2073_v1, %v893_v48  ;;  %v3162_v1 = vld [vmem:[#allocation9 + $0x1c8] sm:$0xff] }
 0x1cf   :  { %v902_v4 = vsel %vm899_vm11, %v901_v3, %v897_v63 }
 0x1d4   :  { %v2077_v54 = vpop.eup %2076 }
 0x1d5   :  { %v909_v10 = vmul.f32 %v2077_v54, %v902_v4 }
 0x1d7   :  { %933 = vmatmul.f32.vlgmr.msrb.gmra.mxu0 %v909_v10  ;;  %953 = vmatmul.f32.vlgmr.msra.gmra.mxu1 %v909_v10 }
 0x1d8   :  { %973 = vmatmul.f32.vlgmr.msra.gmra.mxu2 %v909_v10  ;;  %993 = vmatmul.f32.vlgmr.msrb.gmra.mxu3 %v909_v10 }
 0x1d9   :  { %1225 = vmatpush.msrb.mxu0 %v3075_v39  ;;  %1245 = vmatpush.msra.mxu1 %v3152_v5 }
 0x1da   :  { %1265 = vmatpush.msra.mxu2 %v3155_v13  ;;  %1285 = vmatpush.msrb.mxu3 %v3158_v2 }
 0x1db   :  { %1226 = vmatpush.msrb.mxu0 %v3081_v6  ;;  %1246 = vmatpush.msra.mxu1 %v3162_v1 }
 0x1dc   :  { %1266 = vmatpush.msra.mxu2 %v3165_v32  ;;  %1286 = vmatpush.msrb.mxu3 %v3168_v58 }
 0x1dd   :  { %1227 = vmatpush.msrb.mxu0 %v3171_v21  ;;  %1247 = vmatpush.msra.mxu1 %v3174_v45 }
 0x1de   :  { %1267 = vmatpush.msra.mxu2 %v3177_v59  ;;  %1287 = vmatpush.msrb.mxu3 %v3180_v62 }
 0x1df   :  { %1228 = vmatpush.msrb.mxu0 %v3183_v31  ;;  %1248 = vmatpush.msra.mxu1 %v3186_v44 }
 0x1e0   :  { %1268 = vmatpush.msra.mxu2 %v2712_v9  ;;  %1288 = vmatpush.msrb.mxu3 %v3190_v0  ;;  %v3207_v9 = vld [vmem:[#allocation9 + $0x120] sm:$0xff] }
 0x1e1   :  { %1229 = vmatpush.msrb.mxu0 %v3193_v15  ;;  %1249 = vmatpush.msra.mxu1 %v3196_v23 }
 0x1e2   :  { %1269 = vmatpush.msra.mxu2 %v2727_v14  ;;  %1289 = vmatpush.msrb.mxu3 %v2719_v12  ;;  %v3213_v12 = vld [vmem:[#allocation9 + $0x100] sm:$0xff] }
 0x1e3   :  { %1230 = vmatpush.msrb.mxu0 %v3201_v18  ;;  %1250 = vmatpush.msra.mxu1 %v2717_v11  ;;  %v3219_v11 = vld [vmem:[#allocation9 + $0xe0] sm:$0xff] }
 0x1e4   :  { %1270 = vmatpush.msra.mxu2 %v2741_v37  ;;  %1290 = vmatpush.msrb.mxu3 %v2743_v20  ;;  %v3225_v14 = vld [vmem:[#allocation9 + $0xc0] sm:$0xff] }
 0x1e5   :  { %1231 = vmatpush.msrb.mxu0 %v3207_v9  ;;  %1251 = vmatpush.msra.mxu1 %v2736_v19  ;;  %v3231_v19 = vld [vmem:[#allocation9 + $0xa0] sm:$0xff] }
 0x1e6   :  { %1271 = vmatpush.msra.mxu2 %v2759_v24  ;;  %1291 = vmatpush.msrb.mxu3 %v2763_v27  ;;  %3776 = vst [vmem:[#allocation20_spill] sm:$0xff] %v3231_v19  ;;  %v3237_v37 = vld [vmem:[#allocation9 + $0x80] sm:$0xff] }
 0x1e7   :  { %1232 = vmatpush.msrb.mxu0 %v3213_v12  ;;  %1252 = vmatpush.msra.mxu1 %v2751_v22  ;;  %3777 = vst [vmem:[#allocation26_spill] sm:$0xff] %v3237_v37  ;;  %v3243_v20 = vld [vmem:[#allocation9 + $0x60] sm:$0xff] }
 0x1e8   :  { %1272 = vmatpush.msra.mxu2 %v2771_v30  ;;  %1292 = vmatpush.msrb.mxu3 %v2778_v34  ;;  %3778 = vst [vmem:[#allocation29_spill] sm:$0xff] %v3243_v20  ;;  %v3249_v22 = vld [vmem:[#allocation9 + $0x40] sm:$0xff] }
 0x1e9   :  { %1233 = vmatpush.msrb.mxu0 %v3219_v11  ;;  %1253 = vmatpush.msra.mxu1 %v2765_v28  ;;  %3779 = vst [vmem:[#allocation28_spill] sm:$0xff] %v3249_v22  ;;  %v3255_v24 = vld [vmem:[#allocation9 + $0x20] sm:$0xff] }
 0x1ea   :  { %1273 = vmatpush.msra.mxu2 %v2784_v33  ;;  %1293 = vmatpush.msrb.mxu3 %v2791_v38  ;;  %3780 = vst [vmem:[#allocation21_spill] sm:$0xff] %v3255_v24  ;;  %v3261_v27 = vld [vmem:[#allocation9] sm:$0xff]  ;;  %v3783_v33 = vld [vmem:[#allocation50_spill] sm:$0xff] }
 0x1eb   :  { %1234 = vmatpush.msrb.mxu0 %v3225_v14  ;;  %1254 = vmatpush.msra.mxu1 %v2781_v35  ;;  %3781 = vst [vmem:[#allocation27_spill] sm:$0xff] %v3261_v27  ;;  %v3782_v34 = vld [vmem:[#allocation48_spill] sm:$0xff] }
 0x1ec   :  { %1274 = vmatpush.msra.mxu2 %v2800_v41  ;;  %1294 = vmatpush.msrb.mxu3 %v2797_v40 }
 0x1ed   :  { %1235 = vmatpush.msrb.mxu0 %v3231_v19  ;;  %1255 = vmatpush.msra.mxu1 %v3749_v25 }
 0x1ee   :  { %1275 = vmatpush.msra.mxu2 %v3750_v26  ;;  %1295 = vmatpush.msrb.mxu3 %v3751_v29  ;;  %v3784_v26 = vld [vmem:[#allocation49_spill] sm:$0xff] }
 0x1ef   :  { %1236 = vmatpush.msrb.mxu0 %v3237_v37  ;;  %1256 = vmatpush.msra.mxu1 %v3753_v36 }
 0x1f0   :  { %1276 = vmatpush.msra.mxu2 %v3754_v42  ;;  %1296 = vmatpush.msrb.mxu3 %v3755_v43 }
 0x1f1   :  { %1237 = vmatpush.msrb.mxu0 %v3243_v20  ;;  %1257 = vmatpush.msra.mxu1 %v3757_v50 }
 0x1f2   :  { %1277 = vmatpush.msra.mxu2 %v3758_v52  ;;  %1297 = vmatpush.msrb.mxu3 %v3759_v53 }
 0x1f3   :  { %1238 = vmatpush.msrb.mxu0 %v3249_v22  ;;  %1258 = vmatpush.msra.mxu1 %v3761_v56 }
 0x1f4   :  { %1278 = vmatpush.msra.mxu2 %v3762_v60  ;;  %1298 = vmatpush.msrb.mxu3 %v3763_v61 }
 0x1f5   :  { %1239 = vmatpush.msrb.mxu0 %v3255_v24  ;;  %1259 = vmatpush.msra.mxu1 %v3765_v8  ;;  %v3785_v8 = vld [vmem:[#allocation51_spill] sm:$0xff] }
 0x1f6   :  { %1279 = vmatpush.msra.mxu2 %v3766_v49  ;;  %1299 = vmatpush.msrb.mxu3 %v3767_v51 }
 0x1f7   :  { %1240 = vmatpush.msrb.mxu0 %v3261_v27  ;;  %1260 = vmatpush.msra.mxu1 %v3769_v47 }
 0x1f8   :  { %1280 = vmatpush.msra.mxu2 %v3770_v46  ;;  %1300 = vmatpush.msrb.mxu3 %v3771_v57 }
 0x254   :  { %v934_v28 = vpop.f32.mrf.mxu0  ;;  %v954_v30 = vpop.f32.mrf.mxu1 }
 0x255   :  { %v997_v35 = vadd.f32 %v934_v28, %v3782_v34  ;;  %v998_v38 = vadd.f32 %v954_v30, %v3783_v33 }
 0x257   :  { %v2001_v40 = vmul.f32 -1.442695, %v997_v35  ;;  %v2002_v41 = vmul.f32 -1.442695, %v998_v38 }
 0x259   :  { %2078 = vpow2.f32 %v2001_v40 }
 0x25a   :  { %2080 = vpow2.f32 %v2002_v41 }
 0x25b   :  { %v974_v25 = vpop.f32.mrf.mxu2  ;;  %v994_v53 = vpop.f32.mrf.mxu3 }
 0x25c   :  { %v999_v29 = vadd.f32 %v974_v25, %v3784_v26  ;;  %v1000_v49 = vadd.f32 %v994_v53, %v3785_v8 }
 0x25e   :  { %v2003_v36 = vmul.f32 -1.442695, %v999_v29 }
 0x25f   :  { %v2079_v42 = vpop.eup %2078 }
 0x260   :  { %v2081_v43 = vpop.eup %2080  ;;  %v1010_v50 = vadd.f32 1.0, %v2079_v42  ;;  %2082 = vpow2.f32 %v2003_v36 }
 0x261   :  { %v1011_v52 = vadd.f32 1.0, %v2081_v43 }
 0x262   :  { %2084 = vrcp.f32 %v1010_v50  ;;  %v1024_v48 = vand.u32 2147483648, %v1010_v50  ;;  %v1022_v63 = vand.u32 2147483647, %v1010_v50  ;;  %vm1018_vm14 = vweird.f32 %v1010_v50 }
 0x263   :  { %2086 = vrcp.f32 %v1011_v52  ;;  %v1039_v16 = vand.u32 2147483648, %v1011_v52  ;;  %v1037_v54 = vand.u32 2147483647, %v1011_v52  ;;  %vm1033_vm15 = vweird.f32 %v1011_v52 }
 0x264   :  { %v1025_v30 = vor.u32 1.1754944e-38, %v1024_v48  ;;  %vm1023_vm4 = vcmp.eq.f32.partialorder %v1022_v63, 8.507059e+37  ;;  %v3312_v48 = vld [vmem:[#allocation9 + $0x128] sm:$0xff] }
 0x265   :  { %v1040_v35 = vor.u32 1.1754944e-38, %v1039_v16  ;;  %vm1038_vm5 = vcmp.eq.f32.partialorder %v1037_v54, 8.507059e+37  ;;  %v3315_v16 = vld [vmem:[#allocation9 + $0x130] sm:$0xff]  ;;  %v3322_v63 = vld [vmem:[#allocation9 + $0x108] sm:$0xff]  ;;  %v3328_v54 = vld [vmem:[#allocation9 + $0x118] sm:$0xff] }
 0x266   :  { %v2083_v56 = vpop.eup %2082 }
 0x267   :  { %v1012_v60 = vadd.f32 1.0, %v2083_v56 }
 0x268   :  { %v2085_v61 = vpop.eup %2084 }
 0x269   :  { %v2087_v51 = vpop.eup %2086  ;;  %v1014_v47 = vmul.f32 %v2085_v61, %v1010_v50  ;;  %2088 = vrcp.f32 %v1012_v60  ;;  %vm1019_vm12 = vweird.f32 %v2085_v61  ;;  %vm1048_vm1 = vweird.f32 %v1012_v60 }
 0x26a   :  { %v1029_v46 = vmul.f32 %v2087_v51, %v1011_v52  ;;  %2090 = vtanh.f32 %v1000_v49  ;;  %vm1034_vm13 = vweird.f32 %v2087_v51  ;;  %vm1020_vm2 = vmor %vm1018_vm14, %vm1019_vm12  ;;  %v1054_v52 = vand.u32 2147483648, %v1012_v60 }
 0x26b   :  { %v1015_v57 = vsub.f32 1.0, %v1014_v47  ;;  %vm1035_vm3 = vmor %vm1033_vm15, %vm1034_vm13  ;;  %v1052_v53 = vand.u32 2147483647, %v1012_v60  ;;  %v3298_v47 = vld [vmem:[#allocation9 + $0x178] sm:$0xff] }
 0x26c   :  { %v1030_v7 = vsub.f32 1.0, %v1029_v46  ;;  %v3302_v46 = vld [vmem:[#allocation9 + $0x148] sm:$0xff] }
 0x26d   :  { %v1016_v17 = vmul.f32 %v2085_v61, %v1015_v57  ;;  %vm1053_vm7 = vcmp.eq.f32.partialorder %v1052_v53, 8.507059e+37  ;;  %v3305_v57 = vld [vmem:[#allocation9 + $0x150] sm:$0xff]  ;;  %v3388_v53 = vld [vmem:[#allocation9 + $0x58] sm:$0xff] }
 0x26e   :  { %v1031_v3 = vmul.f32 %v2087_v51, %v1030_v7  ;;  %v3308_v7 = vld [vmem:[#allocation9 + $0x158] sm:$0xff]  ;;  %3799 = vst [vmem:[#allocation37_spill] sm:$0xff] %v3388_v53 }
 0x26f   :  { %v2089_v4 = vpop.eup %2088  ;;  %v1017_v10 = vadd.f32 %v2085_v61, %v1016_v17  ;;  %v3318_v17 = vld [vmem:[#allocation9 + $0x138] sm:$0xff] }
 0x270   :  { %v1044_v28 = vmul.f32 %v2089_v4, %v1012_v60  ;;  %v1032_v34 = vadd.f32 %v2087_v51, %v1031_v3  ;;  %v2091_v38 = vpop.eup %2090  ;;  %vm1049_vm0 = vweird.f32 %v2089_v4  ;;  %v3295_v60 = vld [vmem:[#allocation9 + $0x170] sm:$0xff] }
 0x271   :  { %v1021_v33 = vsel %vm1020_vm2, %v2085_v61, %v1017_v10  ;;  %vm1050_vm6 = vmor %vm1048_vm1, %vm1049_vm0  ;;  %v1055_v61 = vor.u32 1.1754944e-38, %v1054_v52  ;;  %v3325_v3 = vld [vmem:[#allocation9 + $0x110] sm:$0xff] }
 0x272   :  { %v1045_v40 = vsub.f32 1.0, %v1044_v28  ;;  %v1026_v41 = vsel %vm1023_vm4, %v1025_v30, %v1021_v33  ;;  %v1036_v25 = vsel %vm1035_vm3, %v2087_v51, %v1032_v34  ;;  %v3335_v10 = vld [vmem:[#allocation9 + $0xf0] sm:$0xff]  ;;  %v3338_v28 = vld [vmem:[#allocation9 + $0xf8] sm:$0xff]  ;;  %v3342_v30 = vld [vmem:[#allocation9 + $0xc8] sm:$0xff] }
 0x273   :  { %v1041_v26 = vsel %vm1038_vm5, %v1040_v35, %v1036_v25  ;;  %v1060_v29 = vmul.f32 %v2091_v38, %v1026_v41  ;;  %v3345_v34 = vld [vmem:[#allocation9 + $0xd0] sm:$0xff]  ;;  %v3348_v35 = vld [vmem:[#allocation9 + $0xd8] sm:$0xff]  ;;  %v3352_v33 = vld [vmem:[#allocation9 + $0xa8] sm:$0xff] }
 0x274   :  { %v1059_v36 = vmul.f32 %v1041_v26, %v3148_v55  ;;  %v1046_v42 = vmul.f32 %v2089_v4, %v1045_v40  ;;  %v3289_v55 = vld [vmem:[#allocation9 + $0x190] sm:$0xff]  ;;  %3786 = vst [vmem:[#allocation32_spill] sm:$0xff] %v3345_v34  ;;  %v3358_v40 = vld [vmem:[#allocation9 + $0xb8] sm:$0xff]  ;;  %v3362_v41 = vld [vmem:[#allocation9 + $0x88] sm:$0xff] }
 0x275   :  { %3787 = vst [vmem:[#allocation30_spill] sm:$0xff] %v3348_v35  ;;  %v3355_v38 = vld [vmem:[#allocation9 + $0xb0] sm:$0xff]  ;;  %v3368_v26 = vld [vmem:[#allocation9 + $0x98] sm:$0xff] }
 0x276   :  { %v3272_v43 = vadd.f32 %v1060_v29, %v1059_v36  ;;  %v1047_v50 = vadd.f32 %v2089_v4, %v1046_v42  ;;  %3788 = vst [vmem:[#allocation22_spill] sm:$0xff] %v3352_v33  ;;  %v3365_v25 = vld [vmem:[#allocation9 + $0x90] sm:$0xff]  ;;  %v3372_v29 = vld [vmem:[#allocation9 + $0x68] sm:$0xff]  ;;  %v3378_v42 = vld [vmem:[#allocation9 + $0x78] sm:$0xff] }
 0x277   :  { %3789 = vst [vmem:[#allocation31_spill] sm:$0xff] %v3355_v38  ;;  %v3375_v36 = vld [vmem:[#allocation9 + $0x70] sm:$0xff] }
 0x278   :  { %2092 = vtanh.f32 %v3272_v43  ;;  %v1051_v56 = vsel %vm1050_vm6, %v2089_v4, %v1047_v50  ;;  %v3332_v4 = vld [vmem:[#allocation9 + $0xe8] sm:$0xff]  ;;  %3790 = vst [vmem:[#allocation36_spill] sm:$0xff] %v3358_v40  ;;  %v3385_v52 = vld [vmem:[#allocation9 + $0x50] sm:$0xff] }
 0x279   :  { %v1056_v49 = vsel %vm1053_vm7, %v1055_v61, %v1051_v56  ;;  %3791 = vst [vmem:[#allocation33_spill] sm:$0xff] %v3362_v41  ;;  %v3382_v50 = vld [vmem:[#allocation9 + $0x48] sm:$0xff]  ;;  %v3395_v61 = vld [vmem:[#allocation9 + $0x30] sm:$0xff] }
 0x27a   :  { %3792 = vst [vmem:[#allocation23_spill] sm:$0xff] %v3365_v25  ;;  %v3392_v56 = vld [vmem:[#allocation9 + $0x28] sm:$0xff] }
 0x27b   :  { %3793 = vst [vmem:[#allocation34_spill] sm:$0xff] %v3368_v26 }
 0x27c   :  { %3794 = vst [vmem:[#allocation39_spill] sm:$0xff] %v3372_v29 }
 0x27d   :  { %3795 = vst [vmem:[#allocation35_spill] sm:$0xff] %v3375_v36 }
 0x27e   :  { %v2093_v8 = vpop.eup %2092  ;;  %3796 = vst [vmem:[#allocation24_spill] sm:$0xff] %v3378_v42 }
 0x27f   :  { %v1063_v51 = vmul.f32 %v2093_v8, %v1056_v49  ;;  %3797 = vst [vmem:[#allocation38_spill] sm:$0xff] %v3382_v50  ;;  %v3398_v8 = vld [vmem:[#allocation9 + $0x38] sm:$0xff]  ;;  %v3402_v49 = vld [vmem:[#allocation9 + $0x8] sm:$0xff] }
 0x280   :  { %3798 = vst [vmem:[#allocation42_spill] sm:$0xff] %v3385_v52 }
 0x281   :  { %1087 = vmatmul.f32.vlgmr.msra.gmra.mxu0 %v1063_v51  ;;  %1107 = vmatmul.f32.vlgmr.msrb.gmra.mxu1 %v1063_v51  ;;  %3800 = vst [vmem:[#allocation25_spill] sm:$0xff] %v3392_v56 }
 0x282   :  { %1127 = vmatmul.f32.vlgmr.msrb.gmra.mxu2 %v1063_v51  ;;  %1147 = vmatmul.f32.vlgmr.msra.gmra.mxu3 %v1063_v51  ;;  %3801 = vst [vmem:[#allocation40_spill] sm:$0xff] %v3395_v61  ;;  %v3405_v51 = vld [vmem:[#allocation9 + $0x10] sm:$0xff] }
 0x283   :  { %1379 = vmatpush.msra.mxu0 %v3075_v39  ;;  %1399 = vmatpush.msrb.mxu1 %v3152_v5  ;;  %3802 = vst [vmem:[#allocation43_spill] sm:$0xff] %v3398_v8 }
 0x284   :  { %1419 = vmatpush.msrb.mxu2 %v3155_v13  ;;  %1439 = vmatpush.msra.mxu3 %v3158_v2  ;;  %3803 = vst [vmem:[#allocation41_spill] sm:$0xff] %v3402_v49 }
 0x285   :  { %1380 = vmatpush.msra.mxu0 %v3081_v6  ;;  %1400 = vmatpush.msrb.mxu1 %v3162_v1  ;;  %3804 = vst [vmem:[#allocation44_spill] sm:$0xff] %v3405_v51 }
 0x286   :  { %1420 = vmatpush.msrb.mxu2 %v3165_v32  ;;  %1440 = vmatpush.msra.mxu3 %v3168_v58 }
 0x287   :  { %1381 = vmatpush.msra.mxu0 %v3171_v21  ;;  %1401 = vmatpush.msrb.mxu1 %v3174_v45 }
 0x288   :  { %1421 = vmatpush.msrb.mxu2 %v3177_v59  ;;  %1441 = vmatpush.msra.mxu3 %v3180_v62 }
 0x289   :  { %1382 = vmatpush.msra.mxu0 %v3183_v31  ;;  %1402 = vmatpush.msrb.mxu1 %v3186_v44 }
 0x28a   :  { %1422 = vmatpush.msrb.mxu2 %v3289_v55  ;;  %1442 = vmatpush.msra.mxu3 %v3190_v0 }
 0x28b   :  { %1383 = vmatpush.msra.mxu0 %v3193_v15  ;;  %1403 = vmatpush.msrb.mxu1 %v3196_v23 }
 0x28c   :  { %1423 = vmatpush.msrb.mxu2 %v3295_v60  ;;  %1443 = vmatpush.msra.mxu3 %v3298_v47 }
 0x28d   :  { %1384 = vmatpush.msra.mxu0 %v3201_v18  ;;  %1404 = vmatpush.msrb.mxu1 %v3302_v46 }
 0x28e   :  { %1424 = vmatpush.msrb.mxu2 %v3305_v57  ;;  %1444 = vmatpush.msra.mxu3 %v3308_v7 }
 0x28f   :  { %1385 = vmatpush.msra.mxu0 %v3207_v9  ;;  %1405 = vmatpush.msrb.mxu1 %v3312_v48 }
 0x290   :  { %1425 = vmatpush.msrb.mxu2 %v3315_v16  ;;  %1445 = vmatpush.msra.mxu3 %v3318_v17 }
 0x291   :  { %1386 = vmatpush.msra.mxu0 %v3213_v12  ;;  %1406 = vmatpush.msrb.mxu1 %v3322_v63 }
 0x292   :  { %1426 = vmatpush.msrb.mxu2 %v3325_v3  ;;  %1446 = vmatpush.msra.mxu3 %v3328_v54 }
 0x293   :  { %1387 = vmatpush.msra.mxu0 %v3219_v11  ;;  %1407 = vmatpush.msrb.mxu1 %v3332_v4 }
 0x294   :  { %1427 = vmatpush.msrb.mxu2 %v3335_v10  ;;  %1447 = vmatpush.msra.mxu3 %v3338_v28 }
 0x295   :  { %1388 = vmatpush.msra.mxu0 %v3225_v14  ;;  %1408 = vmatpush.msrb.mxu1 %v3342_v30 }
 0x296   :  { %1428 = vmatpush.msrb.mxu2 %v3345_v34  ;;  %1448 = vmatpush.msra.mxu3 %v3348_v35 }
 0x297   :  { %1389 = vmatpush.msra.mxu0 %v3231_v19  ;;  %1409 = vmatpush.msrb.mxu1 %v3352_v33 }
 0x298   :  { %1429 = vmatpush.msrb.mxu2 %v3355_v38  ;;  %1449 = vmatpush.msra.mxu3 %v3358_v40 }
 0x299   :  { %1390 = vmatpush.msra.mxu0 %v3237_v37  ;;  %1410 = vmatpush.msrb.mxu1 %v3362_v41 }
 0x29a   :  { %1430 = vmatpush.msrb.mxu2 %v3365_v25  ;;  %1450 = vmatpush.msra.mxu3 %v3368_v26 }
 0x29b   :  { %1391 = vmatpush.msra.mxu0 %v3243_v20  ;;  %1411 = vmatpush.msrb.mxu1 %v3372_v29 }
 0x29c   :  { %1431 = vmatpush.msrb.mxu2 %v3375_v36  ;;  %1451 = vmatpush.msra.mxu3 %v3378_v42 }
 0x29d   :  { %1392 = vmatpush.msra.mxu0 %v3249_v22  ;;  %1412 = vmatpush.msrb.mxu1 %v3382_v50  ;;  %v3807_v50 = vld [vmem:[#allocation54_spill] sm:$0xff] }
 0x29e   :  { %1432 = vmatpush.msrb.mxu2 %v3385_v52  ;;  %1452 = vmatpush.msra.mxu3 %v3388_v53  ;;  %v3806_v53 = vld [vmem:[#allocation52_spill] sm:$0xff] }
 0x29f   :  { %1393 = vmatpush.msra.mxu0 %v3255_v24  ;;  %1413 = vmatpush.msrb.mxu1 %v3392_v56  ;;  %v3408_v24 = vld [vmem:[#allocation9 + $0x18] sm:$0xff] }
 0x2a0   :  { %1433 = vmatpush.msrb.mxu2 %v3395_v61  ;;  %1453 = vmatpush.msra.mxu3 %v3398_v8  ;;  %3805 = vst [vmem:[#allocation46_spill] sm:$0xff] %v3408_v24 }
 0x2a1   :  { %1394 = vmatpush.msra.mxu0 %v3261_v27  ;;  %1414 = vmatpush.msrb.mxu1 %v3402_v49  ;;  %v3808_v49 = vld [vmem:[#allocation53_spill] sm:$0xff] }
 0x2a2   :  { %1434 = vmatpush.msrb.mxu2 %v3405_v51  ;;  %1454 = vmatpush.msra.mxu3 %v3408_v24 }
 0x2fe   :  { %v1088_v56 = vpop.f32.mrf.mxu0  ;;  %v1108_v61 = vpop.f32.mrf.mxu1 }
 0x2ff   :  { %v1151_v52 = vadd.f32 %v1088_v56, %v3806_v53  ;;  %v1152_v8 = vadd.f32 %v1108_v61, %v3807_v50  ;;  %v3809_v50 = vld [vmem:[#allocation55_spill] sm:$0xff] }
 0x301   :  { %v2004_v22 = vmul.f32 -1.442695, %v1151_v52  ;;  %v2005_v27 = vmul.f32 -1.442695, %v1152_v8 }
 0x303   :  { %2094 = vpow2.f32 %v2004_v22 }
 0x304   :  { %2096 = vpow2.f32 %v2005_v27 }
 0x305   :  { %v1128_v42 = vpop.f32.mrf.mxu2  ;;  %v1148_v24 = vpop.f32.mrf.mxu3 }
 0x306   :  { %v1153_v36 = vadd.f32 %v1128_v42, %v3808_v49  ;;  %v1154_v52 = vadd.f32 %v1148_v24, %v3809_v50 }
 0x308   :  { %v2006_v29 = vmul.f32 -1.442695, %v1153_v36 }
 0x309   :  { %v2095_v20 = vpop.eup %2094 }
 0x30a   :  { %v2097_v51 = vpop.eup %2096  ;;  %v1164_v26 = vadd.f32 1.0, %v2095_v20  ;;  %2098 = vpow2.f32 %v2006_v29 }
 0x30b   :  { %v1165_v25 = vadd.f32 1.0, %v2097_v51 }
 0x30c   :  { %2100 = vrcp.f32 %v1164_v26  ;;  %v1178_v36 = vand.u32 2147483648, %v1164_v26  ;;  %v1176_v29 = vand.u32 2147483647, %v1164_v26  ;;  %vm1172_vm10 = vweird.f32 %v1164_v26 }
 0x30d   :  { %2102 = vrcp.f32 %v1165_v25  ;;  %v1193_v49 = vand.u32 2147483648, %v1165_v25  ;;  %v1191_v37 = vand.u32 2147483647, %v1165_v25  ;;  %vm1187_vm11 = vweird.f32 %v1165_v25 }
 0x30e   :  { %v1179_v50 = vor.u32 1.1754944e-38, %v1178_v36  ;;  %vm1177_vm14 = vcmp.eq.f32.partialorder %v1176_v29, 8.507059e+37 }
 0x30f   :  { %vm1192_vm15 = vcmp.eq.f32.partialorder %v1191_v37, 8.507059e+37 }
 0x310   :  { %v2099_v41 = vpop.eup %2098 }
 0x311   :  { %v1166_v53 = vadd.f32 1.0, %v2099_v41 }
 0x312   :  { %v2101_v56 = vpop.eup %2100 }
 0x313   :  { %v2103_v61 = vpop.eup %2102  ;;  %v1168_v22 = vmul.f32 %v2101_v56, %v1164_v26  ;;  %2104 = vrcp.f32 %v1166_v53  ;;  %vm1173_vm8 = vweird.f32 %v2101_v56  ;;  %v1208_v36 = vand.u32 2147483648, %v1166_v53 }
 0x314   :  { %v1183_v27 = vmul.f32 %v2103_v61, %v1165_v25  ;;  %2106 = vtanh.f32 %v1154_v52  ;;  %vm1188_vm9 = vweird.f32 %v2103_v61  ;;  %vm1174_vm12 = vmor %vm1172_vm10, %vm1173_vm8  ;;  %vm1202_vm3 = vweird.f32 %v1166_v53 }
 0x315   :  { %v1169_v8 = vsub.f32 1.0, %v1168_v22  ;;  %vm1189_vm13 = vmor %vm1187_vm11, %vm1188_vm9  ;;  %v1194_v22 = vor.u32 1.1754944e-38, %v1193_v49  ;;  %v1209_v29 = vor.u32 1.1754944e-38, %v1208_v36  ;;  %v3830_v36 = vld [vmem:[#allocation40_spill] sm:$0xff] }
 0x316   :  { %v1184_v42 = vsub.f32 1.0, %v1183_v27 }
 0x317   :  { %v1170_v20 = vmul.f32 %v2101_v56, %v1169_v8 }
 0x318   :  { %v1185_v51 = vmul.f32 %v2103_v61, %v1184_v42 }
 0x319   :  { %v2105_v40 = vpop.eup %2104  ;;  %v1171_v41 = vadd.f32 %v2101_v56, %v1170_v20 }
 0x31a   :  { %v1198_v24 = vmul.f32 %v2105_v40, %v1166_v53  ;;  %v1186_v38 = vadd.f32 %v2103_v61, %v1185_v51  ;;  %v2107_v52 = vpop.eup %2106  ;;  %vm1203_vm2 = vweird.f32 %v2105_v40  ;;  %v3819_v51 = vld [vmem:[#allocation34_spill] sm:$0xff] }
 0x31b   :  { %v1175_v27 = vsel %vm1174_vm12, %v2101_v56, %v1171_v41  ;;  %v1206_v56 = vand.u32 2147483647, %v1166_v53  ;;  %vm1204_vm4 = vmor %vm1202_vm3, %vm1203_vm2  ;;  %v3817_v53 = vld [vmem:[#allocation33_spill] sm:$0xff] }
 0x31c   :  { %v1199_v33 = vsub.f32 1.0, %v1198_v24  ;;  %v1180_v8 = vsel %vm1177_vm14, %v1179_v50, %v1175_v27  ;;  %v1190_v19 = vsel %vm1189_vm13, %v2103_v61, %v1186_v38  ;;  %v3818_v61 = vld [vmem:[#allocation23_spill] sm:$0xff]  ;;  %v3820_v41 = vld [vmem:[#allocation29_spill] sm:$0xff]  ;;  %v3824_v27 = vld [vmem:[#allocation28_spill] sm:$0xff] }
 0x31d   :  { %v1195_v42 = vsel %vm1192_vm15, %v1194_v22, %v1190_v19  ;;  %v1214_v35 = vmul.f32 %v2107_v52, %v1180_v8  ;;  %vm1207_vm5 = vcmp.eq.f32.partialorder %v1206_v56, 8.507059e+37  ;;  %v3821_v24 = vld [vmem:[#allocation39_spill] sm:$0xff]  ;;  %v3823_v22 = vld [vmem:[#allocation24_spill] sm:$0xff]  ;;  %v3825_v52 = vld [vmem:[#allocation38_spill] sm:$0xff] }
 0x31e   :  { %v1213_v34 = vmul.f32 %v1195_v42, %v3272_v43  ;;  %v1200_v20 = vmul.f32 %v2105_v40, %v1199_v33  ;;  %v3812_v43 = vld [vmem:[#allocation20_spill] sm:$0xff]  ;;  %v3822_v50 = vld [vmem:[#allocation35_spill] sm:$0xff]  ;;  %v3826_v8 = vld [vmem:[#allocation42_spill] sm:$0xff] }
 0x31f   :  { %v3815_v33 = vld [vmem:[#allocation36_spill] sm:$0xff]  ;;  %v3827_v42 = vld [vmem:[#allocation37_spill] sm:$0xff]  ;;  %v3831_v56 = vld [vmem:[#allocation43_spill] sm:$0xff] }
 0x320   :  { %v3416_v26 = vadd.f32 %v1214_v35, %v1213_v34  ;;  %v1201_v25 = vadd.f32 %v2105_v40, %v1200_v20  ;;  %v3813_v34 = vld [vmem:[#allocation22_spill] sm:$0xff]  ;;  %v3814_v35 = vld [vmem:[#allocation31_spill] sm:$0xff]  ;;  %v3828_v20 = vld [vmem:[#allocation21_spill] sm:$0xff] }
 0x322   :  { %2108 = vtanh.f32 %v3416_v26  ;;  %v1205_v49 = vsel %vm1204_vm4, %v2105_v40, %v1201_v25  ;;  %v3816_v40 = vld [vmem:[#allocation26_spill] sm:$0xff]  ;;  %v3829_v25 = vld [vmem:[#allocation25_spill] sm:$0xff] }
 0x323   :  { %v1210_v37 = vsel %vm1207_vm5, %v1209_v29, %v1205_v49  ;;  %v3832_v49 = vld [vmem:[#allocation27_spill] sm:$0xff]  ;;  %v3833_v29 = vld [vmem:[#allocation41_spill] sm:$0xff] }
 0x328   :  { %v2109_v38 = vpop.eup %2108 }
 0x329   :  { %v1217_v19 = vmul.f32 %v2109_v38, %v1210_v37  ;;  %v3834_v38 = vld [vmem:[#allocation44_spill] sm:$0xff]  ;;  %v3835_v37 = vld [vmem:[#allocation46_spill] sm:$0xff] }
 0x32b   :  { %1241 = vmatmul.f32.vlgmr.msrb.gmra.mxu0 %v1217_v19  ;;  %1261 = vmatmul.f32.vlgmr.msra.gmra.mxu1 %v1217_v19 }
 0x32c   :  { %1281 = vmatmul.f32.vlgmr.msra.gmra.mxu2 %v1217_v19  ;;  %1301 = vmatmul.f32.vlgmr.msrb.gmra.mxu3 %v1217_v19 }
 0x32d   :  { %1533 = vmatpush.msrb.mxu0 %v3075_v39  ;;  %1553 = vmatpush.msra.mxu1 %v3152_v5  ;;  %v3810_v39 = vld [vmem:[#allocation32_spill] sm:$0xff] }
 0x32e   :  { %1573 = vmatpush.msra.mxu2 %v3155_v13  ;;  %1593 = vmatpush.msrb.mxu3 %v3158_v2 }
 0x32f   :  { %1534 = vmatpush.msrb.mxu0 %v3081_v6  ;;  %1554 = vmatpush.msra.mxu1 %v3162_v1  ;;  %v3811_v6 = vld [vmem:[#allocation30_spill] sm:$0xff] }
 0x330   :  { %1574 = vmatpush.msra.mxu2 %v3165_v32  ;;  %1594 = vmatpush.msrb.mxu3 %v3168_v58 }
 0x331   :  { %1535 = vmatpush.msrb.mxu0 %v3171_v21  ;;  %1555 = vmatpush.msra.mxu1 %v3174_v45 }
 0x332   :  { %1575 = vmatpush.msra.mxu2 %v3177_v59  ;;  %1595 = vmatpush.msrb.mxu3 %v3180_v62 }
 0x333   :  { %1536 = vmatpush.msrb.mxu0 %v3183_v31  ;;  %1556 = vmatpush.msra.mxu1 %v3186_v44 }
 0x334   :  { %1576 = vmatpush.msra.mxu2 %v3289_v55  ;;  %1596 = vmatpush.msrb.mxu3 %v3190_v0 }
 0x335   :  { %1537 = vmatpush.msrb.mxu0 %v3193_v15  ;;  %1557 = vmatpush.msra.mxu1 %v3196_v23 }
 0x336   :  { %1577 = vmatpush.msra.mxu2 %v3295_v60  ;;  %1597 = vmatpush.msrb.mxu3 %v3298_v47 }
 0x337   :  { %1538 = vmatpush.msrb.mxu0 %v3201_v18  ;;  %1558 = vmatpush.msra.mxu1 %v3302_v46 }
 0x338   :  { %1578 = vmatpush.msra.mxu2 %v3305_v57  ;;  %1598 = vmatpush.msrb.mxu3 %v3308_v7 }
 0x339   :  { %1539 = vmatpush.msrb.mxu0 %v3207_v9  ;;  %1559 = vmatpush.msra.mxu1 %v3312_v48 }
 0x33a   :  { %1579 = vmatpush.msra.mxu2 %v3315_v16  ;;  %1599 = vmatpush.msrb.mxu3 %v3318_v17 }
 0x33b   :  { %1540 = vmatpush.msrb.mxu0 %v3213_v12  ;;  %1560 = vmatpush.msra.mxu1 %v3322_v63 }
 0x33c   :  { %1580 = vmatpush.msra.mxu2 %v3325_v3  ;;  %1600 = vmatpush.msrb.mxu3 %v3328_v54 }
 0x33d   :  { %1541 = vmatpush.msrb.mxu0 %v3219_v11  ;;  %1561 = vmatpush.msra.mxu1 %v3332_v4 }
 0x33e   :  { %1581 = vmatpush.msra.mxu2 %v3335_v10  ;;  %1601 = vmatpush.msrb.mxu3 %v3338_v28 }
 0x33f   :  { %1542 = vmatpush.msrb.mxu0 %v3225_v14  ;;  %1562 = vmatpush.msra.mxu1 %v3342_v30 }
 0x340   :  { %1582 = vmatpush.msra.mxu2 %v3810_v39  ;;  %1602 = vmatpush.msrb.mxu3 %v3811_v6 }
 0x341   :  { %1543 = vmatpush.msrb.mxu0 %v3812_v43  ;;  %1563 = vmatpush.msra.mxu1 %v3813_v34 }
 0x342   :  { %1583 = vmatpush.msra.mxu2 %v3814_v35  ;;  %1603 = vmatpush.msrb.mxu3 %v3815_v33 }
 0x343   :  { %1544 = vmatpush.msrb.mxu0 %v3816_v40  ;;  %1564 = vmatpush.msra.mxu1 %v3817_v53 }
 0x344   :  { %1584 = vmatpush.msra.mxu2 %v3818_v61  ;;  %1604 = vmatpush.msrb.mxu3 %v3819_v51 }
 0x345   :  { %1545 = vmatpush.msrb.mxu0 %v3820_v41  ;;  %1565 = vmatpush.msra.mxu1 %v3821_v24 }
 0x346   :  { %1585 = vmatpush.msra.mxu2 %v3822_v50  ;;  %1605 = vmatpush.msrb.mxu3 %v3823_v22 }
 0x347   :  { %1546 = vmatpush.msrb.mxu0 %v3824_v27  ;;  %1566 = vmatpush.msra.mxu1 %v3825_v52  ;;  %v3836_v52 = vld [vmem:[#allocation57_spill] sm:$0xff]  ;;  %v3837_v27 = vld [vmem:[#allocation58_spill] sm:$0xff] }
 0x348   :  { %1586 = vmatpush.msra.mxu2 %v3826_v8  ;;  %1606 = vmatpush.msrb.mxu3 %v3827_v42 }
 0x349   :  { %1547 = vmatpush.msrb.mxu0 %v3828_v20  ;;  %1567 = vmatpush.msra.mxu1 %v3829_v25 }
 0x34a   :  { %1587 = vmatpush.msra.mxu2 %v3830_v36  ;;  %1607 = vmatpush.msrb.mxu3 %v3831_v56  ;;  %v3838_v56 = vld [vmem:[#allocation56_spill] sm:$0xff] }
 0x34b   :  { %1548 = vmatpush.msrb.mxu0 %v3832_v49  ;;  %1568 = vmatpush.msra.mxu1 %v3833_v29 }
 0x34c   :  { %1588 = vmatpush.msra.mxu2 %v3834_v38  ;;  %1608 = vmatpush.msrb.mxu3 %v3835_v37 }
 0x3a8   :  { %v1242_v19 = vpop.f32.mrf.mxu0  ;;  %v1262_v8 = vpop.f32.mrf.mxu1 }
 0x3a9   :  { %v1305_v42 = vadd.f32 %v1242_v19, %v3836_v52  ;;  %v1306_v20 = vadd.f32 %v1262_v8, %v3837_v27  ;;  %v3839_v27 = vld [vmem:[#allocation60_spill] sm:$0xff] }
 0x3ab   :  { %v2007_v22 = vmul.f32 -1.442695, %v1305_v42  ;;  %v2008_v25 = vmul.f32 -1.442695, %v1306_v20 }
 0x3ad   :  { %2110 = vpow2.f32 %v2007_v22 }
 0x3ae   :  { %2112 = vpow2.f32 %v2008_v25 }
 0x3af   :  { %v1282_v36 = vpop.f32.mrf.mxu2  ;;  %v1302_v37 = vpop.f32.mrf.mxu3 }
 0x3b0   :  { %v1307_v50 = vadd.f32 %v1282_v36, %v3838_v56  ;;  %v1308_v8 = vadd.f32 %v1302_v37, %v3839_v27 }
 0x3b2   :  { %v2009_v49 = vmul.f32 -1.442695, %v1307_v50 }
 0x3b3   :  { %v2111_v24 = vpop.eup %2110 }
 0x3b4   :  { %v2113_v29 = vpop.eup %2112  ;;  %v1318_v41 = vadd.f32 1.0, %v2111_v24  ;;  %2114 = vpow2.f32 %v2009_v49 }
 0x3b5   :  { %v1319_v38 = vadd.f32 1.0, %v2113_v29 }
 0x3b6   :  { %2116 = vrcp.f32 %v1318_v41  ;;  %v1332_v50 = vand.u32 2147483648, %v1318_v41  ;;  %v1330_v49 = vand.u32 2147483647, %v1318_v41  ;;  %vm1326_vm6 = vweird.f32 %v1318_v41 }
 0x3b7   :  { %2118 = vrcp.f32 %v1319_v38  ;;  %v1347_v56 = vand.u32 2147483648, %v1319_v38  ;;  %v1345_v61 = vand.u32 2147483647, %v1319_v38  ;;  %vm1341_vm7 = vweird.f32 %v1319_v38 }
 0x3b8   :  { %v1333_v27 = vor.u32 1.1754944e-38, %v1332_v50  ;;  %vm1331_vm10 = vcmp.eq.f32.partialorder %v1330_v49, 8.507059e+37 }
 0x3b9   :  { %vm1346_vm11 = vcmp.eq.f32.partialorder %v1345_v61, 8.507059e+37 }
 0x3ba   :  { %v2115_v51 = vpop.eup %2114 }
 0x3bb   :  { %v1320_v52 = vadd.f32 1.0, %v2115_v51 }
 0x3bc   :  { %v2117_v19 = vpop.eup %2116 }
 0x3bd   :  { %v2119_v42 = vpop.eup %2118  ;;  %v1322_v22 = vmul.f32 %v2117_v19, %v1318_v41  ;;  %2120 = vrcp.f32 %v1320_v52  ;;  %vm1327_vm0 = vweird.f32 %v2117_v19  ;;  %v1362_v50 = vand.u32 2147483648, %v1320_v52 }
 0x3be   :  { %v1337_v20 = vmul.f32 %v2119_v42, %v1319_v38  ;;  %2122 = vtanh.f32 %v1308_v8  ;;  %vm1342_vm1 = vweird.f32 %v2119_v42  ;;  %vm1328_vm8 = vmor %vm1326_vm6, %vm1327_vm0  ;;  %vm1356_vm13 = vweird.f32 %v1320_v52 }
 0x3bf   :  { %v1323_v25 = vsub.f32 1.0, %v1322_v22  ;;  %vm1343_vm9 = vmor %vm1341_vm7, %vm1342_vm1  ;;  %v1348_v22 = vor.u32 1.1754944e-38, %v1347_v56  ;;  %v1363_v49 = vor.u32 1.1754944e-38, %v1362_v50 }
 0x3c0   :  { %v1338_v36 = vsub.f32 1.0, %v1337_v20 }
 0x3c1   :  { %v1324_v24 = vmul.f32 %v2117_v19, %v1323_v25 }
 0x3c2   :  { %v1339_v29 = vmul.f32 %v2119_v42, %v1338_v36 }
 0x3c3   :  { %v2121_v53 = vpop.eup %2120  ;;  %v1325_v51 = vadd.f32 %v2117_v19, %v1324_v24 }
 0x3c4   :  { %v1352_v37 = vmul.f32 %v2121_v53, %v1320_v52  ;;  %v1340_v40 = vadd.f32 %v2119_v42, %v1339_v29  ;;  %v2123_v8 = vpop.eup %2122  ;;  %vm1357_vm12 = vweird.f32 %v2121_v53 }
 0x3c5   :  { %v1329_v20 = vsel %vm1328_vm8, %v2117_v19, %v1325_v51  ;;  %v1360_v19 = vand.u32 2147483647, %v1320_v52  ;;  %vm1358_vm14 = vmor %vm1356_vm13, %vm1357_vm12  ;;  %v3867_v51 = vld [vmem:[#allocation64_spill] sm:$0xff] }
 0x3c6   :  { %v1353_v33 = vsub.f32 1.0, %v1352_v37  ;;  %v1334_v25 = vsel %vm1331_vm10, %v1333_v27, %v1329_v20  ;;  %v1344_v35 = vsel %vm1343_vm9, %v2119_v42, %v1340_v40 }
 0x3c7   :  { %v1349_v36 = vsel %vm1346_vm11, %v1348_v22, %v1344_v35  ;;  %v1368_v34 = vmul.f32 %v2123_v8, %v1334_v25  ;;  %vm1361_vm15 = vcmp.eq.f32.partialorder %v1360_v19, 8.507059e+37 }
 0x3c8   :  { %v1367_v43 = vmul.f32 %v1349_v36, %v3416_v26  ;;  %v1354_v24 = vmul.f32 %v2121_v53, %v1353_v33  ;;  %v2238_v26 = vld [vmem:[#allocation9 + $0x1e0] sm:$0xff] }
 0x3ca   :  { %v3488_v41 = vadd.f32 %v1368_v34, %v1367_v43  ;;  %v1355_v38 = vadd.f32 %v2121_v53, %v1354_v24  ;;  %v2239_v43 = vld [vmem:[#allocation9 + $0x1c0] sm:$0xff] }
 0x3cc   :  { %2124 = vtanh.f32 %v3488_v41  ;;  %v1359_v56 = vsel %vm1358_vm14, %v2121_v53, %v1355_v38 }
 0x3cd   :  { %v1364_v61 = vsel %vm1361_vm15, %v1363_v49, %v1359_v56 }
 0x3d2   :  { %v2125_v40 = vpop.eup %2124 }
 0x3d3   :  { %v1371_v35 = vmul.f32 %v2125_v40, %v1364_v61 }
 0x3d5   :  { %1395 = vmatmul.f32.vlgmr.msra.gmra.mxu0 %v1371_v35  ;;  %1415 = vmatmul.f32.vlgmr.msrb.gmra.mxu1 %v1371_v35 }
 0x3d6   :  { %1435 = vmatmul.f32.vlgmr.msrb.gmra.mxu2 %v1371_v35  ;;  %1455 = vmatmul.f32.vlgmr.msra.gmra.mxu3 %v1371_v35 }
 0x3d7   :  { %1687 = vmatpush.msra.mxu0 %v2238_v26  ;;  %1707 = vmatpush.msrb.mxu1 %v3152_v5  ;;  %v3840_v5 = vld [vmem:[#allocation20_spill] sm:$0xff] }
 0x3d8   :  { %1727 = vmatpush.msrb.mxu2 %v3155_v13  ;;  %1747 = vmatpush.msra.mxu3 %v3158_v2  ;;  %v3841_v13 = vld [vmem:[#allocation22_spill] sm:$0xff]  ;;  %v3842_v2 = vld [vmem:[#allocation31_spill] sm:$0xff] }
 0x3d9   :  { %1688 = vmatpush.msra.mxu0 %v2239_v43  ;;  %1708 = vmatpush.msrb.mxu1 %v3162_v1  ;;  %v3843_v1 = vld [vmem:[#allocation36_spill] sm:$0xff] }
 0x3da   :  { %1728 = vmatpush.msrb.mxu2 %v3165_v32  ;;  %1748 = vmatpush.msra.mxu3 %v3168_v58  ;;  %v3844_v32 = vld [vmem:[#allocation26_spill] sm:$0xff]  ;;  %v3845_v58 = vld [vmem:[#allocation33_spill] sm:$0xff] }
 0x3db   :  { %1689 = vmatpush.msra.mxu0 %v3171_v21  ;;  %1709 = vmatpush.msrb.mxu1 %v3174_v45  ;;  %v3846_v21 = vld [vmem:[#allocation23_spill] sm:$0xff]  ;;  %v3847_v45 = vld [vmem:[#allocation34_spill] sm:$0xff] }
 0x3dc   :  { %1729 = vmatpush.msrb.mxu2 %v3177_v59  ;;  %1749 = vmatpush.msra.mxu3 %v3180_v62  ;;  %v3848_v59 = vld [vmem:[#allocation29_spill] sm:$0xff]  ;;  %v3849_v62 = vld [vmem:[#allocation39_spill] sm:$0xff] }
 0x3dd   :  { %1690 = vmatpush.msra.mxu0 %v3183_v31  ;;  %1710 = vmatpush.msrb.mxu1 %v3186_v44  ;;  %v3850_v31 = vld [vmem:[#allocation35_spill] sm:$0xff]  ;;  %v3851_v44 = vld [vmem:[#allocation24_spill] sm:$0xff] }
 0x3de   :  { %1730 = vmatpush.msrb.mxu2 %v3289_v55  ;;  %1750 = vmatpush.msra.mxu3 %v3190_v0  ;;  %v3852_v0 = vld [vmem:[#allocation28_spill] sm:$0xff]  ;;  %v3860_v55 = vld [vmem:[#allocation27_spill] sm:$0xff] }
 0x3df   :  { %1691 = vmatpush.msra.mxu0 %v3193_v15  ;;  %1711 = vmatpush.msrb.mxu1 %v3196_v23  ;;  %v3853_v15 = vld [vmem:[#allocation38_spill] sm:$0xff] }
 0x3e0   :  { %1731 = vmatpush.msrb.mxu2 %v3295_v60  ;;  %1751 = vmatpush.msra.mxu3 %v3298_v47  ;;  %v3854_v23 = vld [vmem:[#allocation42_spill] sm:$0xff]  ;;  %v3861_v60 = vld [vmem:[#allocation41_spill] sm:$0xff]  ;;  %v3862_v47 = vld [vmem:[#allocation44_spill] sm:$0xff] }
 0x3e1   :  { %1692 = vmatpush.msra.mxu0 %v3201_v18  ;;  %1712 = vmatpush.msrb.mxu1 %v3302_v46  ;;  %v3855_v18 = vld [vmem:[#allocation37_spill] sm:$0xff]  ;;  %v3863_v46 = vld [vmem:[#allocation46_spill] sm:$0xff] }
 0x3e2   :  { %1732 = vmatpush.msrb.mxu2 %v3305_v57  ;;  %1752 = vmatpush.msra.mxu3 %v3308_v7 }
 0x3e3   :  { %1693 = vmatpush.msra.mxu0 %v3207_v9  ;;  %1713 = vmatpush.msrb.mxu1 %v3312_v48  ;;  %v3856_v9 = vld [vmem:[#allocation21_spill] sm:$0xff] }
 0x3e4   :  { %1733 = vmatpush.msrb.mxu2 %v3315_v16  ;;  %1753 = vmatpush.msra.mxu3 %v3318_v17  ;;  %v3864_v48 = vld [vmem:[#allocation17_spill] sm:$0xff] }
 0x3e5   :  { %1694 = vmatpush.msra.mxu0 %v3213_v12  ;;  %1714 = vmatpush.msrb.mxu1 %v3322_v63  ;;  %v3857_v12 = vld [vmem:[#allocation25_spill] sm:$0xff] }
 0x3e6   :  { %1734 = vmatpush.msrb.mxu2 %v3325_v3  ;;  %1754 = vmatpush.msra.mxu3 %v3328_v54  ;;  %v3865_v17 = vld [vmem:[#allocation61_spill] sm:$0xff] }
 0x3e7   :  { %1695 = vmatpush.msra.mxu0 %v3219_v11  ;;  %1715 = vmatpush.msrb.mxu1 %v3332_v4  ;;  %v3858_v11 = vld [vmem:[#allocation40_spill] sm:$0xff] }
 0x3e8   :  { %1735 = vmatpush.msrb.mxu2 %v3335_v10  ;;  %1755 = vmatpush.msra.mxu3 %v3338_v28  ;;  %v3866_v10 = vld [vmem:[#allocation59_spill] sm:$0xff] }
 0x3e9   :  { %1696 = vmatpush.msra.mxu0 %v3225_v14  ;;  %1716 = vmatpush.msrb.mxu1 %v3342_v30  ;;  %v3859_v14 = vld [vmem:[#allocation43_spill] sm:$0xff] }
 0x3ea   :  { %1736 = vmatpush.msrb.mxu2 %v3810_v39  ;;  %1756 = vmatpush.msra.mxu3 %v3811_v6 }
 0x3eb   :  { %1697 = vmatpush.msra.mxu0 %v3840_v5  ;;  %1717 = vmatpush.msrb.mxu1 %v3841_v13 }
 0x3ec   :  { %1737 = vmatpush.msrb.mxu2 %v3842_v2  ;;  %1757 = vmatpush.msra.mxu3 %v3843_v1 }
 0x3ed   :  { %1698 = vmatpush.msra.mxu0 %v3844_v32  ;;  %1718 = vmatpush.msrb.mxu1 %v3845_v58 }
 0x3ee   :  { %1738 = vmatpush.msrb.mxu2 %v3846_v21  ;;  %1758 = vmatpush.msra.mxu3 %v3847_v45 }
 0x3ef   :  { %1699 = vmatpush.msra.mxu0 %v3848_v59  ;;  %1719 = vmatpush.msrb.mxu1 %v3849_v62 }
 0x3f0   :  { %1739 = vmatpush.msrb.mxu2 %v3850_v31  ;;  %1759 = vmatpush.msra.mxu3 %v3851_v44 }
 0x3f1   :  { %1700 = vmatpush.msra.mxu0 %v3852_v0  ;;  %1720 = vmatpush.msrb.mxu1 %v3853_v15 }
 0x3f2   :  { %1740 = vmatpush.msrb.mxu2 %v3854_v23  ;;  %1760 = vmatpush.msra.mxu3 %v3855_v18 }
 0x3f3   :  { %1701 = vmatpush.msra.mxu0 %v3856_v9  ;;  %1721 = vmatpush.msrb.mxu1 %v3857_v12 }
 0x3f4   :  { %1741 = vmatpush.msrb.mxu2 %v3858_v11  ;;  %1761 = vmatpush.msra.mxu3 %v3859_v14  ;;  %v3868_v14 = vld [vmem:[#allocation19_spill] sm:$0xff] }
 0x3f5   :  { %1702 = vmatpush.msra.mxu0 %v3860_v55  ;;  %1722 = vmatpush.msrb.mxu1 %v3861_v60  ;;  %v3869_v60 = vld [vmem:[#allocation63_spill] sm:$0xff] }
 0x3f6   :  { %1742 = vmatpush.msrb.mxu2 %v3862_v47  ;;  %1762 = vmatpush.msra.mxu3 %v3863_v46 }
 0x452   :  { %v1396_v57 = vpop.f32.mrf.mxu0  ;;  %v1416_v7 = vpop.f32.mrf.mxu1 }
 0x453   :  { %v1459_v16 = vadd.f32 %v1396_v57, %v3864_v48  ;;  %v1460_v63 = vadd.f32 %v1416_v7, %v3865_v17  ;;  %v3870_v48 = vld [vmem:[#allocation62_spill] sm:$0xff] }
 0x455   :  { %v2010_v3 = vmul.f32 -1.442695, %v1459_v16  ;;  %v2011_v54 = vmul.f32 -1.442695, %v1460_v63 }
 0x457   :  { %2126 = vpow2.f32 %v2010_v3 }
 0x458   :  { %2128 = vpow2.f32 %v2011_v54 }
 0x459   :  { %v1436_v4 = vpop.f32.mrf.mxu2  ;;  %v1456_v53 = vpop.f32.mrf.mxu3 }
 0x45a   :  { %v1461_v28 = vadd.f32 %v1436_v4, %v3866_v10  ;;  %v1462_v37 = vadd.f32 %v1456_v53, %v3867_v51 }
 0x45c   :  { %v2012_v30 = vmul.f32 -1.442695, %v1461_v28 }
 0x45d   :  { %v2127_v39 = vpop.eup %2126 }
 0x45e   :  { %v2129_v6 = vpop.eup %2128  ;;  %v1472_v34 = vadd.f32 1.0, %v2127_v39  ;;  %2130 = vpow2.f32 %v2012_v30 }
 0x45f   :  { %v1473_v33 = vadd.f32 1.0, %v2129_v6  ;;  %v3871_v6 = vld [vmem:[#allocation67_spill] sm:$0xff] }
 0x460   :  { %2132 = vrcp.f32 %v1472_v34  ;;  %v1486_v36 = vand.u32 2147483648, %v1472_v34  ;;  %v1484_v50 = vand.u32 2147483647, %v1472_v34  ;;  %vm1480_vm4 = vweird.f32 %v1472_v34 }
 0x461   :  { %2134 = vrcp.f32 %v1473_v33  ;;  %v1501_v24 = vand.u32 2147483648, %v1473_v33  ;;  %v1499_v56 = vand.u32 2147483647, %v1473_v33  ;;  %vm1495_vm5 = vweird.f32 %v1473_v33 }
 0x462   :  { %v1487_v35 = vor.u32 1.1754944e-38, %v1486_v36  ;;  %vm1485_vm6 = vcmp.eq.f32.partialorder %v1484_v50, 8.507059e+37 }
 0x463   :  { %v1502_v43 = vor.u32 1.1754944e-38, %v1501_v24  ;;  %vm1500_vm7 = vcmp.eq.f32.partialorder %v1499_v56, 8.507059e+37 }
 0x464   :  { %v2131_v52 = vpop.eup %2130 }
 0x465   :  { %v1474_v42 = vadd.f32 1.0, %v2131_v52 }
 0x466   :  { %v2133_v29 = vpop.eup %2132 }
 0x467   :  { %v2135_v27 = vpop.eup %2134  ;;  %v1476_v22 = vmul.f32 %v2133_v29, %v1472_v34  ;;  %2136 = vrcp.f32 %v1474_v42  ;;  %vm1481_vm2 = vweird.f32 %v2133_v29  ;;  %v1516_v44 = vand.u32 2147483648, %v1474_v42 }
 0x468   :  { %v1491_v20 = vmul.f32 %v2135_v27, %v1473_v33  ;;  %2138 = vtanh.f32 %v1462_v37  ;;  %vm1496_vm3 = vweird.f32 %v2135_v27  ;;  %vm1482_vm0 = vmor %vm1480_vm4, %vm1481_vm2  ;;  %vm1510_vm9 = vweird.f32 %v1474_v42 }
 0x469   :  { %v1477_v8 = vsub.f32 1.0, %v1476_v22  ;;  %vm1497_vm1 = vmor %vm1495_vm5, %vm1496_vm3  ;;  %v1514_v0 = vand.u32 2147483647, %v1474_v42  ;;  %v1517_v23 = vor.u32 1.1754944e-38, %v1516_v44 }
 0x46a   :  { %v1492_v25 = vsub.f32 1.0, %v1491_v20 }
 0x46b   :  { %v1478_v38 = vmul.f32 %v2133_v29, %v1477_v8  ;;  %vm1515_vm11 = vcmp.eq.f32.partialorder %v1514_v0, 8.507059e+37  ;;  %v1848_v0 = vld [vmem:[#allocation11 + $0x70] sm:$0xff] }
 0x46c   :  { %v1493_v19 = vmul.f32 %v2135_v27, %v1492_v25 }
 0x46d   :  { %v2137_v49 = vpop.eup %2136  ;;  %v1479_v40 = vadd.f32 %v2133_v29, %v1478_v38 }
 0x46e   :  { %v1506_v61 = vmul.f32 %v2137_v49, %v1474_v42  ;;  %v1494_v26 = vadd.f32 %v2135_v27, %v1493_v19  ;;  %v2139_v13 = vpop.eup %2138  ;;  %vm1511_vm8 = vweird.f32 %v2137_v49 }
 0x46f   :  { %v1483_v5 = vsel %vm1482_vm0, %v2133_v29, %v1479_v40  ;;  %vm1512_vm10 = vmor %vm1510_vm9, %vm1511_vm8 }
 0x470   :  { %v1507_v2 = vsub.f32 1.0, %v1506_v61  ;;  %v1488_v1 = vsel %vm1485_vm6, %v1487_v35, %v1483_v5  ;;  %v1498_v32 = vsel %vm1497_vm1, %v2135_v27, %v1494_v26 }
 0x471   :  { %v1503_v58 = vsel %vm1500_vm7, %v1502_v43, %v1498_v32  ;;  %v1522_v21 = vmul.f32 %v2139_v13, %v1488_v1 }
 0x472   :  { %v1521_v45 = vmul.f32 %v1503_v58, %v3488_v41  ;;  %v1508_v59 = vmul.f32 %v2137_v49, %v1507_v2 }
 0x474   :  { %v3558_v62 = vadd.f32 %v1522_v21, %v1521_v45  ;;  %v1509_v31 = vadd.f32 %v2137_v49, %v1508_v59 }
 0x476   :  { %2140 = vtanh.f32 %v3558_v62  ;;  %v1513_v15 = vsel %vm1512_vm10, %v2137_v49, %v1509_v31 }
 0x477   :  { %v1518_v9 = vsel %vm1515_vm11, %v1517_v23, %v1513_v15  ;;  %v1847_v15 = vld [vmem:[#allocation11 + $0x68] sm:$0xff]  ;;  %v1846_v23 = vld [vmem:[#allocation11 + $0x60] sm:$0xff] }
 0x47c   :  { %v2141_v18 = vpop.eup %2140 }
 0x47d   :  { %v1525_v12 = vmul.f32 %v2141_v18, %v1518_v9  ;;  %v1845_v18 = vld [vmem:[#allocation11 + $0x58] sm:$0xff]  ;;  %v1844_v9 = vld [vmem:[#allocation11 + $0x50] sm:$0xff] }
 0x47f   :  { %1549 = vmatmul.f32.vlgmr.msrb.gmra.mxu0 %v1525_v12  ;;  %1569 = vmatmul.f32.vlgmr.msra.gmra.mxu1 %v1525_v12 }
 0x480   :  { %1589 = vmatmul.f32.vlgmr.msra.gmra.mxu2 %v1525_v12  ;;  %1609 = vmatmul.f32.vlgmr.msrb.gmra.mxu3 %v1525_v12  ;;  %v1843_v12 = vld [vmem:[#allocation11 + $0x48] sm:$0xff] }
 0x4fc   :  { %v1550_v41 = vpop.f32.mrf.mxu0  ;;  %v1570_v11 = vpop.f32.mrf.mxu1 }
 0x4fd   :  { %v1613_v55 = vadd.f32 %v1550_v41, %v3868_v14  ;;  %v1614_v47 = vadd.f32 %v1570_v11, %v3869_v60  ;;  %v1842_v41 = vld [vmem:[#allocation11 + $0x40] sm:$0xff]  ;;  %v1841_v11 = vld [vmem:[#allocation11 + $0x38] sm:$0xff]  ;;  %v1840_v14 = vld [vmem:[#allocation11 + $0x30] sm:$0xff] }
 0x4ff   :  { %v2013_v46 = vmul.f32 -1.442695, %v1613_v55  ;;  %v2014_v57 = vmul.f32 -1.442695, %v1614_v47  ;;  %v3872_v47 = vld [vmem:[#allocation18_spill] sm:$0xff] }
 0x501   :  { %2142 = vpow2.f32 %v2013_v46 }
 0x502   :  { %2144 = vpow2.f32 %v2014_v57  ;;  %v3873_v57 = vld [vmem:[#allocation66_spill] sm:$0xff] }
 0x503   :  { %v1590_v7 = vpop.f32.mrf.mxu2  ;;  %v1610_v10 = vpop.f32.mrf.mxu3 }
 0x504   :  { %v1615_v16 = vadd.f32 %v1590_v7, %v3870_v48  ;;  %v1616_v34 = vadd.f32 %v1610_v10, %v3871_v6  ;;  %v1839_v48 = vld [vmem:[#allocation11 + $0x28] sm:$0xff] }
 0x505   :  { %v1835_v10 = vld [vmem:[#allocation11 + $0x8] sm:$0xff] }
 0x506   :  { %v2015_v17 = vmul.f32 -1.442695, %v1615_v16 }
 0x507   :  { %v2143_v63 = vpop.eup %2142 }
 0x508   :  { %v2145_v3 = vpop.eup %2144  ;;  %v1626_v54 = vadd.f32 1.0, %v2143_v63  ;;  %2146 = vpow2.f32 %v2015_v17  ;;  %v1838_v63 = vld [vmem:[#allocation11 + $0x20] sm:$0xff] }
 0x509   :  { %v1627_v4 = vadd.f32 1.0, %v2145_v3  ;;  %v1837_v3 = vld [vmem:[#allocation11 + $0x18] sm:$0xff] }
 0x50a   :  { %2148 = vrcp.f32 %v1626_v54  ;;  %v1640_v51 = vand.u32 2147483648, %v1626_v54  ;;  %v1638_v22 = vand.u32 2147483647, %v1626_v54  ;;  %vm1634_vm14 = vweird.f32 %v1626_v54 }
 0x50b   :  { %2150 = vrcp.f32 %v1627_v4  ;;  %v1655_v37 = vand.u32 2147483648, %v1627_v4  ;;  %v1653_v8 = vand.u32 2147483647, %v1627_v4  ;;  %vm1649_vm15 = vweird.f32 %v1627_v4 }
 0x50c   :  { %v1641_v38 = vor.u32 1.1754944e-38, %v1640_v51  ;;  %vm1639_vm4 = vcmp.eq.f32.partialorder %v1638_v22, 8.507059e+37 }
 0x50d   :  { %v1656_v19 = vor.u32 1.1754944e-38, %v1655_v37  ;;  %vm1654_vm5 = vcmp.eq.f32.partialorder %v1653_v8, 8.507059e+37 }
 0x50e   :  { %v2147_v28 = vpop.eup %2146 }
 0x50f   :  { %v1628_v30 = vadd.f32 1.0, %v2147_v28  ;;  %v3874_v28 = vld [vmem:[#allocation65_spill] sm:$0xff] }
 0x510   :  { %v2149_v39 = vpop.eup %2148 }
 0x511   :  { %v2151_v33 = vpop.eup %2150  ;;  %v1630_v53 = vmul.f32 %v2149_v39, %v1626_v54  ;;  %2152 = vrcp.f32 %v1628_v30  ;;  %vm1635_vm12 = vweird.f32 %v2149_v39  ;;  %v1670_v32 = vand.u32 2147483648, %v1628_v30  ;;  %v1836_v54 = vld [vmem:[#allocation11 + $0x10] sm:$0xff] }
 0x512   :  { %v1645_v52 = vmul.f32 %v2151_v33, %v1627_v4  ;;  %2154 = vtanh.f32 %v1616_v34  ;;  %vm1650_vm13 = vweird.f32 %v2151_v33  ;;  %vm1636_vm2 = vmor %vm1634_vm14, %vm1635_vm12  ;;  %vm1664_vm1 = vweird.f32 %v1628_v30 }
 0x513   :  { %v1631_v42 = vsub.f32 1.0, %v1630_v53  ;;  %vm1651_vm3 = vmor %vm1649_vm15, %vm1650_vm13  ;;  %v1668_v58 = vand.u32 2147483647, %v1628_v30  ;;  %v1671_v45 = vor.u32 1.1754944e-38, %v1670_v32 }
 0x514   :  { %v1646_v29 = vsub.f32 1.0, %v1645_v52 }
 0x515   :  { %v1632_v27 = vmul.f32 %v2149_v39, %v1631_v42  ;;  %vm1669_vm7 = vcmp.eq.f32.partialorder %v1668_v58, 8.507059e+37 }
 0x516   :  { %v1647_v20 = vmul.f32 %v2151_v33, %v1646_v29 }
 0x517   :  { %v2153_v25 = vpop.eup %2152  ;;  %v1633_v36 = vadd.f32 %v2149_v39, %v1632_v27  ;;  %v3875_v27 = vld [vmem:[#allocation68_spill] sm:$0xff] }
 0x518   :  { %v1660_v24 = vmul.f32 %v2153_v25, %v1628_v30  ;;  %v1648_v50 = vadd.f32 %v2151_v33, %v1647_v20  ;;  %v2155_v49 = vpop.eup %2154  ;;  %vm1665_vm0 = vweird.f32 %v2153_v25 }
 0x519   :  { %v1637_v56 = vsel %vm1636_vm2, %v2149_v39, %v1633_v36  ;;  %vm1666_vm6 = vmor %vm1664_vm1, %vm1665_vm0  ;;  %v1834_v39 = vld [vmem:[#allocation11] sm:$0xff] }
 0x51a   :  { %v1661_v40 = vsub.f32 1.0, %v1660_v24  ;;  %v1642_v61 = vsel %vm1639_vm4, %v1641_v38, %v1637_v56  ;;  %v1652_v35 = vsel %vm1651_vm3, %v2151_v33, %v1648_v50 }
 0x51b   :  { %v1657_v26 = vsel %vm1654_vm5, %v1656_v19, %v1652_v35  ;;  %v1676_v43 = vmul.f32 %v2155_v49, %v1642_v61 }
 0x51c   :  { %v1675_v5 = vmul.f32 %v1657_v26, %v3558_v62  ;;  %v1662_v13 = vmul.f32 %v2153_v25, %v1661_v40  ;;  %v1849_v62 = vld [vmem:[#allocation11 + $0x78] sm:$0xff] }
 0x51d   :  { %1854 = vmatpush.msrb.mxu0 %v1849_v62 }
 0x51e   :  { %v3566_v2 = vadd.f32 %v1676_v43, %v1675_v5  ;;  %v1663_v1 = vadd.f32 %v2153_v25, %v1662_v13 }
 0x51f   :  { %1855 = vmatpush.msrb.mxu0 %v1848_v0 }
 0x520   :  { %2156 = vtanh.f32 %v3566_v2  ;;  %v1667_v21 = vsel %vm1666_vm6, %v2153_v25, %v1663_v1 }
 0x521   :  { %v1672_v31 = vsel %vm1669_vm7, %v1671_v45, %v1667_v21  ;;  %1856 = vmatpush.msrb.mxu0 %v1847_v15 }
 0x523   :  { %1857 = vmatpush.msrb.mxu0 %v1846_v23 }
 0x525   :  { %1858 = vmatpush.msrb.mxu0 %v1845_v18 }
 0x526   :  { %v2157_v59 = vpop.eup %2156 }
 0x527   :  { %v1679_v44 = vmul.f32 %v2157_v59, %v1672_v31  ;;  %1859 = vmatpush.msrb.mxu0 %v1844_v9 }
 0x529   :  { %1703 = vmatmul.f32.vlgmr.msra.gmra.mxu0 %v1679_v44  ;;  %1723 = vmatmul.f32.vlgmr.msrb.gmra.mxu1 %v1679_v44 }
 0x52a   :  { %1743 = vmatmul.f32.vlgmr.msrb.gmra.mxu2 %v1679_v44  ;;  %1763 = vmatmul.f32.vlgmr.msra.gmra.mxu3 %v1679_v44 }
 0x52b   :  { %1860 = vmatpush.msrb.mxu0 %v1843_v12 }
 0x52d   :  { %1861 = vmatpush.msrb.mxu0 %v1842_v41 }
 0x52f   :  { %1862 = vmatpush.msrb.mxu0 %v1841_v11 }
 0x531   :  { %1863 = vmatpush.msrb.mxu0 %v1840_v14 }
 0x533   :  { %1864 = vmatpush.msrb.mxu0 %v1839_v48 }
 0x535   :  { %1865 = vmatpush.msrb.mxu0 %v1838_v63 }
 0x537   :  { %1866 = vmatpush.msrb.mxu0 %v1837_v3 }
 0x539   :  { %1867 = vmatpush.msrb.mxu0 %v1836_v54 }
 0x53b   :  { %1868 = vmatpush.msrb.mxu0 %v1835_v10 }
 0x53d   :  { %1869 = vmatpush.msrb.mxu0 %v1834_v39 }
 0x5a6   :  { %v1704_v55 = vpop.f32.mrf.mxu0  ;;  %v1724_v60 = vpop.f32.mrf.mxu1 }
 0x5a7   :  { %v1767_v46 = vadd.f32 %v1704_v55, %v3872_v47  ;;  %v1768_v7 = vadd.f32 %v1724_v60, %v3873_v57 }
 0x5a9   :  { %v2016_v16 = vmul.f32 -1.442695, %v1767_v46  ;;  %v2017_v17 = vmul.f32 -1.442695, %v1768_v7 }
 0x5ab   :  { %2158 = vpow2.f32 %v2016_v16 }
 0x5ac   :  { %2160 = vpow2.f32 %v2017_v17 }
 0x5ad   :  { %v1744_v4 = vpop.f32.mrf.mxu2  ;;  %v1764_v42 = vpop.f32.mrf.mxu3 }
 0x5ae   :  { %v1769_v30 = vadd.f32 %v1744_v4, %v3874_v28  ;;  %v1770_v22 = vadd.f32 %v1764_v42, %v3875_v27 }
 0x5b0   :  { %v2018_v6 = vmul.f32 -1.442695, %v1769_v30 }
 0x5b1   :  { %v2159_v34 = vpop.eup %2158 }
 0x5b2   :  { %v2161_v33 = vpop.eup %2160  ;;  %v1780_v53 = vadd.f32 1.0, %v2159_v34  ;;  %2162 = vpow2.f32 %v2018_v6 }
 0x5b3   :  { %v1781_v52 = vadd.f32 1.0, %v2161_v33 }
 0x5b4   :  { %2164 = vrcp.f32 %v1780_v53  ;;  %v1794_v38 = vand.u32 2147483648, %v1780_v53  ;;  %v1792_v56 = vand.u32 2147483647, %v1780_v53  ;;  %vm1788_vm10 = vweird.f32 %v1780_v53 }
 0x5b5   :  { %2166 = vrcp.f32 %v1781_v52  ;;  %v1809_v50 = vand.u32 2147483648, %v1781_v52  ;;  %v1807_v40 = vand.u32 2147483647, %v1781_v52  ;;  %vm1803_vm11 = vweird.f32 %v1781_v52 }
 0x5b6   :  { %v1795_v43 = vor.u32 1.1754944e-38, %v1794_v38  ;;  %vm1793_vm14 = vcmp.eq.f32.partialorder %v1792_v56, 8.507059e+37 }
 0x5b7   :  { %v1810_v13 = vor.u32 1.1754944e-38, %v1809_v50  ;;  %vm1808_vm15 = vcmp.eq.f32.partialorder %v1807_v40, 8.507059e+37 }
 0x5b8   :  { %v2163_v29 = vpop.eup %2162 }
 0x5b9   :  { %v1782_v51 = vadd.f32 1.0, %v2163_v29 }
 0x5ba   :  { %v2165_v37 = vpop.eup %2164 }
 0x5bb   :  { %v2167_v20 = vpop.eup %2166  ;;  %v1784_v8 = vmul.f32 %v2165_v37, %v1780_v53  ;;  %2168 = vrcp.f32 %v1782_v51  ;;  %vm1789_vm8 = vweird.f32 %v2165_v37  ;;  %v1824_v23 = vand.u32 2147483648, %v1782_v51 }
 0x5bc   :  { %v1799_v25 = vmul.f32 %v2167_v20, %v1781_v52  ;;  %2170 = vtanh.f32 %v1770_v22  ;;  %vm1804_vm9 = vweird.f32 %v2167_v20  ;;  %vm1790_vm12 = vmor %vm1788_vm10, %vm1789_vm8  ;;  %vm1818_vm3 = vweird.f32 %v1782_v51 }
 0x5bd   :  { %v1785_v36 = vsub.f32 1.0, %v1784_v8  ;;  %vm1805_vm13 = vmor %vm1803_vm11, %vm1804_vm9  ;;  %v1822_v18 = vand.u32 2147483647, %v1782_v51  ;;  %v1825_v12 = vor.u32 1.1754944e-38, %v1824_v23 }
 0x5be   :  { %v1800_v24 = vsub.f32 1.0, %v1799_v25 }
 0x5bf   :  { %v1786_v19 = vmul.f32 %v2165_v37, %v1785_v36  ;;  %vm1823_vm5 = vcmp.eq.f32.partialorder %v1822_v18, 8.507059e+37 }
 0x5c0   :  { %v1801_v49 = vmul.f32 %v2167_v20, %v1800_v24 }
 0x5c1   :  { %v2169_v61 = vpop.eup %2168  ;;  %v1787_v35 = vadd.f32 %v2165_v37, %v1786_v19 }
 0x5c2   :  { %v1814_v26 = vmul.f32 %v2169_v61, %v1782_v51  ;;  %v1802_v5 = vadd.f32 %v2167_v20, %v1801_v49  ;;  %v2171_v32 = vpop.eup %2170  ;;  %vm1819_vm2 = vweird.f32 %v2169_v61 }
 0x5c3   :  { %v1791_v1 = vsel %vm1790_vm12, %v2165_v37, %v1787_v35  ;;  %vm1820_vm4 = vmor %vm1818_vm3, %vm1819_vm2 }
 0x5c4   :  { %v1815_v58 = vsub.f32 1.0, %v1814_v26  ;;  %v1796_v21 = vsel %vm1793_vm14, %v1795_v43, %v1791_v1  ;;  %v1806_v45 = vsel %vm1805_vm13, %v2167_v20, %v1802_v5 }
 0x5c5   :  { %v1811_v59 = vsel %vm1808_vm15, %v1810_v13, %v1806_v45  ;;  %v1830_v31 = vmul.f32 %v2171_v32, %v1796_v21 }
 0x5c6   :  { %v1829_v44 = vmul.f32 %v1811_v59, %v3566_v2  ;;  %v1816_v62 = vmul.f32 %v2169_v61, %v1815_v58  ;;  %v2045_v2 = vld [vmem:[%s3584_s4] ss:$0 sm:$0xff] }
 0x5c8   :  { %v1831_v0 = vadd.f32 %v1830_v31, %v1829_v44  ;;  %v1817_v15 = vadd.f32 %v2169_v61, %v1816_v62 }
 0x5ca   :  { %2172 = vtanh.f32 %v1831_v0  ;;  %v1821_v9 = vsel %vm1820_vm4, %v2169_v61, %v1817_v15 }
 0x5cb   :  { %v1826_v11 = vsel %vm1823_vm5, %v1825_v12, %v1821_v9 }
 0x5d0   :  { %v2173_v41 = vpop.eup %2172 }
 0x5d1   :  { %v1833_v14 = vmul.f32 %v2173_v41, %v1826_v11 }
 0x5d3   :  { %1870 = vmatmul.f32.vlgmr.msrb.gmra.mxu0 %v1833_v14 }
 0x650   :  { %v1871_v55 = vpop.f32.mrf.mxu0 }
 0x651   :  { %v1872_v60 = vadd.f32 %v2045_v2, %v1871_v55 }
 0x653   :  { %1874 = vst [vmem:[#allocation12] sm:$0xff] %v1872_v60 }
 0x654   :  { %1885 = dma.vmem_to_hbm [thread:$0]  %s1881_s18, 128, %s1883_s21, [#allocation8]  }
 0x655   :  { %2354 = dma.done.wait [#allocation8], 128  }
 0x656   :  { %2355 = vsyncadd [#allocation8], 4294967168 }
 0x657   :  { %1890 = vsyncpa [#allocation7], 1 }
 0x658   :  { %1891 = vsyncpa [#allocation10], 1 }
 0x659   :  { %1892 = vsyncpa [#allocation8], 1 }

</bundles_post_ra>
